<compile_context>
chip_gen: v5e
topology: v5e:2x2
jax: 0.10.0
libtpu: 0.0.40
codegen_flags: <defaults>
</compile_context>

<pallas_src>
import functools
import math

import jax
import jax.numpy as jnp
from jax.experimental import pallas as pl
from jax.experimental.pallas import tpu as pltpu


_NUM_W = 16  # wq,bq,wk,bk,wv,bv,wo,bo,w1,b1,w2,b2,n1w,n1b,n2w,n2b


def _layer_norm(x, w, b, eps=1e-5):
    mean = jnp.mean(x, axis=-1, keepdims=True)
    var = jnp.mean(jnp.square(x - mean), axis=-1, keepdims=True)
    return (x - mean) * jax.lax.rsqrt(var + eps) * w + b


def _encoder_layer(h, wq, bq, wk, bk, wv, bv, wo, bo,
                   w1, b1, w2, b2, n1w, n1b, n2w, n2b,
                   *, nhead, block_batch, seq_len):
    """One post-norm nn.TransformerEncoderLayer (ReLU FFN, eval mode).

    h: (M, D) float32 with M = block_batch * seq_len.  Weights are stored
    transposed for right-multiplication; wq / bq already carry 1/sqrt(hd).
    Dropout is identity (inference).
    """
    Bt, S = block_batch, seq_len
    M, D = h.shape
    hd = D // nhead
    mm = wq.dtype                                     # MXU dtype (bf16)

    hb = h.astype(mm)
    q = (jnp.dot(hb, wq, preferred_element_type=jnp.float32) + bq).reshape(Bt, S, D)
    k = (jnp.dot(hb, wk, preferred_element_type=jnp.float32) + bk).reshape(Bt, S, D)
    v = (jnp.dot(hb, wv, preferred_element_type=jnp.float32) + bv).reshape(Bt, S, D)

    heads = []
    for hh in range(nhead):                           # small static unroll
        lo = hh * hd
        qh = q[:, :, lo:lo + hd]
        kh = k[:, :, lo:lo + hd]
        vh = v[:, :, lo:lo + hd]
        s = jnp.einsum('bqd,bkd->bqk', qh, kh,
                       preferred_element_type=jnp.float32)             # (Bt,S,S)
        s = s - jnp.max(s, axis=-1, keepdims=True)
        p = jnp.exp(s)
        p = p * pl.reciprocal(jnp.sum(p, axis=-1, keepdims=True), approx=True)
        heads.append(jnp.einsum('bqk,bkd->bqd', p, vh,
                                preferred_element_type=jnp.float32))    # (Bt,S,hd)
    # single fused out_proj matmul (K = D) instead of nhead K=hd partial dots
    ctx = jnp.concatenate(heads, axis=-1).reshape(M, D)
    attn = jnp.dot(ctx.astype(mm), wo, preferred_element_type=jnp.float32) + bo

    h = _layer_norm(h + attn, n1w, n1b)               # post-norm residual 1

    ff = jnp.dot(h.astype(mm), w1, preferred_element_type=jnp.float32) + b1
    ff = jnp.maximum(ff, 0.0)                         # ReLU
    ff = jnp.dot(ff.astype(mm), w2, preferred_element_type=jnp.float32) + b2
    return _layer_norm(h + ff, n2w, n2b)              # post-norm residual 2


def _resident_kernel(*refs, nhead, block_batch, seq_len, num_layers):
    """All layers' weights resident in VMEM; grid over batch blocks only."""
    h0_ref = refs[0]
    w_refs = refs[1:1 + _NUM_W]
    o_ref = refs[1 + _NUM_W]

    h = h0_ref[...]                                   # (M, D) float32

    def body(l, h):
        return _encoder_layer(h, *(r[l] for r in w_refs),
                              nhead=nhead, block_batch=block_batch,
                              seq_len=seq_len)

    h = jax.lax.fori_loop(0, num_layers, body, h, unroll=True)
    o_ref[...] = h.astype(o_ref.dtype)


def _streamed_kernel(*refs, nhead, block_batch, seq_len):
    """grid = (batch_blocks, num_layers); per-layer weights streamed."""
    h0_ref = refs[0]
    w_refs = refs[1:1 + _NUM_W]
    o_ref = refs[1 + _NUM_W]
    h_ref = refs[2 + _NUM_W]                          # persistent (M, D) carry

    layer = pl.program_id(1)
    last = pl.num_programs(1) - 1

    @pl.when(layer == 0)
    def _():
        h_ref[...] = h0_ref[...]

    h = _encoder_layer(h_ref[...], *(r[0] for r in w_refs),
                       nhead=nhead, block_batch=block_batch, seq_len=seq_len)

    @pl.when(layer != last)                           # last layer: o_ref store only
    def _():
        h_ref[...] = h

    @pl.when(layer == last)
    def _():
        o_ref[...] = h.astype(o_ref.dtype)


def _choose_block_batch(batch, seq_len, target_rows=512):
    want = max(1, min(batch, max(1, target_rows // max(seq_len, 1))))
    if batch >= 16:
        # keep >= 2 blocks on the parallel axis (v7x has two TensorCores)
        want = min(want, batch // 2)
    divisors = [d for d in range(1, batch + 1) if batch % d == 0]
    # keep the (8,128) sublane rule on the (Bt*S, D) activation blocks
    ok = [d for d in divisors if d == batch or (d * seq_len) % 8 == 0]
    le = [d for d in ok if d <= want]
    return le[-1] if le else min(ok)


def _vmem_capacity_bytes():
    try:
        cap = int(pltpu.get_tpu_info().vmem_capacity_bytes)
        if cap > 0:
            return cap
    except Exception:
        pass
    return 64 * 2 ** 20        # conservative: v7x per-TensorCore VMEM


def inverted_encoder_transformer(x, params, *, num_layers, nhead,
                                 embed_first=True, block_batch=None,
                                 matmul_dtype=jnp.bfloat16):
    B, S, F = x.shape
    D = params['emb_w'].shape[1] if embed_first else F
    DFF = params['w1'].shape[-1]
    L = num_layers
    assert D % nhead == 0
    hd = D // nhead

    # ---- embedding hoisted out of the kernel (plain XLA matmul, f32) --------
    if embed_first:
        h0 = jnp.einsum('bsf,fd->bsd', x, params['emb_w'],
                        preferred_element_type=jnp.float32)
    else:
        h0 = x.astype(jnp.float32)
    h0 = h0.reshape(B * S, D)                         # 2-D activation slab

    # ---- split in_proj into q/k/v; fold 1/sqrt(hd) into q weights/bias ------
    scale = 1.0 / math.sqrt(hd)
    in_w, in_b = params['in_w'], params['in_b']       # (L, D, 3D), (L, 1, 3D)
    cast = lambda a: a.astype(matmul_dtype)
    wq = cast(in_w[:, :, 0:D] * scale)
    wk = cast(in_w[:, :, D:2 * D])
    wv = cast(in_w[:, :, 2 * D:3 * D])
    bq = (in_b[:, :, 0:D] * scale).astype(jnp.float32)
    bk = in_b[:, :, D:2 * D].astype(jnp.float32)
    bv = in_b[:, :, 2 * D:3 * D].astype(jnp.float32)
    wo, bo = cast(params['out_w']), params['out_b'].astype(jnp.float32)
    w1, b1 = cast(params['w1']), params['b1'].astype(jnp.float32)
    w2, b2 = cast(params['w2']), params['b2'].astype(jnp.float32)
    n1w, n1b = params['n1w'].astype(jnp.float32), params['n1b'].astype(jnp.float32)
    n2w, n2b = params['n2w'].astype(jnp.float32), params['n2b'].astype(jnp.float32)
    weights = (wq, bq, wk, bk, wv, bv, wo, bo, w1, b1, w2, b2,
               n1w, n1b, n2w, n2b)

    # ---- tiling ---------------------------------------------------------------
    if block_batch is None:
        block_batch = _choose_block_batch(B, S)
    Bt = block_batch
    assert B % Bt == 0
    n_bblocks = B // Bt
    M = Bt * S

    # ---- VMEM budget / path choice (clamped to physical VMEM) -----------------
    per_layer_w = sum(int(w.size // L) * w.dtype.itemsize for w in weights)
    all_layers_w = sum(int(w.size) * w.dtype.itemsize for w in weights)
    act = M * D * 4
    inter = (6 * M * D + M * DFF + nhead * Bt * S * S) * 4   # q,k,v,ctx,ff,scores,...
    io = 2 * 2 * act                                          # h0 + out, dbl-buffered
    cap = _vmem_capacity_bytes()
    budget = max(min(cap - 8 * 2 ** 20, int(0.85 * cap)), 16 * 2 ** 20)
    resident_need = 2 * all_layers_w + io + inter
    streamed_need = 2 * per_layer_w + io + act + inter
    use_resident = resident_need <= budget
    need = resident_need if use_resident else streamed_need
    vmem_limit = int(min(budget, max(16 * 2 ** 20, int(1.25 * need))))

    out_shape = jax.ShapeDtypeStruct((B * S, D), jnp.float32)

    if use_resident:
        kernel = functools.partial(_resident_kernel, nhead=nhead,
                                   block_batch=Bt, seq_len=S, num_layers=L)
        full_spec = lambda a: pl.BlockSpec(a.shape, lambda b: (0,) * a.ndim)
        in_specs = ([pl.BlockSpec((M, D), lambda b: (b, 0))]
                    + [full_spec(w) for w in weights])
        out = pl.pallas_call(
            kernel,
            out_shape=out_shape,
            grid_spec=pltpu.PrefetchScalarGridSpec(
                num_scalar_prefetch=0,
                grid=(n_bblocks,),
                in_specs=in_specs,
                out_specs=pl.BlockSpec((M, D), lambda b: (b, 0))),
            compiler_params=pltpu.CompilerParams(
                dimension_semantics=("parallel",),
                vmem_limit_bytes=vmem_limit),
        )(h0, *weights)
    else:
        kernel = functools.partial(_streamed_kernel, nhead=nhead,
                                   block_batch=Bt, seq_len=S)

        def lspec(a):
            return pl.BlockSpec((1,) + a.shape[1:],
                                lambda b, l: (l,) + (0,) * (a.ndim - 1))

        in_specs = ([pl.BlockSpec((M, D), lambda b, l: (b, 0))]
                    + [lspec(w) for w in weights])
        out = pl.pallas_call(
            kernel,
            out_shape=out_shape,
            grid_spec=pltpu.PrefetchScalarGridSpec(
                num_scalar_prefetch=0,
                grid=(n_bblocks, L),
                in_specs=in_specs,
                out_specs=pl.BlockSpec((M, D), lambda b, l: (b, 0)),
                scratch_shapes=[pltpu.VMEM((M, D), jnp.float32)]),
            compiler_params=pltpu.CompilerParams(
                dimension_semantics=("parallel", "arbitrary"),
                vmem_limit_bytes=vmem_limit),
        )(h0, *weights)

    return out.reshape(B, S, D)


def init_params(key, *, num_features, latent_dim, num_layers, dim_feedforward):
    F, D, L, DFF = num_features, latent_dim, num_layers, dim_feedforward
    ks = jax.random.split(key, 9)

    def nrm(k, shape, scale=0.05):
        return (scale * jax.random.normal(k, shape)).astype(jnp.float32)

    return {
        # embedding: nn.Linear(F, D, bias=False).weight.T
        'emb_w': nrm(ks[0], (F, D)),
        # per-layer MHA in_proj (3D, D) stored transposed -> (D, 3D)
        'in_w':  nrm(ks[1], (L, D, 3 * D)),
        'in_b':  nrm(ks[2], (L, 1, 3 * D)),
        # MHA out_proj (D, D) stored transposed
        'out_w': nrm(ks[3], (L, D, D)),
        'out_b': nrm(ks[4], (L, 1, D)),
        # FFN: linear1 (DFF, D) -> (D, DFF); linear2 (D, DFF) -> (DFF, D)
        'w1':    nrm(ks[5], (L, D, DFF)),
        'b1':    nrm(ks[6], (L, 1, DFF)),
        'w2':    nrm(ks[7], (L, DFF, D)),
        'b2':    nrm(ks[8], (L, 1, D)),
        # LayerNorm params (PyTorch default init)
        'n1w':   jnp.ones((L, 1, D), jnp.float32),
        'n1b':   jnp.zeros((L, 1, D), jnp.float32),
        'n2w':   jnp.ones((L, 1, D), jnp.float32),
        'n2b':   jnp.zeros((L, 1, D), jnp.float32),
    }


if __name__ == "__main__":
    # Small shapes consistent with the module (latent_dim divisible by nhead).
    B, S = 2, 8
    num_features = 64
    latent_dim = 32
    nhead = 2
    num_layers = 4
    dim_factor_feedforward = 4
    dim_feedforward = dim_factor_feedforward * latent_dim

    key = jax.random.PRNGKey(0)
    kx, kp = jax.random.split(key)
    x = jax.random.normal(kx, (B, S, num_features), dtype=jnp.float32)

    params = init_params(kp,
                         num_features=num_features,
                         latent_dim=latent_dim,
                         num_layers=num_layers,
                         dim_feedforward=dim_feedforward)

    out = inverted_encoder_transformer(x, params,
                                       num_layers=num_layers, nhead=nhead)
    out = jax.block_until_ready(out)
    assert out.shape == (B, S, latent_dim)
    print("KERNEL_OK")
</pallas_src>

<mosaic_0001>
module attributes {stable_mosaic.version = 11 : i64} {
  func.func @_resident_kernel(%arg0: i32, %arg1: memref<16x32xf32, #tpu.memory_space<vmem>>, %arg2: memref<4x32x32xbf16, #tpu.memory_space<vmem>>, %arg3: memref<4x1x32xf32, #tpu.memory_space<vmem>>, %arg4: memref<4x32x32xbf16, #tpu.memory_space<vmem>>, %arg5: memref<4x1x32xf32, #tpu.memory_space<vmem>>, %arg6: memref<4x32x32xbf16, #tpu.memory_space<vmem>>, %arg7: memref<4x1x32xf32, #tpu.memory_space<vmem>>, %arg8: memref<4x32x32xbf16, #tpu.memory_space<vmem>>, %arg9: memref<4x1x32xf32, #tpu.memory_space<vmem>>, %arg10: memref<4x32x128xbf16, #tpu.memory_space<vmem>>, %arg11: memref<4x1x128xf32, #tpu.memory_space<vmem>>, %arg12: memref<4x128x32xbf16, #tpu.memory_space<vmem>>, %arg13: memref<4x1x32xf32, #tpu.memory_space<vmem>>, %arg14: memref<4x1x32xf32, #tpu.memory_space<vmem>>, %arg15: memref<4x1x32xf32, #tpu.memory_space<vmem>>, %arg16: memref<4x1x32xf32, #tpu.memory_space<vmem>>, %arg17: memref<4x1x32xf32, #tpu.memory_space<vmem>>, %arg18: memref<16x32xf32, #tpu.memory_space<vmem>>) attributes {dimension_semantics = [#tpu.dimension_semantics<parallel>], iteration_bounds = array<i64: 1>, scalar_prefetch = 0 : i64, scratch_operands = 0 : i64, tpu.core_type = #tpu.core_type<tc>, window_params = [{transform_indices = @transform_0, window_bounds = array<i64: 16, 32>}, {pipeline_mode = #tpu.pipeline_mode<synchronous>, transform_indices = @transform_1, window_bounds = array<i64: 4, 32, 32>}, {pipeline_mode = #tpu.pipeline_mode<synchronous>, transform_indices = @transform_2, window_bounds = array<i64: 4, 1, 32>}, {pipeline_mode = #tpu.pipeline_mode<synchronous>, transform_indices = @transform_3, window_bounds = array<i64: 4, 32, 32>}, {pipeline_mode = #tpu.pipeline_mode<synchronous>, transform_indices = @transform_4, window_bounds = array<i64: 4, 1, 32>}, {pipeline_mode = #tpu.pipeline_mode<synchronous>, transform_indices = @transform_5, window_bounds = array<i64: 4, 32, 32>}, {pipeline_mode = #tpu.pipeline_mode<synchronous>, transform_indices = @transform_6, window_bounds = array<i64: 4, 1, 32>}, {pipeline_mode = #tpu.pipeline_mode<synchronous>, transform_indices = @transform_7, window_bounds = array<i64: 4, 32, 32>}, {pipeline_mode = #tpu.pipeline_mode<synchronous>, transform_indices = @transform_8, window_bounds = array<i64: 4, 1, 32>}, {pipeline_mode = #tpu.pipeline_mode<synchronous>, transform_indices = @transform_9, window_bounds = array<i64: 4, 32, 128>}, {pipeline_mode = #tpu.pipeline_mode<synchronous>, transform_indices = @transform_10, window_bounds = array<i64: 4, 1, 128>}, {pipeline_mode = #tpu.pipeline_mode<synchronous>, transform_indices = @transform_11, window_bounds = array<i64: 4, 128, 32>}, {pipeline_mode = #tpu.pipeline_mode<synchronous>, transform_indices = @transform_12, window_bounds = array<i64: 4, 1, 32>}, {pipeline_mode = #tpu.pipeline_mode<synchronous>, transform_indices = @transform_13, window_bounds = array<i64: 4, 1, 32>}, {pipeline_mode = #tpu.pipeline_mode<synchronous>, transform_indices = @transform_14, window_bounds = array<i64: 4, 1, 32>}, {pipeline_mode = #tpu.pipeline_mode<synchronous>, transform_indices = @transform_15, window_bounds = array<i64: 4, 1, 32>}, {pipeline_mode = #tpu.pipeline_mode<synchronous>, transform_indices = @transform_16, window_bounds = array<i64: 4, 1, 32>}, {transform_indices = @transform_17, window_bounds = array<i64: 16, 32>}]} {
    %c0 = arith.constant 0 : index
    %c0_0 = arith.constant 0 : index
    %0 = vector.load %arg1[%c0, %c0_0] : memref<16x32xf32, #tpu.memory_space<vmem>>, vector<16x32xf32>
    %c0_i32 = arith.constant 0 : i32
    %1 = arith.index_cast %c0_i32 : i32 to index
    %c0_1 = arith.constant 0 : index
    %c0_2 = arith.constant 0 : index
    %2 = vector.load %arg2[%1, %c0_1, %c0_2] : memref<4x32x32xbf16, #tpu.memory_space<vmem>>, vector<1x32x32xbf16>
    %3 = vector.shape_cast %2 : vector<1x32x32xbf16> to vector<32x32xbf16>
    %4 = arith.index_cast %c0_i32 : i32 to index
    %c0_3 = arith.constant 0 : index
    %c0_4 = arith.constant 0 : index
    %5 = vector.load %arg3[%4, %c0_3, %c0_4] : memref<4x1x32xf32, #tpu.memory_space<vmem>>, vector<1x1x32xf32>
    %6 = vector.shape_cast %5 : vector<1x1x32xf32> to vector<1x32xf32>
    %7 = arith.index_cast %c0_i32 : i32 to index
    %c0_5 = arith.constant 0 : index
    %c0_6 = arith.constant 0 : index
    %8 = vector.load %arg4[%7, %c0_5, %c0_6] : memref<4x32x32xbf16, #tpu.memory_space<vmem>>, vector<1x32x32xbf16>
    %9 = vector.shape_cast %8 : vector<1x32x32xbf16> to vector<32x32xbf16>
    %10 = arith.index_cast %c0_i32 : i32 to index
    %c0_7 = arith.constant 0 : index
    %c0_8 = arith.constant 0 : index
    %11 = vector.load %arg5[%10, %c0_7, %c0_8] : memref<4x1x32xf32, #tpu.memory_space<vmem>>, vector<1x1x32xf32>
    %12 = vector.shape_cast %11 : vector<1x1x32xf32> to vector<1x32xf32>
    %13 = arith.index_cast %c0_i32 : i32 to index
    %c0_9 = arith.constant 0 : index
    %c0_10 = arith.constant 0 : index
    %14 = vector.load %arg6[%13, %c0_9, %c0_10] : memref<4x32x32xbf16, #tpu.memory_space<vmem>>, vector<1x32x32xbf16>
    %15 = vector.shape_cast %14 : vector<1x32x32xbf16> to vector<32x32xbf16>
    %16 = arith.index_cast %c0_i32 : i32 to index
    %c0_11 = arith.constant 0 : index
    %c0_12 = arith.constant 0 : index
    %17 = vector.load %arg7[%16, %c0_11, %c0_12] : memref<4x1x32xf32, #tpu.memory_space<vmem>>, vector<1x1x32xf32>
    %18 = vector.shape_cast %17 : vector<1x1x32xf32> to vector<1x32xf32>
    %19 = arith.index_cast %c0_i32 : i32 to index
    %c0_13 = arith.constant 0 : index
    %c0_14 = arith.constant 0 : index
    %20 = vector.load %arg8[%19, %c0_13, %c0_14] : memref<4x32x32xbf16, #tpu.memory_space<vmem>>, vector<1x32x32xbf16>
    %21 = vector.shape_cast %20 : vector<1x32x32xbf16> to vector<32x32xbf16>
    %22 = arith.index_cast %c0_i32 : i32 to index
    %c0_15 = arith.constant 0 : index
    %c0_16 = arith.constant 0 : index
    %23 = vector.load %arg9[%22, %c0_15, %c0_16] : memref<4x1x32xf32, #tpu.memory_space<vmem>>, vector<1x1x32xf32>
    %24 = vector.shape_cast %23 : vector<1x1x32xf32> to vector<1x32xf32>
    %25 = arith.index_cast %c0_i32 : i32 to index
    %c0_17 = arith.constant 0 : index
    %c0_18 = arith.constant 0 : index
    %26 = vector.load %arg10[%25, %c0_17, %c0_18] : memref<4x32x128xbf16, #tpu.memory_space<vmem>>, vector<1x32x128xbf16>
    %27 = vector.shape_cast %26 : vector<1x32x128xbf16> to vector<32x128xbf16>
    %28 = arith.index_cast %c0_i32 : i32 to index
    %c0_19 = arith.constant 0 : index
    %c0_20 = arith.constant 0 : index
    %29 = vector.load %arg11[%28, %c0_19, %c0_20] : memref<4x1x128xf32, #tpu.memory_space<vmem>>, vector<1x1x128xf32>
    %30 = vector.shape_cast %29 : vector<1x1x128xf32> to vector<1x128xf32>
    %31 = arith.index_cast %c0_i32 : i32 to index
    %c0_21 = arith.constant 0 : index
    %c0_22 = arith.constant 0 : index
    %32 = vector.load %arg12[%31, %c0_21, %c0_22] : memref<4x128x32xbf16, #tpu.memory_space<vmem>>, vector<1x128x32xbf16>
    %33 = vector.shape_cast %32 : vector<1x128x32xbf16> to vector<128x32xbf16>
    %34 = arith.index_cast %c0_i32 : i32 to index
    %c0_23 = arith.constant 0 : index
    %c0_24 = arith.constant 0 : index
    %35 = vector.load %arg13[%34, %c0_23, %c0_24] : memref<4x1x32xf32, #tpu.memory_space<vmem>>, vector<1x1x32xf32>
    %36 = vector.shape_cast %35 : vector<1x1x32xf32> to vector<1x32xf32>
    %37 = arith.index_cast %c0_i32 : i32 to index
    %c0_25 = arith.constant 0 : index
    %c0_26 = arith.constant 0 : index
    %38 = vector.load %arg14[%37, %c0_25, %c0_26] : memref<4x1x32xf32, #tpu.memory_space<vmem>>, vector<1x1x32xf32>
    %39 = vector.shape_cast %38 : vector<1x1x32xf32> to vector<1x32xf32>
    %40 = arith.index_cast %c0_i32 : i32 to index
    %c0_27 = arith.constant 0 : index
    %c0_28 = arith.constant 0 : index
    %41 = vector.load %arg15[%40, %c0_27, %c0_28] : memref<4x1x32xf32, #tpu.memory_space<vmem>>, vector<1x1x32xf32>
    %42 = vector.shape_cast %41 : vector<1x1x32xf32> to vector<1x32xf32>
    %43 = arith.index_cast %c0_i32 : i32 to index
    %c0_29 = arith.constant 0 : index
    %c0_30 = arith.constant 0 : index
    %44 = vector.load %arg16[%43, %c0_29, %c0_30] : memref<4x1x32xf32, #tpu.memory_space<vmem>>, vector<1x1x32xf32>
    %45 = vector.shape_cast %44 : vector<1x1x32xf32> to vector<1x32xf32>
    %46 = arith.index_cast %c0_i32 : i32 to index
    %c0_31 = arith.constant 0 : index
    %c0_32 = arith.constant 0 : index
    %47 = vector.load %arg17[%46, %c0_31, %c0_32] : memref<4x1x32xf32, #tpu.memory_space<vmem>>, vector<1x1x32xf32>
    %48 = vector.shape_cast %47 : vector<1x1x32xf32> to vector<1x32xf32>
    %49 = arith.truncf %0 : vector<16x32xf32> to vector<16x32xbf16>
    %cst = arith.constant dense<0.000000e+00> : vector<16x32xf32>
    %50 = tpu.matmul %49, %3, %cst {dimension_numbers = #tpu.dot_dimension_numbers<[1], [0], [0], [1], [0, 0, 1, 1], [], []>} : vector<16x32xbf16>, vector<32x32xbf16>, vector<16x32xf32> -> vector<16x32xf32>
    %51 = vector.broadcast %6 : vector<1x32xf32> to vector<16x32xf32>
    %52 = arith.addf %50, %51 : vector<16x32xf32>
    %53 = vector.shape_cast %52 : vector<16x32xf32> to vector<2x8x32xf32>
    %cst_33 = arith.constant dense<0.000000e+00> : vector<16x32xf32>
    %54 = tpu.matmul %49, %9, %cst_33 {dimension_numbers = #tpu.dot_dimension_numbers<[1], [0], [0], [1], [0, 0, 1, 1], [], []>} : vector<16x32xbf16>, vector<32x32xbf16>, vector<16x32xf32> -> vector<16x32xf32>
    %55 = vector.broadcast %12 : vector<1x32xf32> to vector<16x32xf32>
    %56 = arith.addf %54, %55 : vector<16x32xf32>
    %57 = vector.shape_cast %56 : vector<16x32xf32> to vector<2x8x32xf32>
    %cst_34 = arith.constant dense<0.000000e+00> : vector<16x32xf32>
    %58 = tpu.matmul %49, %15, %cst_34 {dimension_numbers = #tpu.dot_dimension_numbers<[1], [0], [0], [1], [0, 0, 1, 1], [], []>} : vector<16x32xbf16>, vector<32x32xbf16>, vector<16x32xf32> -> vector<16x32xf32>
    %59 = vector.broadcast %18 : vector<1x32xf32> to vector<16x32xf32>
    %60 = arith.addf %58, %59 : vector<16x32xf32>
    %61 = vector.shape_cast %60 : vector<16x32xf32> to vector<2x8x32xf32>
    %62 = vector.extract_strided_slice %53 {offsets = [0, 0, 0], sizes = [2, 8, 16], strides = [1, 1, 1]} : vector<2x8x32xf32> to vector<2x8x16xf32>
    %63 = vector.extract_strided_slice %57 {offsets = [0, 0, 0], sizes = [2, 8, 16], strides = [1, 1, 1]} : vector<2x8x32xf32> to vector<2x8x16xf32>
    %64 = vector.extract_strided_slice %61 {offsets = [0, 0, 0], sizes = [2, 8, 16], strides = [1, 1, 1]} : vector<2x8x32xf32> to vector<2x8x16xf32>
    "tpu.trace_start"() <{level = 10 : i32, message = "bqd,bkd->bqk"}> : () -> ()
    %cst_35 = arith.constant dense<0.000000e+00> : vector<2x8x8xf32>
    %65 = tpu.matmul %62, %63, %cst_35 {dimension_numbers = #tpu.dot_dimension_numbers<[2], [2], [1], [1], [0, 0, 0, 1, 1, 1], [0], [0]>} : vector<2x8x16xf32>, vector<2x8x16xf32>, vector<2x8x8xf32> -> vector<2x8x8xf32>
    "tpu.trace_stop"() : () -> ()
    %cst_36 = arith.constant dense<0xFF800000> : vector<2x8xf32>
    %66 = vector.multi_reduction <maximumf>, %65, %cst_36 [2] : vector<2x8x8xf32> to vector<2x8xf32>
    %67 = vector.shape_cast %66 : vector<2x8xf32> to vector<2x8x1xf32>
    %68 = vector.broadcast %67 : vector<2x8x1xf32> to vector<2x8x8xf32>
    %69 = arith.subf %65, %68 : vector<2x8x8xf32>
    %70 = math.exp %69 : vector<2x8x8xf32>
    %cst_37 = arith.constant dense<0.000000e+00> : vector<2x8xf32>
    %71 = vector.multi_reduction <add>, %70, %cst_37 [2] : vector<2x8x8xf32> to vector<2x8xf32>
    %72 = vector.shape_cast %71 : vector<2x8xf32> to vector<2x8x1xf32>
    %73 = tpu.reciprocal %72 {approx = true} : vector<2x8x1xf32> -> vector<2x8x1xf32>
    %74 = vector.broadcast %73 : vector<2x8x1xf32> to vector<2x8x8xf32>
    %75 = arith.mulf %70, %74 : vector<2x8x8xf32>
    "tpu.trace_start"() <{level = 10 : i32, message = "bqk,bkd->bqd"}> : () -> ()
    %cst_38 = arith.constant dense<0.000000e+00> : vector<2x8x16xf32>
    %76 = tpu.matmul %75, %64, %cst_38 {dimension_numbers = #tpu.dot_dimension_numbers<[2], [1], [1], [2], [0, 0, 0, 1, 1, 2], [0], [0]>} : vector<2x8x8xf32>, vector<2x8x16xf32>, vector<2x8x16xf32> -> vector<2x8x16xf32>
    "tpu.trace_stop"() : () -> ()
    %77 = vector.extract_strided_slice %53 {offsets = [0, 0, 16], sizes = [2, 8, 16], strides = [1, 1, 1]} : vector<2x8x32xf32> to vector<2x8x16xf32>
    %78 = vector.extract_strided_slice %57 {offsets = [0, 0, 16], sizes = [2, 8, 16], strides = [1, 1, 1]} : vector<2x8x32xf32> to vector<2x8x16xf32>
    %79 = vector.extract_strided_slice %61 {offsets = [0, 0, 16], sizes = [2, 8, 16], strides = [1, 1, 1]} : vector<2x8x32xf32> to vector<2x8x16xf32>
    "tpu.trace_start"() <{level = 10 : i32, message = "bqd,bkd->bqk"}> : () -> ()
    %cst_39 = arith.constant dense<0.000000e+00> : vector<2x8x8xf32>
    %80 = tpu.matmul %77, %78, %cst_39 {dimension_numbers = #tpu.dot_dimension_numbers<[2], [2], [1], [1], [0, 0, 0, 1, 1, 1], [0], [0]>} : vector<2x8x16xf32>, vector<2x8x16xf32>, vector<2x8x8xf32> -> vector<2x8x8xf32>
    "tpu.trace_stop"() : () -> ()
    %cst_40 = arith.constant dense<0xFF800000> : vector<2x8xf32>
    %81 = vector.multi_reduction <maximumf>, %80, %cst_40 [2] : vector<2x8x8xf32> to vector<2x8xf32>
    %82 = vector.shape_cast %81 : vector<2x8xf32> to vector<2x8x1xf32>
    %83 = vector.broadcast %82 : vector<2x8x1xf32> to vector<2x8x8xf32>
    %84 = arith.subf %80, %83 : vector<2x8x8xf32>
    %85 = math.exp %84 : vector<2x8x8xf32>
    %cst_41 = arith.constant dense<0.000000e+00> : vector<2x8xf32>
    %86 = vector.multi_reduction <add>, %85, %cst_41 [2] : vector<2x8x8xf32> to vector<2x8xf32>
    %87 = vector.shape_cast %86 : vector<2x8xf32> to vector<2x8x1xf32>
    %88 = tpu.reciprocal %87 {approx = true} : vector<2x8x1xf32> -> vector<2x8x1xf32>
    %89 = vector.broadcast %88 : vector<2x8x1xf32> to vector<2x8x8xf32>
    %90 = arith.mulf %85, %89 : vector<2x8x8xf32>
    "tpu.trace_start"() <{level = 10 : i32, message = "bqk,bkd->bqd"}> : () -> ()
    %cst_42 = arith.constant dense<0.000000e+00> : vector<2x8x16xf32>
    %91 = tpu.matmul %90, %79, %cst_42 {dimension_numbers = #tpu.dot_dimension_numbers<[2], [1], [1], [2], [0, 0, 0, 1, 1, 2], [0], [0]>} : vector<2x8x8xf32>, vector<2x8x16xf32>, vector<2x8x16xf32> -> vector<2x8x16xf32>
    "tpu.trace_stop"() : () -> ()
    %92 = tpu.concatenate %76, %91 in 2 : vector<2x8x16xf32>, vector<2x8x16xf32> -> vector<2x8x32xf32>
    %93 = vector.shape_cast %92 : vector<2x8x32xf32> to vector<16x32xf32>
    %94 = arith.truncf %93 : vector<16x32xf32> to vector<16x32xbf16>
    %cst_43 = arith.constant dense<0.000000e+00> : vector<16x32xf32>
    %95 = tpu.matmul %94, %21, %cst_43 {dimension_numbers = #tpu.dot_dimension_numbers<[1], [0], [0], [1], [0, 0, 1, 1], [], []>} : vector<16x32xbf16>, vector<32x32xbf16>, vector<16x32xf32> -> vector<16x32xf32>
    %96 = vector.broadcast %24 : vector<1x32xf32> to vector<16x32xf32>
    %97 = arith.addf %95, %96 : vector<16x32xf32>
    %98 = arith.addf %0, %97 : vector<16x32xf32>
    %cst_44 = arith.constant dense<0.000000e+00> : vector<16xf32>
    %99 = vector.multi_reduction <add>, %98, %cst_44 [1] : vector<16x32xf32> to vector<16xf32>
    %100 = vector.shape_cast %99 : vector<16xf32> to vector<16x1xf32>
    %cst_45 = arith.constant 3.200000e+01 : f32
    %101 = vector.broadcast %cst_45 : f32 to vector<16x1xf32>
    %102 = arith.divf %100, %101 : vector<16x1xf32>
    %103 = vector.broadcast %102 : vector<16x1xf32> to vector<16x32xf32>
    %104 = arith.subf %98, %103 : vector<16x32xf32>
    %105 = arith.mulf %104, %104 : vector<16x32xf32>
    %cst_46 = arith.constant dense<0.000000e+00> : vector<16xf32>
    %106 = vector.multi_reduction <add>, %105, %cst_46 [1] : vector<16x32xf32> to vector<16xf32>
    %107 = vector.shape_cast %106 : vector<16xf32> to vector<16x1xf32>
    %cst_47 = arith.constant 3.200000e+01 : f32
    %108 = vector.broadcast %cst_47 : f32 to vector<16x1xf32>
    %109 = arith.divf %107, %108 : vector<16x1xf32>
    %110 = vector.broadcast %102 : vector<16x1xf32> to vector<16x32xf32>
    %111 = arith.subf %98, %110 : vector<16x32xf32>
    %cst_48 = arith.constant 9.99999974E-6 : f32
    %112 = vector.broadcast %cst_48 : f32 to vector<16x1xf32>
    %113 = arith.addf %109, %112 : vector<16x1xf32>
    %114 = math.rsqrt %113 : vector<16x1xf32>
    %115 = vector.broadcast %114 : vector<16x1xf32> to vector<16x32xf32>
    %116 = arith.mulf %111, %115 : vector<16x32xf32>
    %117 = vector.broadcast %39 : vector<1x32xf32> to vector<16x32xf32>
    %118 = arith.mulf %116, %117 : vector<16x32xf32>
    %119 = vector.broadcast %42 : vector<1x32xf32> to vector<16x32xf32>
    %120 = arith.addf %118, %119 : vector<16x32xf32>
    %121 = arith.truncf %120 : vector<16x32xf32> to vector<16x32xbf16>
    %cst_49 = arith.constant dense<0.000000e+00> : vector<16x128xf32>
    %122 = tpu.matmul %121, %27, %cst_49 {dimension_numbers = #tpu.dot_dimension_numbers<[1], [0], [0], [1], [0, 0, 1, 1], [], []>} : vector<16x32xbf16>, vector<32x128xbf16>, vector<16x128xf32> -> vector<16x128xf32>
    %123 = vector.broadcast %30 : vector<1x128xf32> to vector<16x128xf32>
    %124 = arith.addf %122, %123 : vector<16x128xf32>
    %cst_50 = arith.constant 0.000000e+00 : f32
    %125 = vector.broadcast %cst_50 : f32 to vector<16x128xf32>
    %126 = arith.maximumf %124, %125 : vector<16x128xf32>
    %127 = arith.truncf %126 : vector<16x128xf32> to vector<16x128xbf16>
    %cst_51 = arith.constant dense<0.000000e+00> : vector<16x32xf32>
    %128 = tpu.matmul %127, %33, %cst_51 {dimension_numbers = #tpu.dot_dimension_numbers<[1], [0], [0], [1], [0, 0, 1, 1], [], []>} : vector<16x128xbf16>, vector<128x32xbf16>, vector<16x32xf32> -> vector<16x32xf32>
    %129 = vector.broadcast %36 : vector<1x32xf32> to vector<16x32xf32>
    %130 = arith.addf %128, %129 : vector<16x32xf32>
    %131 = arith.addf %120, %130 : vector<16x32xf32>
    %cst_52 = arith.constant dense<0.000000e+00> : vector<16xf32>
    %132 = vector.multi_reduction <add>, %131, %cst_52 [1] : vector<16x32xf32> to vector<16xf32>
    %133 = vector.shape_cast %132 : vector<16xf32> to vector<16x1xf32>
    %cst_53 = arith.constant 3.200000e+01 : f32
    %134 = vector.broadcast %cst_53 : f32 to vector<16x1xf32>
    %135 = arith.divf %133, %134 : vector<16x1xf32>
    %136 = vector.broadcast %135 : vector<16x1xf32> to vector<16x32xf32>
    %137 = arith.subf %131, %136 : vector<16x32xf32>
    %138 = arith.mulf %137, %137 : vector<16x32xf32>
    %cst_54 = arith.constant dense<0.000000e+00> : vector<16xf32>
    %139 = vector.multi_reduction <add>, %138, %cst_54 [1] : vector<16x32xf32> to vector<16xf32>
    %140 = vector.shape_cast %139 : vector<16xf32> to vector<16x1xf32>
    %cst_55 = arith.constant 3.200000e+01 : f32
    %141 = vector.broadcast %cst_55 : f32 to vector<16x1xf32>
    %142 = arith.divf %140, %141 : vector<16x1xf32>
    %143 = vector.broadcast %135 : vector<16x1xf32> to vector<16x32xf32>
    %144 = arith.subf %131, %143 : vector<16x32xf32>
    %cst_56 = arith.constant 9.99999974E-6 : f32
    %145 = vector.broadcast %cst_56 : f32 to vector<16x1xf32>
    %146 = arith.addf %142, %145 : vector<16x1xf32>
    %147 = math.rsqrt %146 : vector<16x1xf32>
    %148 = vector.broadcast %147 : vector<16x1xf32> to vector<16x32xf32>
    %149 = arith.mulf %144, %148 : vector<16x32xf32>
    %150 = vector.broadcast %45 : vector<1x32xf32> to vector<16x32xf32>
    %151 = arith.mulf %149, %150 : vector<16x32xf32>
    %152 = vector.broadcast %48 : vector<1x32xf32> to vector<16x32xf32>
    %153 = arith.addf %151, %152 : vector<16x32xf32>
    %c1_i32 = arith.constant 1 : i32
    %154 = arith.index_cast %c1_i32 : i32 to index
    %c0_57 = arith.constant 0 : index
    %c0_58 = arith.constant 0 : index
    %155 = vector.load %arg2[%154, %c0_57, %c0_58] : memref<4x32x32xbf16, #tpu.memory_space<vmem>>, vector<1x32x32xbf16>
    %156 = vector.shape_cast %155 : vector<1x32x32xbf16> to vector<32x32xbf16>
    %157 = arith.index_cast %c1_i32 : i32 to index
    %c0_59 = arith.constant 0 : index
    %c0_60 = arith.constant 0 : index
    %158 = vector.load %arg3[%157, %c0_59, %c0_60] : memref<4x1x32xf32, #tpu.memory_space<vmem>>, vector<1x1x32xf32>
    %159 = vector.shape_cast %158 : vector<1x1x32xf32> to vector<1x32xf32>
    %160 = arith.index_cast %c1_i32 : i32 to index
    %c0_61 = arith.constant 0 : index
    %c0_62 = arith.constant 0 : index
    %161 = vector.load %arg4[%160, %c0_61, %c0_62] : memref<4x32x32xbf16, #tpu.memory_space<vmem>>, vector<1x32x32xbf16>
    %162 = vector.shape_cast %161 : vector<1x32x32xbf16> to vector<32x32xbf16>
    %163 = arith.index_cast %c1_i32 : i32 to index
    %c0_63 = arith.constant 0 : index
    %c0_64 = arith.constant 0 : index
    %164 = vector.load %arg5[%163, %c0_63, %c0_64] : memref<4x1x32xf32, #tpu.memory_space<vmem>>, vector<1x1x32xf32>
    %165 = vector.shape_cast %164 : vector<1x1x32xf32> to vector<1x32xf32>
    %166 = arith.index_cast %c1_i32 : i32 to index
    %c0_65 = arith.constant 0 : index
    %c0_66 = arith.constant 0 : index
    %167 = vector.load %arg6[%166, %c0_65, %c0_66] : memref<4x32x32xbf16, #tpu.memory_space<vmem>>, vector<1x32x32xbf16>
    %168 = vector.shape_cast %167 : vector<1x32x32xbf16> to vector<32x32xbf16>
    %169 = arith.index_cast %c1_i32 : i32 to index
    %c0_67 = arith.constant 0 : index
    %c0_68 = arith.constant 0 : index
    %170 = vector.load %arg7[%169, %c0_67, %c0_68] : memref<4x1x32xf32, #tpu.memory_space<vmem>>, vector<1x1x32xf32>
    %171 = vector.shape_cast %170 : vector<1x1x32xf32> to vector<1x32xf32>
    %172 = arith.index_cast %c1_i32 : i32 to index
    %c0_69 = arith.constant 0 : index
    %c0_70 = arith.constant 0 : index
    %173 = vector.load %arg8[%172, %c0_69, %c0_70] : memref<4x32x32xbf16, #tpu.memory_space<vmem>>, vector<1x32x32xbf16>
    %174 = vector.shape_cast %173 : vector<1x32x32xbf16> to vector<32x32xbf16>
    %175 = arith.index_cast %c1_i32 : i32 to index
    %c0_71 = arith.constant 0 : index
    %c0_72 = arith.constant 0 : index
    %176 = vector.load %arg9[%175, %c0_71, %c0_72] : memref<4x1x32xf32, #tpu.memory_space<vmem>>, vector<1x1x32xf32>
    %177 = vector.shape_cast %176 : vector<1x1x32xf32> to vector<1x32xf32>
    %178 = arith.index_cast %c1_i32 : i32 to index
    %c0_73 = arith.constant 0 : index
    %c0_74 = arith.constant 0 : index
    %179 = vector.load %arg10[%178, %c0_73, %c0_74] : memref<4x32x128xbf16, #tpu.memory_space<vmem>>, vector<1x32x128xbf16>
    %180 = vector.shape_cast %179 : vector<1x32x128xbf16> to vector<32x128xbf16>
    %181 = arith.index_cast %c1_i32 : i32 to index
    %c0_75 = arith.constant 0 : index
    %c0_76 = arith.constant 0 : index
    %182 = vector.load %arg11[%181, %c0_75, %c0_76] : memref<4x1x128xf32, #tpu.memory_space<vmem>>, vector<1x1x128xf32>
    %183 = vector.shape_cast %182 : vector<1x1x128xf32> to vector<1x128xf32>
    %184 = arith.index_cast %c1_i32 : i32 to index
    %c0_77 = arith.constant 0 : index
    %c0_78 = arith.constant 0 : index
    %185 = vector.load %arg12[%184, %c0_77, %c0_78] : memref<4x128x32xbf16, #tpu.memory_space<vmem>>, vector<1x128x32xbf16>
    %186 = vector.shape_cast %185 : vector<1x128x32xbf16> to vector<128x32xbf16>
    %187 = arith.index_cast %c1_i32 : i32 to index
    %c0_79 = arith.constant 0 : index
    %c0_80 = arith.constant 0 : index
    %188 = vector.load %arg13[%187, %c0_79, %c0_80] : memref<4x1x32xf32, #tpu.memory_space<vmem>>, vector<1x1x32xf32>
    %189 = vector.shape_cast %188 : vector<1x1x32xf32> to vector<1x32xf32>
    %190 = arith.index_cast %c1_i32 : i32 to index
    %c0_81 = arith.constant 0 : index
    %c0_82 = arith.constant 0 : index
    %191 = vector.load %arg14[%190, %c0_81, %c0_82] : memref<4x1x32xf32, #tpu.memory_space<vmem>>, vector<1x1x32xf32>
    %192 = vector.shape_cast %191 : vector<1x1x32xf32> to vector<1x32xf32>
    %193 = arith.index_cast %c1_i32 : i32 to index
    %c0_83 = arith.constant 0 : index
    %c0_84 = arith.constant 0 : index
    %194 = vector.load %arg15[%193, %c0_83, %c0_84] : memref<4x1x32xf32, #tpu.memory_space<vmem>>, vector<1x1x32xf32>
    %195 = vector.shape_cast %194 : vector<1x1x32xf32> to vector<1x32xf32>
    %196 = arith.index_cast %c1_i32 : i32 to index
    %c0_85 = arith.constant 0 : index
    %c0_86 = arith.constant 0 : index
    %197 = vector.load %arg16[%196, %c0_85, %c0_86] : memref<4x1x32xf32, #tpu.memory_space<vmem>>, vector<1x1x32xf32>
    %198 = vector.shape_cast %197 : vector<1x1x32xf32> to vector<1x32xf32>
    %199 = arith.index_cast %c1_i32 : i32 to index
    %c0_87 = arith.constant 0 : index
    %c0_88 = arith.constant 0 : index
    %200 = vector.load %arg17[%199, %c0_87, %c0_88] : memref<4x1x32xf32, #tpu.memory_space<vmem>>, vector<1x1x32xf32>
    %201 = vector.shape_cast %200 : vector<1x1x32xf32> to vector<1x32xf32>
    %202 = arith.truncf %153 : vector<16x32xf32> to vector<16x32xbf16>
    %cst_89 = arith.constant dense<0.000000e+00> : vector<16x32xf32>
    %203 = tpu.matmul %202, %156, %cst_89 {dimension_numbers = #tpu.dot_dimension_numbers<[1], [0], [0], [1], [0, 0, 1, 1], [], []>} : vector<16x32xbf16>, vector<32x32xbf16>, vector<16x32xf32> -> vector<16x32xf32>
    %204 = vector.broadcast %159 : vector<1x32xf32> to vector<16x32xf32>
    %205 = arith.addf %203, %204 : vector<16x32xf32>
    %206 = vector.shape_cast %205 : vector<16x32xf32> to vector<2x8x32xf32>
    %cst_90 = arith.constant dense<0.000000e+00> : vector<16x32xf32>
    %207 = tpu.matmul %202, %162, %cst_90 {dimension_numbers = #tpu.dot_dimension_numbers<[1], [0], [0], [1], [0, 0, 1, 1], [], []>} : vector<16x32xbf16>, vector<32x32xbf16>, vector<16x32xf32> -> vector<16x32xf32>
    %208 = vector.broadcast %165 : vector<1x32xf32> to vector<16x32xf32>
    %209 = arith.addf %207, %208 : vector<16x32xf32>
    %210 = vector.shape_cast %209 : vector<16x32xf32> to vector<2x8x32xf32>
    %cst_91 = arith.constant dense<0.000000e+00> : vector<16x32xf32>
    %211 = tpu.matmul %202, %168, %cst_91 {dimension_numbers = #tpu.dot_dimension_numbers<[1], [0], [0], [1], [0, 0, 1, 1], [], []>} : vector<16x32xbf16>, vector<32x32xbf16>, vector<16x32xf32> -> vector<16x32xf32>
    %212 = vector.broadcast %171 : vector<1x32xf32> to vector<16x32xf32>
    %213 = arith.addf %211, %212 : vector<16x32xf32>
    %214 = vector.shape_cast %213 : vector<16x32xf32> to vector<2x8x32xf32>
    %215 = vector.extract_strided_slice %206 {offsets = [0, 0, 0], sizes = [2, 8, 16], strides = [1, 1, 1]} : vector<2x8x32xf32> to vector<2x8x16xf32>
    %216 = vector.extract_strided_slice %210 {offsets = [0, 0, 0], sizes = [2, 8, 16], strides = [1, 1, 1]} : vector<2x8x32xf32> to vector<2x8x16xf32>
    %217 = vector.extract_strided_slice %214 {offsets = [0, 0, 0], sizes = [2, 8, 16], strides = [1, 1, 1]} : vector<2x8x32xf32> to vector<2x8x16xf32>
    "tpu.trace_start"() <{level = 10 : i32, message = "bqd,bkd->bqk"}> : () -> ()
    %cst_92 = arith.constant dense<0.000000e+00> : vector<2x8x8xf32>
    %218 = tpu.matmul %215, %216, %cst_92 {dimension_numbers = #tpu.dot_dimension_numbers<[2], [2], [1], [1], [0, 0, 0, 1, 1, 1], [0], [0]>} : vector<2x8x16xf32>, vector<2x8x16xf32>, vector<2x8x8xf32> -> vector<2x8x8xf32>
    "tpu.trace_stop"() : () -> ()
    %cst_93 = arith.constant dense<0xFF800000> : vector<2x8xf32>
    %219 = vector.multi_reduction <maximumf>, %218, %cst_93 [2] : vector<2x8x8xf32> to vector<2x8xf32>
    %220 = vector.shape_cast %219 : vector<2x8xf32> to vector<2x8x1xf32>
    %221 = vector.broadcast %220 : vector<2x8x1xf32> to vector<2x8x8xf32>
    %222 = arith.subf %218, %221 : vector<2x8x8xf32>
    %223 = math.exp %222 : vector<2x8x8xf32>
    %cst_94 = arith.constant dense<0.000000e+00> : vector<2x8xf32>
    %224 = vector.multi_reduction <add>, %223, %cst_94 [2] : vector<2x8x8xf32> to vector<2x8xf32>
    %225 = vector.shape_cast %224 : vector<2x8xf32> to vector<2x8x1xf32>
    %226 = tpu.reciprocal %225 {approx = true} : vector<2x8x1xf32> -> vector<2x8x1xf32>
    %227 = vector.broadcast %226 : vector<2x8x1xf32> to vector<2x8x8xf32>
    %228 = arith.mulf %223, %227 : vector<2x8x8xf32>
    "tpu.trace_start"() <{level = 10 : i32, message = "bqk,bkd->bqd"}> : () -> ()
    %cst_95 = arith.constant dense<0.000000e+00> : vector<2x8x16xf32>
    %229 = tpu.matmul %228, %217, %cst_95 {dimension_numbers = #tpu.dot_dimension_numbers<[2], [1], [1], [2], [0, 0, 0, 1, 1, 2], [0], [0]>} : vector<2x8x8xf32>, vector<2x8x16xf32>, vector<2x8x16xf32> -> vector<2x8x16xf32>
    "tpu.trace_stop"() : () -> ()
    %230 = vector.extract_strided_slice %206 {offsets = [0, 0, 16], sizes = [2, 8, 16], strides = [1, 1, 1]} : vector<2x8x32xf32> to vector<2x8x16xf32>
    %231 = vector.extract_strided_slice %210 {offsets = [0, 0, 16], sizes = [2, 8, 16], strides = [1, 1, 1]} : vector<2x8x32xf32> to vector<2x8x16xf32>
    %232 = vector.extract_strided_slice %214 {offsets = [0, 0, 16], sizes = [2, 8, 16], strides = [1, 1, 1]} : vector<2x8x32xf32> to vector<2x8x16xf32>
    "tpu.trace_start"() <{level = 10 : i32, message = "bqd,bkd->bqk"}> : () -> ()
    %cst_96 = arith.constant dense<0.000000e+00> : vector<2x8x8xf32>
    %233 = tpu.matmul %230, %231, %cst_96 {dimension_numbers = #tpu.dot_dimension_numbers<[2], [2], [1], [1], [0, 0, 0, 1, 1, 1], [0], [0]>} : vector<2x8x16xf32>, vector<2x8x16xf32>, vector<2x8x8xf32> -> vector<2x8x8xf32>
    "tpu.trace_stop"() : () -> ()
    %cst_97 = arith.constant dense<0xFF800000> : vector<2x8xf32>
    %234 = vector.multi_reduction <maximumf>, %233, %cst_97 [2] : vector<2x8x8xf32> to vector<2x8xf32>
    %235 = vector.shape_cast %234 : vector<2x8xf32> to vector<2x8x1xf32>
    %236 = vector.broadcast %235 : vector<2x8x1xf32> to vector<2x8x8xf32>
    %237 = arith.subf %233, %236 : vector<2x8x8xf32>
    %238 = math.exp %237 : vector<2x8x8xf32>
    %cst_98 = arith.constant dense<0.000000e+00> : vector<2x8xf32>
    %239 = vector.multi_reduction <add>, %238, %cst_98 [2] : vector<2x8x8xf32> to vector<2x8xf32>
    %240 = vector.shape_cast %239 : vector<2x8xf32> to vector<2x8x1xf32>
    %241 = tpu.reciprocal %240 {approx = true} : vector<2x8x1xf32> -> vector<2x8x1xf32>
    %242 = vector.broadcast %241 : vector<2x8x1xf32> to vector<2x8x8xf32>
    %243 = arith.mulf %238, %242 : vector<2x8x8xf32>
    "tpu.trace_start"() <{level = 10 : i32, message = "bqk,bkd->bqd"}> : () -> ()
    %cst_99 = arith.constant dense<0.000000e+00> : vector<2x8x16xf32>
    %244 = tpu.matmul %243, %232, %cst_99 {dimension_numbers = #tpu.dot_dimension_numbers<[2], [1], [1], [2], [0, 0, 0, 1, 1, 2], [0], [0]>} : vector<2x8x8xf32>, vector<2x8x16xf32>, vector<2x8x16xf32> -> vector<2x8x16xf32>
    "tpu.trace_stop"() : () -> ()
    %245 = tpu.concatenate %229, %244 in 2 : vector<2x8x16xf32>, vector<2x8x16xf32> -> vector<2x8x32xf32>
    %246 = vector.shape_cast %245 : vector<2x8x32xf32> to vector<16x32xf32>
    %247 = arith.truncf %246 : vector<16x32xf32> to vector<16x32xbf16>
    %cst_100 = arith.constant dense<0.000000e+00> : vector<16x32xf32>
    %248 = tpu.matmul %247, %174, %cst_100 {dimension_numbers = #tpu.dot_dimension_numbers<[1], [0], [0], [1], [0, 0, 1, 1], [], []>} : vector<16x32xbf16>, vector<32x32xbf16>, vector<16x32xf32> -> vector<16x32xf32>
    %249 = vector.broadcast %177 : vector<1x32xf32> to vector<16x32xf32>
    %250 = arith.addf %248, %249 : vector<16x32xf32>
    %251 = arith.addf %153, %250 : vector<16x32xf32>
    %cst_101 = arith.constant dense<0.000000e+00> : vector<16xf32>
    %252 = vector.multi_reduction <add>, %251, %cst_101 [1] : vector<16x32xf32> to vector<16xf32>
    %253 = vector.shape_cast %252 : vector<16xf32> to vector<16x1xf32>
    %cst_102 = arith.constant 3.200000e+01 : f32
    %254 = vector.broadcast %cst_102 : f32 to vector<16x1xf32>
    %255 = arith.divf %253, %254 : vector<16x1xf32>
    %256 = vector.broadcast %255 : vector<16x1xf32> to vector<16x32xf32>
    %257 = arith.subf %251, %256 : vector<16x32xf32>
    %258 = arith.mulf %257, %257 : vector<16x32xf32>
    %cst_103 = arith.constant dense<0.000000e+00> : vector<16xf32>
    %259 = vector.multi_reduction <add>, %258, %cst_103 [1] : vector<16x32xf32> to vector<16xf32>
    %260 = vector.shape_cast %259 : vector<16xf32> to vector<16x1xf32>
    %cst_104 = arith.constant 3.200000e+01 : f32
    %261 = vector.broadcast %cst_104 : f32 to vector<16x1xf32>
    %262 = arith.divf %260, %261 : vector<16x1xf32>
    %263 = vector.broadcast %255 : vector<16x1xf32> to vector<16x32xf32>
    %264 = arith.subf %251, %263 : vector<16x32xf32>
    %cst_105 = arith.constant 9.99999974E-6 : f32
    %265 = vector.broadcast %cst_105 : f32 to vector<16x1xf32>
    %266 = arith.addf %262, %265 : vector<16x1xf32>
    %267 = math.rsqrt %266 : vector<16x1xf32>
    %268 = vector.broadcast %267 : vector<16x1xf32> to vector<16x32xf32>
    %269 = arith.mulf %264, %268 : vector<16x32xf32>
    %270 = vector.broadcast %192 : vector<1x32xf32> to vector<16x32xf32>
    %271 = arith.mulf %269, %270 : vector<16x32xf32>
    %272 = vector.broadcast %195 : vector<1x32xf32> to vector<16x32xf32>
    %273 = arith.addf %271, %272 : vector<16x32xf32>
    %274 = arith.truncf %273 : vector<16x32xf32> to vector<16x32xbf16>
    %cst_106 = arith.constant dense<0.000000e+00> : vector<16x128xf32>
    %275 = tpu.matmul %274, %180, %cst_106 {dimension_numbers = #tpu.dot_dimension_numbers<[1], [0], [0], [1], [0, 0, 1, 1], [], []>} : vector<16x32xbf16>, vector<32x128xbf16>, vector<16x128xf32> -> vector<16x128xf32>
    %276 = vector.broadcast %183 : vector<1x128xf32> to vector<16x128xf32>
    %277 = arith.addf %275, %276 : vector<16x128xf32>
    %cst_107 = arith.constant 0.000000e+00 : f32
    %278 = vector.broadcast %cst_107 : f32 to vector<16x128xf32>
    %279 = arith.maximumf %277, %278 : vector<16x128xf32>
    %280 = arith.truncf %279 : vector<16x128xf32> to vector<16x128xbf16>
    %cst_108 = arith.constant dense<0.000000e+00> : vector<16x32xf32>
    %281 = tpu.matmul %280, %186, %cst_108 {dimension_numbers = #tpu.dot_dimension_numbers<[1], [0], [0], [1], [0, 0, 1, 1], [], []>} : vector<16x128xbf16>, vector<128x32xbf16>, vector<16x32xf32> -> vector<16x32xf32>
    %282 = vector.broadcast %189 : vector<1x32xf32> to vector<16x32xf32>
    %283 = arith.addf %281, %282 : vector<16x32xf32>
    %284 = arith.addf %273, %283 : vector<16x32xf32>
    %cst_109 = arith.constant dense<0.000000e+00> : vector<16xf32>
    %285 = vector.multi_reduction <add>, %284, %cst_109 [1] : vector<16x32xf32> to vector<16xf32>
    %286 = vector.shape_cast %285 : vector<16xf32> to vector<16x1xf32>
    %cst_110 = arith.constant 3.200000e+01 : f32
    %287 = vector.broadcast %cst_110 : f32 to vector<16x1xf32>
    %288 = arith.divf %286, %287 : vector<16x1xf32>
    %289 = vector.broadcast %288 : vector<16x1xf32> to vector<16x32xf32>
    %290 = arith.subf %284, %289 : vector<16x32xf32>
    %291 = arith.mulf %290, %290 : vector<16x32xf32>
    %cst_111 = arith.constant dense<0.000000e+00> : vector<16xf32>
    %292 = vector.multi_reduction <add>, %291, %cst_111 [1] : vector<16x32xf32> to vector<16xf32>
    %293 = vector.shape_cast %292 : vector<16xf32> to vector<16x1xf32>
    %cst_112 = arith.constant 3.200000e+01 : f32
    %294 = vector.broadcast %cst_112 : f32 to vector<16x1xf32>
    %295 = arith.divf %293, %294 : vector<16x1xf32>
    %296 = vector.broadcast %288 : vector<16x1xf32> to vector<16x32xf32>
    %297 = arith.subf %284, %296 : vector<16x32xf32>
    %cst_113 = arith.constant 9.99999974E-6 : f32
    %298 = vector.broadcast %cst_113 : f32 to vector<16x1xf32>
    %299 = arith.addf %295, %298 : vector<16x1xf32>
    %300 = math.rsqrt %299 : vector<16x1xf32>
    %301 = vector.broadcast %300 : vector<16x1xf32> to vector<16x32xf32>
    %302 = arith.mulf %297, %301 : vector<16x32xf32>
    %303 = vector.broadcast %198 : vector<1x32xf32> to vector<16x32xf32>
    %304 = arith.mulf %302, %303 : vector<16x32xf32>
    %305 = vector.broadcast %201 : vector<1x32xf32> to vector<16x32xf32>
    %306 = arith.addf %304, %305 : vector<16x32xf32>
    %c2_i32 = arith.constant 2 : i32
    %307 = arith.index_cast %c2_i32 : i32 to index
    %c0_114 = arith.constant 0 : index
    %c0_115 = arith.constant 0 : index
    %308 = vector.load %arg2[%307, %c0_114, %c0_115] : memref<4x32x32xbf16, #tpu.memory_space<vmem>>, vector<1x32x32xbf16>
    %309 = vector.shape_cast %308 : vector<1x32x32xbf16> to vector<32x32xbf16>
    %310 = arith.index_cast %c2_i32 : i32 to index
    %c0_116 = arith.constant 0 : index
    %c0_117 = arith.constant 0 : index
    %311 = vector.load %arg3[%310, %c0_116, %c0_117] : memref<4x1x32xf32, #tpu.memory_space<vmem>>, vector<1x1x32xf32>
    %312 = vector.shape_cast %311 : vector<1x1x32xf32> to vector<1x32xf32>
    %313 = arith.index_cast %c2_i32 : i32 to index
    %c0_118 = arith.constant 0 : index
    %c0_119 = arith.constant 0 : index
    %314 = vector.load %arg4[%313, %c0_118, %c0_119] : memref<4x32x32xbf16, #tpu.memory_space<vmem>>, vector<1x32x32xbf16>
    %315 = vector.shape_cast %314 : vector<1x32x32xbf16> to vector<32x32xbf16>
    %316 = arith.index_cast %c2_i32 : i32 to index
    %c0_120 = arith.constant 0 : index
    %c0_121 = arith.constant 0 : index
    %317 = vector.load %arg5[%316, %c0_120, %c0_121] : memref<4x1x32xf32, #tpu.memory_space<vmem>>, vector<1x1x32xf32>
    %318 = vector.shape_cast %317 : vector<1x1x32xf32> to vector<1x32xf32>
    %319 = arith.index_cast %c2_i32 : i32 to index
    %c0_122 = arith.constant 0 : index
    %c0_123 = arith.constant 0 : index
    %320 = vector.load %arg6[%319, %c0_122, %c0_123] : memref<4x32x32xbf16, #tpu.memory_space<vmem>>, vector<1x32x32xbf16>
    %321 = vector.shape_cast %320 : vector<1x32x32xbf16> to vector<32x32xbf16>
    %322 = arith.index_cast %c2_i32 : i32 to index
    %c0_124 = arith.constant 0 : index
    %c0_125 = arith.constant 0 : index
    %323 = vector.load %arg7[%322, %c0_124, %c0_125] : memref<4x1x32xf32, #tpu.memory_space<vmem>>, vector<1x1x32xf32>
    %324 = vector.shape_cast %323 : vector<1x1x32xf32> to vector<1x32xf32>
    %325 = arith.index_cast %c2_i32 : i32 to index
    %c0_126 = arith.constant 0 : index
    %c0_127 = arith.constant 0 : index
    %326 = vector.load %arg8[%325, %c0_126, %c0_127] : memref<4x32x32xbf16, #tpu.memory_space<vmem>>, vector<1x32x32xbf16>
    %327 = vector.shape_cast %326 : vector<1x32x32xbf16> to vector<32x32xbf16>
    %328 = arith.index_cast %c2_i32 : i32 to index
    %c0_128 = arith.constant 0 : index
    %c0_129 = arith.constant 0 : index
    %329 = vector.load %arg9[%328, %c0_128, %c0_129] : memref<4x1x32xf32, #tpu.memory_space<vmem>>, vector<1x1x32xf32>
    %330 = vector.shape_cast %329 : vector<1x1x32xf32> to vector<1x32xf32>
    %331 = arith.index_cast %c2_i32 : i32 to index
    %c0_130 = arith.constant 0 : index
    %c0_131 = arith.constant 0 : index
    %332 = vector.load %arg10[%331, %c0_130, %c0_131] : memref<4x32x128xbf16, #tpu.memory_space<vmem>>, vector<1x32x128xbf16>
    %333 = vector.shape_cast %332 : vector<1x32x128xbf16> to vector<32x128xbf16>
    %334 = arith.index_cast %c2_i32 : i32 to index
    %c0_132 = arith.constant 0 : index
    %c0_133 = arith.constant 0 : index
    %335 = vector.load %arg11[%334, %c0_132, %c0_133] : memref<4x1x128xf32, #tpu.memory_space<vmem>>, vector<1x1x128xf32>
    %336 = vector.shape_cast %335 : vector<1x1x128xf32> to vector<1x128xf32>
    %337 = arith.index_cast %c2_i32 : i32 to index
    %c0_134 = arith.constant 0 : index
    %c0_135 = arith.constant 0 : index
    %338 = vector.load %arg12[%337, %c0_134, %c0_135] : memref<4x128x32xbf16, #tpu.memory_space<vmem>>, vector<1x128x32xbf16>
    %339 = vector.shape_cast %338 : vector<1x128x32xbf16> to vector<128x32xbf16>
    %340 = arith.index_cast %c2_i32 : i32 to index
    %c0_136 = arith.constant 0 : index
    %c0_137 = arith.constant 0 : index
    %341 = vector.load %arg13[%340, %c0_136, %c0_137] : memref<4x1x32xf32, #tpu.memory_space<vmem>>, vector<1x1x32xf32>
    %342 = vector.shape_cast %341 : vector<1x1x32xf32> to vector<1x32xf32>
    %343 = arith.index_cast %c2_i32 : i32 to index
    %c0_138 = arith.constant 0 : index
    %c0_139 = arith.constant 0 : index
    %344 = vector.load %arg14[%343, %c0_138, %c0_139] : memref<4x1x32xf32, #tpu.memory_space<vmem>>, vector<1x1x32xf32>
    %345 = vector.shape_cast %344 : vector<1x1x32xf32> to vector<1x32xf32>
    %346 = arith.index_cast %c2_i32 : i32 to index
    %c0_140 = arith.constant 0 : index
    %c0_141 = arith.constant 0 : index
    %347 = vector.load %arg15[%346, %c0_140, %c0_141] : memref<4x1x32xf32, #tpu.memory_space<vmem>>, vector<1x1x32xf32>
    %348 = vector.shape_cast %347 : vector<1x1x32xf32> to vector<1x32xf32>
    %349 = arith.index_cast %c2_i32 : i32 to index
    %c0_142 = arith.constant 0 : index
    %c0_143 = arith.constant 0 : index
    %350 = vector.load %arg16[%349, %c0_142, %c0_143] : memref<4x1x32xf32, #tpu.memory_space<vmem>>, vector<1x1x32xf32>
    %351 = vector.shape_cast %350 : vector<1x1x32xf32> to vector<1x32xf32>
    %352 = arith.index_cast %c2_i32 : i32 to index
    %c0_144 = arith.constant 0 : index
    %c0_145 = arith.constant 0 : index
    %353 = vector.load %arg17[%352, %c0_144, %c0_145] : memref<4x1x32xf32, #tpu.memory_space<vmem>>, vector<1x1x32xf32>
    %354 = vector.shape_cast %353 : vector<1x1x32xf32> to vector<1x32xf32>
    %355 = arith.truncf %306 : vector<16x32xf32> to vector<16x32xbf16>
    %cst_146 = arith.constant dense<0.000000e+00> : vector<16x32xf32>
    %356 = tpu.matmul %355, %309, %cst_146 {dimension_numbers = #tpu.dot_dimension_numbers<[1], [0], [0], [1], [0, 0, 1, 1], [], []>} : vector<16x32xbf16>, vector<32x32xbf16>, vector<16x32xf32> -> vector<16x32xf32>
    %357 = vector.broadcast %312 : vector<1x32xf32> to vector<16x32xf32>
    %358 = arith.addf %356, %357 : vector<16x32xf32>
    %359 = vector.shape_cast %358 : vector<16x32xf32> to vector<2x8x32xf32>
    %cst_147 = arith.constant dense<0.000000e+00> : vector<16x32xf32>
    %360 = tpu.matmul %355, %315, %cst_147 {dimension_numbers = #tpu.dot_dimension_numbers<[1], [0], [0], [1], [0, 0, 1, 1], [], []>} : vector<16x32xbf16>, vector<32x32xbf16>, vector<16x32xf32> -> vector<16x32xf32>
    %361 = vector.broadcast %318 : vector<1x32xf32> to vector<16x32xf32>
    %362 = arith.addf %360, %361 : vector<16x32xf32>
    %363 = vector.shape_cast %362 : vector<16x32xf32> to vector<2x8x32xf32>
    %cst_148 = arith.constant dense<0.000000e+00> : vector<16x32xf32>
    %364 = tpu.matmul %355, %321, %cst_148 {dimension_numbers = #tpu.dot_dimension_numbers<[1], [0], [0], [1], [0, 0, 1, 1], [], []>} : vector<16x32xbf16>, vector<32x32xbf16>, vector<16x32xf32> -> vector<16x32xf32>
    %365 = vector.broadcast %324 : vector<1x32xf32> to vector<16x32xf32>
    %366 = arith.addf %364, %365 : vector<16x32xf32>
    %367 = vector.shape_cast %366 : vector<16x32xf32> to vector<2x8x32xf32>
    %368 = vector.extract_strided_slice %359 {offsets = [0, 0, 0], sizes = [2, 8, 16], strides = [1, 1, 1]} : vector<2x8x32xf32> to vector<2x8x16xf32>
    %369 = vector.extract_strided_slice %363 {offsets = [0, 0, 0], sizes = [2, 8, 16], strides = [1, 1, 1]} : vector<2x8x32xf32> to vector<2x8x16xf32>
    %370 = vector.extract_strided_slice %367 {offsets = [0, 0, 0], sizes = [2, 8, 16], strides = [1, 1, 1]} : vector<2x8x32xf32> to vector<2x8x16xf32>
    "tpu.trace_start"() <{level = 10 : i32, message = "bqd,bkd->bqk"}> : () -> ()
    %cst_149 = arith.constant dense<0.000000e+00> : vector<2x8x8xf32>
    %371 = tpu.matmul %368, %369, %cst_149 {dimension_numbers = #tpu.dot_dimension_numbers<[2], [2], [1], [1], [0, 0, 0, 1, 1, 1], [0], [0]>} : vector<2x8x16xf32>, vector<2x8x16xf32>, vector<2x8x8xf32> -> vector<2x8x8xf32>
    "tpu.trace_stop"() : () -> ()
    %cst_150 = arith.constant dense<0xFF800000> : vector<2x8xf32>
    %372 = vector.multi_reduction <maximumf>, %371, %cst_150 [2] : vector<2x8x8xf32> to vector<2x8xf32>
    %373 = vector.shape_cast %372 : vector<2x8xf32> to vector<2x8x1xf32>
    %374 = vector.broadcast %373 : vector<2x8x1xf32> to vector<2x8x8xf32>
    %375 = arith.subf %371, %374 : vector<2x8x8xf32>
    %376 = math.exp %375 : vector<2x8x8xf32>
    %cst_151 = arith.constant dense<0.000000e+00> : vector<2x8xf32>
    %377 = vector.multi_reduction <add>, %376, %cst_151 [2] : vector<2x8x8xf32> to vector<2x8xf32>
    %378 = vector.shape_cast %377 : vector<2x8xf32> to vector<2x8x1xf32>
    %379 = tpu.reciprocal %378 {approx = true} : vector<2x8x1xf32> -> vector<2x8x1xf32>
    %380 = vector.broadcast %379 : vector<2x8x1xf32> to vector<2x8x8xf32>
    %381 = arith.mulf %376, %380 : vector<2x8x8xf32>
    "tpu.trace_start"() <{level = 10 : i32, message = "bqk,bkd->bqd"}> : () -> ()
    %cst_152 = arith.constant dense<0.000000e+00> : vector<2x8x16xf32>
    %382 = tpu.matmul %381, %370, %cst_152 {dimension_numbers = #tpu.dot_dimension_numbers<[2], [1], [1], [2], [0, 0, 0, 1, 1, 2], [0], [0]>} : vector<2x8x8xf32>, vector<2x8x16xf32>, vector<2x8x16xf32> -> vector<2x8x16xf32>
    "tpu.trace_stop"() : () -> ()
    %383 = vector.extract_strided_slice %359 {offsets = [0, 0, 16], sizes = [2, 8, 16], strides = [1, 1, 1]} : vector<2x8x32xf32> to vector<2x8x16xf32>
    %384 = vector.extract_strided_slice %363 {offsets = [0, 0, 16], sizes = [2, 8, 16], strides = [1, 1, 1]} : vector<2x8x32xf32> to vector<2x8x16xf32>
    %385 = vector.extract_strided_slice %367 {offsets = [0, 0, 16], sizes = [2, 8, 16], strides = [1, 1, 1]} : vector<2x8x32xf32> to vector<2x8x16xf32>
    "tpu.trace_start"() <{level = 10 : i32, message = "bqd,bkd->bqk"}> : () -> ()
    %cst_153 = arith.constant dense<0.000000e+00> : vector<2x8x8xf32>
    %386 = tpu.matmul %383, %384, %cst_153 {dimension_numbers = #tpu.dot_dimension_numbers<[2], [2], [1], [1], [0, 0, 0, 1, 1, 1], [0], [0]>} : vector<2x8x16xf32>, vector<2x8x16xf32>, vector<2x8x8xf32> -> vector<2x8x8xf32>
    "tpu.trace_stop"() : () -> ()
    %cst_154 = arith.constant dense<0xFF800000> : vector<2x8xf32>
    %387 = vector.multi_reduction <maximumf>, %386, %cst_154 [2] : vector<2x8x8xf32> to vector<2x8xf32>
    %388 = vector.shape_cast %387 : vector<2x8xf32> to vector<2x8x1xf32>
    %389 = vector.broadcast %388 : vector<2x8x1xf32> to vector<2x8x8xf32>
    %390 = arith.subf %386, %389 : vector<2x8x8xf32>
    %391 = math.exp %390 : vector<2x8x8xf32>
    %cst_155 = arith.constant dense<0.000000e+00> : vector<2x8xf32>
    %392 = vector.multi_reduction <add>, %391, %cst_155 [2] : vector<2x8x8xf32> to vector<2x8xf32>
    %393 = vector.shape_cast %392 : vector<2x8xf32> to vector<2x8x1xf32>
    %394 = tpu.reciprocal %393 {approx = true} : vector<2x8x1xf32> -> vector<2x8x1xf32>
    %395 = vector.broadcast %394 : vector<2x8x1xf32> to vector<2x8x8xf32>
    %396 = arith.mulf %391, %395 : vector<2x8x8xf32>
    "tpu.trace_start"() <{level = 10 : i32, message = "bqk,bkd->bqd"}> : () -> ()
    %cst_156 = arith.constant dense<0.000000e+00> : vector<2x8x16xf32>
    %397 = tpu.matmul %396, %385, %cst_156 {dimension_numbers = #tpu.dot_dimension_numbers<[2], [1], [1], [2], [0, 0, 0, 1, 1, 2], [0], [0]>} : vector<2x8x8xf32>, vector<2x8x16xf32>, vector<2x8x16xf32> -> vector<2x8x16xf32>
    "tpu.trace_stop"() : () -> ()
    %398 = tpu.concatenate %382, %397 in 2 : vector<2x8x16xf32>, vector<2x8x16xf32> -> vector<2x8x32xf32>
    %399 = vector.shape_cast %398 : vector<2x8x32xf32> to vector<16x32xf32>
    %400 = arith.truncf %399 : vector<16x32xf32> to vector<16x32xbf16>
    %cst_157 = arith.constant dense<0.000000e+00> : vector<16x32xf32>
    %401 = tpu.matmul %400, %327, %cst_157 {dimension_numbers = #tpu.dot_dimension_numbers<[1], [0], [0], [1], [0, 0, 1, 1], [], []>} : vector<16x32xbf16>, vector<32x32xbf16>, vector<16x32xf32> -> vector<16x32xf32>
    %402 = vector.broadcast %330 : vector<1x32xf32> to vector<16x32xf32>
    %403 = arith.addf %401, %402 : vector<16x32xf32>
    %404 = arith.addf %306, %403 : vector<16x32xf32>
    %cst_158 = arith.constant dense<0.000000e+00> : vector<16xf32>
    %405 = vector.multi_reduction <add>, %404, %cst_158 [1] : vector<16x32xf32> to vector<16xf32>
    %406 = vector.shape_cast %405 : vector<16xf32> to vector<16x1xf32>
    %cst_159 = arith.constant 3.200000e+01 : f32
    %407 = vector.broadcast %cst_159 : f32 to vector<16x1xf32>
    %408 = arith.divf %406, %407 : vector<16x1xf32>
    %409 = vector.broadcast %408 : vector<16x1xf32> to vector<16x32xf32>
    %410 = arith.subf %404, %409 : vector<16x32xf32>
    %411 = arith.mulf %410, %410 : vector<16x32xf32>
    %cst_160 = arith.constant dense<0.000000e+00> : vector<16xf32>
    %412 = vector.multi_reduction <add>, %411, %cst_160 [1] : vector<16x32xf32> to vector<16xf32>
    %413 = vector.shape_cast %412 : vector<16xf32> to vector<16x1xf32>
    %cst_161 = arith.constant 3.200000e+01 : f32
    %414 = vector.broadcast %cst_161 : f32 to vector<16x1xf32>
    %415 = arith.divf %413, %414 : vector<16x1xf32>
    %416 = vector.broadcast %408 : vector<16x1xf32> to vector<16x32xf32>
    %417 = arith.subf %404, %416 : vector<16x32xf32>
    %cst_162 = arith.constant 9.99999974E-6 : f32
    %418 = vector.broadcast %cst_162 : f32 to vector<16x1xf32>
    %419 = arith.addf %415, %418 : vector<16x1xf32>
    %420 = math.rsqrt %419 : vector<16x1xf32>
    %421 = vector.broadcast %420 : vector<16x1xf32> to vector<16x32xf32>
    %422 = arith.mulf %417, %421 : vector<16x32xf32>
    %423 = vector.broadcast %345 : vector<1x32xf32> to vector<16x32xf32>
    %424 = arith.mulf %422, %423 : vector<16x32xf32>
    %425 = vector.broadcast %348 : vector<1x32xf32> to vector<16x32xf32>
    %426 = arith.addf %424, %425 : vector<16x32xf32>
    %427 = arith.truncf %426 : vector<16x32xf32> to vector<16x32xbf16>
    %cst_163 = arith.constant dense<0.000000e+00> : vector<16x128xf32>
    %428 = tpu.matmul %427, %333, %cst_163 {dimension_numbers = #tpu.dot_dimension_numbers<[1], [0], [0], [1], [0, 0, 1, 1], [], []>} : vector<16x32xbf16>, vector<32x128xbf16>, vector<16x128xf32> -> vector<16x128xf32>
    %429 = vector.broadcast %336 : vector<1x128xf32> to vector<16x128xf32>
    %430 = arith.addf %428, %429 : vector<16x128xf32>
    %cst_164 = arith.constant 0.000000e+00 : f32
    %431 = vector.broadcast %cst_164 : f32 to vector<16x128xf32>
    %432 = arith.maximumf %430, %431 : vector<16x128xf32>
    %433 = arith.truncf %432 : vector<16x128xf32> to vector<16x128xbf16>
    %cst_165 = arith.constant dense<0.000000e+00> : vector<16x32xf32>
    %434 = tpu.matmul %433, %339, %cst_165 {dimension_numbers = #tpu.dot_dimension_numbers<[1], [0], [0], [1], [0, 0, 1, 1], [], []>} : vector<16x128xbf16>, vector<128x32xbf16>, vector<16x32xf32> -> vector<16x32xf32>
    %435 = vector.broadcast %342 : vector<1x32xf32> to vector<16x32xf32>
    %436 = arith.addf %434, %435 : vector<16x32xf32>
    %437 = arith.addf %426, %436 : vector<16x32xf32>
    %cst_166 = arith.constant dense<0.000000e+00> : vector<16xf32>
    %438 = vector.multi_reduction <add>, %437, %cst_166 [1] : vector<16x32xf32> to vector<16xf32>
    %439 = vector.shape_cast %438 : vector<16xf32> to vector<16x1xf32>
    %cst_167 = arith.constant 3.200000e+01 : f32
    %440 = vector.broadcast %cst_167 : f32 to vector<16x1xf32>
    %441 = arith.divf %439, %440 : vector<16x1xf32>
    %442 = vector.broadcast %441 : vector<16x1xf32> to vector<16x32xf32>
    %443 = arith.subf %437, %442 : vector<16x32xf32>
    %444 = arith.mulf %443, %443 : vector<16x32xf32>
    %cst_168 = arith.constant dense<0.000000e+00> : vector<16xf32>
    %445 = vector.multi_reduction <add>, %444, %cst_168 [1] : vector<16x32xf32> to vector<16xf32>
    %446 = vector.shape_cast %445 : vector<16xf32> to vector<16x1xf32>
    %cst_169 = arith.constant 3.200000e+01 : f32
    %447 = vector.broadcast %cst_169 : f32 to vector<16x1xf32>
    %448 = arith.divf %446, %447 : vector<16x1xf32>
    %449 = vector.broadcast %441 : vector<16x1xf32> to vector<16x32xf32>
    %450 = arith.subf %437, %449 : vector<16x32xf32>
    %cst_170 = arith.constant 9.99999974E-6 : f32
    %451 = vector.broadcast %cst_170 : f32 to vector<16x1xf32>
    %452 = arith.addf %448, %451 : vector<16x1xf32>
    %453 = math.rsqrt %452 : vector<16x1xf32>
    %454 = vector.broadcast %453 : vector<16x1xf32> to vector<16x32xf32>
    %455 = arith.mulf %450, %454 : vector<16x32xf32>
    %456 = vector.broadcast %351 : vector<1x32xf32> to vector<16x32xf32>
    %457 = arith.mulf %455, %456 : vector<16x32xf32>
    %458 = vector.broadcast %354 : vector<1x32xf32> to vector<16x32xf32>
    %459 = arith.addf %457, %458 : vector<16x32xf32>
    %c3_i32 = arith.constant 3 : i32
    %460 = arith.index_cast %c3_i32 : i32 to index
    %c0_171 = arith.constant 0 : index
    %c0_172 = arith.constant 0 : index
    %461 = vector.load %arg2[%460, %c0_171, %c0_172] : memref<4x32x32xbf16, #tpu.memory_space<vmem>>, vector<1x32x32xbf16>
    %462 = vector.shape_cast %461 : vector<1x32x32xbf16> to vector<32x32xbf16>
    %463 = arith.index_cast %c3_i32 : i32 to index
    %c0_173 = arith.constant 0 : index
    %c0_174 = arith.constant 0 : index
    %464 = vector.load %arg3[%463, %c0_173, %c0_174] : memref<4x1x32xf32, #tpu.memory_space<vmem>>, vector<1x1x32xf32>
    %465 = vector.shape_cast %464 : vector<1x1x32xf32> to vector<1x32xf32>
    %466 = arith.index_cast %c3_i32 : i32 to index
    %c0_175 = arith.constant 0 : index
    %c0_176 = arith.constant 0 : index
    %467 = vector.load %arg4[%466, %c0_175, %c0_176] : memref<4x32x32xbf16, #tpu.memory_space<vmem>>, vector<1x32x32xbf16>
    %468 = vector.shape_cast %467 : vector<1x32x32xbf16> to vector<32x32xbf16>
    %469 = arith.index_cast %c3_i32 : i32 to index
    %c0_177 = arith.constant 0 : index
    %c0_178 = arith.constant 0 : index
    %470 = vector.load %arg5[%469, %c0_177, %c0_178] : memref<4x1x32xf32, #tpu.memory_space<vmem>>, vector<1x1x32xf32>
    %471 = vector.shape_cast %470 : vector<1x1x32xf32> to vector<1x32xf32>
    %472 = arith.index_cast %c3_i32 : i32 to index
    %c0_179 = arith.constant 0 : index
    %c0_180 = arith.constant 0 : index
    %473 = vector.load %arg6[%472, %c0_179, %c0_180] : memref<4x32x32xbf16, #tpu.memory_space<vmem>>, vector<1x32x32xbf16>
    %474 = vector.shape_cast %473 : vector<1x32x32xbf16> to vector<32x32xbf16>
    %475 = arith.index_cast %c3_i32 : i32 to index
    %c0_181 = arith.constant 0 : index
    %c0_182 = arith.constant 0 : index
    %476 = vector.load %arg7[%475, %c0_181, %c0_182] : memref<4x1x32xf32, #tpu.memory_space<vmem>>, vector<1x1x32xf32>
    %477 = vector.shape_cast %476 : vector<1x1x32xf32> to vector<1x32xf32>
    %478 = arith.index_cast %c3_i32 : i32 to index
    %c0_183 = arith.constant 0 : index
    %c0_184 = arith.constant 0 : index
    %479 = vector.load %arg8[%478, %c0_183, %c0_184] : memref<4x32x32xbf16, #tpu.memory_space<vmem>>, vector<1x32x32xbf16>
    %480 = vector.shape_cast %479 : vector<1x32x32xbf16> to vector<32x32xbf16>
    %481 = arith.index_cast %c3_i32 : i32 to index
    %c0_185 = arith.constant 0 : index
    %c0_186 = arith.constant 0 : index
    %482 = vector.load %arg9[%481, %c0_185, %c0_186] : memref<4x1x32xf32, #tpu.memory_space<vmem>>, vector<1x1x32xf32>
    %483 = vector.shape_cast %482 : vector<1x1x32xf32> to vector<1x32xf32>
    %484 = arith.index_cast %c3_i32 : i32 to index
    %c0_187 = arith.constant 0 : index
    %c0_188 = arith.constant 0 : index
    %485 = vector.load %arg10[%484, %c0_187, %c0_188] : memref<4x32x128xbf16, #tpu.memory_space<vmem>>, vector<1x32x128xbf16>
    %486 = vector.shape_cast %485 : vector<1x32x128xbf16> to vector<32x128xbf16>
    %487 = arith.index_cast %c3_i32 : i32 to index
    %c0_189 = arith.constant 0 : index
    %c0_190 = arith.constant 0 : index
    %488 = vector.load %arg11[%487, %c0_189, %c0_190] : memref<4x1x128xf32, #tpu.memory_space<vmem>>, vector<1x1x128xf32>
    %489 = vector.shape_cast %488 : vector<1x1x128xf32> to vector<1x128xf32>
    %490 = arith.index_cast %c3_i32 : i32 to index
    %c0_191 = arith.constant 0 : index
    %c0_192 = arith.constant 0 : index
    %491 = vector.load %arg12[%490, %c0_191, %c0_192] : memref<4x128x32xbf16, #tpu.memory_space<vmem>>, vector<1x128x32xbf16>
    %492 = vector.shape_cast %491 : vector<1x128x32xbf16> to vector<128x32xbf16>
    %493 = arith.index_cast %c3_i32 : i32 to index
    %c0_193 = arith.constant 0 : index
    %c0_194 = arith.constant 0 : index
    %494 = vector.load %arg13[%493, %c0_193, %c0_194] : memref<4x1x32xf32, #tpu.memory_space<vmem>>, vector<1x1x32xf32>
    %495 = vector.shape_cast %494 : vector<1x1x32xf32> to vector<1x32xf32>
    %496 = arith.index_cast %c3_i32 : i32 to index
    %c0_195 = arith.constant 0 : index
    %c0_196 = arith.constant 0 : index
    %497 = vector.load %arg14[%496, %c0_195, %c0_196] : memref<4x1x32xf32, #tpu.memory_space<vmem>>, vector<1x1x32xf32>
    %498 = vector.shape_cast %497 : vector<1x1x32xf32> to vector<1x32xf32>
    %499 = arith.index_cast %c3_i32 : i32 to index
    %c0_197 = arith.constant 0 : index
    %c0_198 = arith.constant 0 : index
    %500 = vector.load %arg15[%499, %c0_197, %c0_198] : memref<4x1x32xf32, #tpu.memory_space<vmem>>, vector<1x1x32xf32>
    %501 = vector.shape_cast %500 : vector<1x1x32xf32> to vector<1x32xf32>
    %502 = arith.index_cast %c3_i32 : i32 to index
    %c0_199 = arith.constant 0 : index
    %c0_200 = arith.constant 0 : index
    %503 = vector.load %arg16[%502, %c0_199, %c0_200] : memref<4x1x32xf32, #tpu.memory_space<vmem>>, vector<1x1x32xf32>
    %504 = vector.shape_cast %503 : vector<1x1x32xf32> to vector<1x32xf32>
    %505 = arith.index_cast %c3_i32 : i32 to index
    %c0_201 = arith.constant 0 : index
    %c0_202 = arith.constant 0 : index
    %506 = vector.load %arg17[%505, %c0_201, %c0_202] : memref<4x1x32xf32, #tpu.memory_space<vmem>>, vector<1x1x32xf32>
    %507 = vector.shape_cast %506 : vector<1x1x32xf32> to vector<1x32xf32>
    %508 = arith.truncf %459 : vector<16x32xf32> to vector<16x32xbf16>
    %cst_203 = arith.constant dense<0.000000e+00> : vector<16x32xf32>
    %509 = tpu.matmul %508, %462, %cst_203 {dimension_numbers = #tpu.dot_dimension_numbers<[1], [0], [0], [1], [0, 0, 1, 1], [], []>} : vector<16x32xbf16>, vector<32x32xbf16>, vector<16x32xf32> -> vector<16x32xf32>
    %510 = vector.broadcast %465 : vector<1x32xf32> to vector<16x32xf32>
    %511 = arith.addf %509, %510 : vector<16x32xf32>
    %512 = vector.shape_cast %511 : vector<16x32xf32> to vector<2x8x32xf32>
    %cst_204 = arith.constant dense<0.000000e+00> : vector<16x32xf32>
    %513 = tpu.matmul %508, %468, %cst_204 {dimension_numbers = #tpu.dot_dimension_numbers<[1], [0], [0], [1], [0, 0, 1, 1], [], []>} : vector<16x32xbf16>, vector<32x32xbf16>, vector<16x32xf32> -> vector<16x32xf32>
    %514 = vector.broadcast %471 : vector<1x32xf32> to vector<16x32xf32>
    %515 = arith.addf %513, %514 : vector<16x32xf32>
    %516 = vector.shape_cast %515 : vector<16x32xf32> to vector<2x8x32xf32>
    %cst_205 = arith.constant dense<0.000000e+00> : vector<16x32xf32>
    %517 = tpu.matmul %508, %474, %cst_205 {dimension_numbers = #tpu.dot_dimension_numbers<[1], [0], [0], [1], [0, 0, 1, 1], [], []>} : vector<16x32xbf16>, vector<32x32xbf16>, vector<16x32xf32> -> vector<16x32xf32>
    %518 = vector.broadcast %477 : vector<1x32xf32> to vector<16x32xf32>
    %519 = arith.addf %517, %518 : vector<16x32xf32>
    %520 = vector.shape_cast %519 : vector<16x32xf32> to vector<2x8x32xf32>
    %521 = vector.extract_strided_slice %512 {offsets = [0, 0, 0], sizes = [2, 8, 16], strides = [1, 1, 1]} : vector<2x8x32xf32> to vector<2x8x16xf32>
    %522 = vector.extract_strided_slice %516 {offsets = [0, 0, 0], sizes = [2, 8, 16], strides = [1, 1, 1]} : vector<2x8x32xf32> to vector<2x8x16xf32>
    %523 = vector.extract_strided_slice %520 {offsets = [0, 0, 0], sizes = [2, 8, 16], strides = [1, 1, 1]} : vector<2x8x32xf32> to vector<2x8x16xf32>
    "tpu.trace_start"() <{level = 10 : i32, message = "bqd,bkd->bqk"}> : () -> ()
    %cst_206 = arith.constant dense<0.000000e+00> : vector<2x8x8xf32>
    %524 = tpu.matmul %521, %522, %cst_206 {dimension_numbers = #tpu.dot_dimension_numbers<[2], [2], [1], [1], [0, 0, 0, 1, 1, 1], [0], [0]>} : vector<2x8x16xf32>, vector<2x8x16xf32>, vector<2x8x8xf32> -> vector<2x8x8xf32>
    "tpu.trace_stop"() : () -> ()
    %cst_207 = arith.constant dense<0xFF800000> : vector<2x8xf32>
    %525 = vector.multi_reduction <maximumf>, %524, %cst_207 [2] : vector<2x8x8xf32> to vector<2x8xf32>
    %526 = vector.shape_cast %525 : vector<2x8xf32> to vector<2x8x1xf32>
    %527 = vector.broadcast %526 : vector<2x8x1xf32> to vector<2x8x8xf32>
    %528 = arith.subf %524, %527 : vector<2x8x8xf32>
    %529 = math.exp %528 : vector<2x8x8xf32>
    %cst_208 = arith.constant dense<0.000000e+00> : vector<2x8xf32>
    %530 = vector.multi_reduction <add>, %529, %cst_208 [2] : vector<2x8x8xf32> to vector<2x8xf32>
    %531 = vector.shape_cast %530 : vector<2x8xf32> to vector<2x8x1xf32>
    %532 = tpu.reciprocal %531 {approx = true} : vector<2x8x1xf32> -> vector<2x8x1xf32>
    %533 = vector.broadcast %532 : vector<2x8x1xf32> to vector<2x8x8xf32>
    %534 = arith.mulf %529, %533 : vector<2x8x8xf32>
    "tpu.trace_start"() <{level = 10 : i32, message = "bqk,bkd->bqd"}> : () -> ()
    %cst_209 = arith.constant dense<0.000000e+00> : vector<2x8x16xf32>
    %535 = tpu.matmul %534, %523, %cst_209 {dimension_numbers = #tpu.dot_dimension_numbers<[2], [1], [1], [2], [0, 0, 0, 1, 1, 2], [0], [0]>} : vector<2x8x8xf32>, vector<2x8x16xf32>, vector<2x8x16xf32> -> vector<2x8x16xf32>
    "tpu.trace_stop"() : () -> ()
    %536 = vector.extract_strided_slice %512 {offsets = [0, 0, 16], sizes = [2, 8, 16], strides = [1, 1, 1]} : vector<2x8x32xf32> to vector<2x8x16xf32>
    %537 = vector.extract_strided_slice %516 {offsets = [0, 0, 16], sizes = [2, 8, 16], strides = [1, 1, 1]} : vector<2x8x32xf32> to vector<2x8x16xf32>
    %538 = vector.extract_strided_slice %520 {offsets = [0, 0, 16], sizes = [2, 8, 16], strides = [1, 1, 1]} : vector<2x8x32xf32> to vector<2x8x16xf32>
    "tpu.trace_start"() <{level = 10 : i32, message = "bqd,bkd->bqk"}> : () -> ()
    %cst_210 = arith.constant dense<0.000000e+00> : vector<2x8x8xf32>
    %539 = tpu.matmul %536, %537, %cst_210 {dimension_numbers = #tpu.dot_dimension_numbers<[2], [2], [1], [1], [0, 0, 0, 1, 1, 1], [0], [0]>} : vector<2x8x16xf32>, vector<2x8x16xf32>, vector<2x8x8xf32> -> vector<2x8x8xf32>
    "tpu.trace_stop"() : () -> ()
    %cst_211 = arith.constant dense<0xFF800000> : vector<2x8xf32>
    %540 = vector.multi_reduction <maximumf>, %539, %cst_211 [2] : vector<2x8x8xf32> to vector<2x8xf32>
    %541 = vector.shape_cast %540 : vector<2x8xf32> to vector<2x8x1xf32>
    %542 = vector.broadcast %541 : vector<2x8x1xf32> to vector<2x8x8xf32>
    %543 = arith.subf %539, %542 : vector<2x8x8xf32>
    %544 = math.exp %543 : vector<2x8x8xf32>
    %cst_212 = arith.constant dense<0.000000e+00> : vector<2x8xf32>
    %545 = vector.multi_reduction <add>, %544, %cst_212 [2] : vector<2x8x8xf32> to vector<2x8xf32>
    %546 = vector.shape_cast %545 : vector<2x8xf32> to vector<2x8x1xf32>
    %547 = tpu.reciprocal %546 {approx = true} : vector<2x8x1xf32> -> vector<2x8x1xf32>
    %548 = vector.broadcast %547 : vector<2x8x1xf32> to vector<2x8x8xf32>
    %549 = arith.mulf %544, %548 : vector<2x8x8xf32>
    "tpu.trace_start"() <{level = 10 : i32, message = "bqk,bkd->bqd"}> : () -> ()
    %cst_213 = arith.constant dense<0.000000e+00> : vector<2x8x16xf32>
    %550 = tpu.matmul %549, %538, %cst_213 {dimension_numbers = #tpu.dot_dimension_numbers<[2], [1], [1], [2], [0, 0, 0, 1, 1, 2], [0], [0]>} : vector<2x8x8xf32>, vector<2x8x16xf32>, vector<2x8x16xf32> -> vector<2x8x16xf32>
    "tpu.trace_stop"() : () -> ()
    %551 = tpu.concatenate %535, %550 in 2 : vector<2x8x16xf32>, vector<2x8x16xf32> -> vector<2x8x32xf32>
    %552 = vector.shape_cast %551 : vector<2x8x32xf32> to vector<16x32xf32>
    %553 = arith.truncf %552 : vector<16x32xf32> to vector<16x32xbf16>
    %cst_214 = arith.constant dense<0.000000e+00> : vector<16x32xf32>
    %554 = tpu.matmul %553, %480, %cst_214 {dimension_numbers = #tpu.dot_dimension_numbers<[1], [0], [0], [1], [0, 0, 1, 1], [], []>} : vector<16x32xbf16>, vector<32x32xbf16>, vector<16x32xf32> -> vector<16x32xf32>
    %555 = vector.broadcast %483 : vector<1x32xf32> to vector<16x32xf32>
    %556 = arith.addf %554, %555 : vector<16x32xf32>
    %557 = arith.addf %459, %556 : vector<16x32xf32>
    %cst_215 = arith.constant dense<0.000000e+00> : vector<16xf32>
    %558 = vector.multi_reduction <add>, %557, %cst_215 [1] : vector<16x32xf32> to vector<16xf32>
    %559 = vector.shape_cast %558 : vector<16xf32> to vector<16x1xf32>
    %cst_216 = arith.constant 3.200000e+01 : f32
    %560 = vector.broadcast %cst_216 : f32 to vector<16x1xf32>
    %561 = arith.divf %559, %560 : vector<16x1xf32>
    %562 = vector.broadcast %561 : vector<16x1xf32> to vector<16x32xf32>
    %563 = arith.subf %557, %562 : vector<16x32xf32>
    %564 = arith.mulf %563, %563 : vector<16x32xf32>
    %cst_217 = arith.constant dense<0.000000e+00> : vector<16xf32>
    %565 = vector.multi_reduction <add>, %564, %cst_217 [1] : vector<16x32xf32> to vector<16xf32>
    %566 = vector.shape_cast %565 : vector<16xf32> to vector<16x1xf32>
    %cst_218 = arith.constant 3.200000e+01 : f32
    %567 = vector.broadcast %cst_218 : f32 to vector<16x1xf32>
    %568 = arith.divf %566, %567 : vector<16x1xf32>
    %569 = vector.broadcast %561 : vector<16x1xf32> to vector<16x32xf32>
    %570 = arith.subf %557, %569 : vector<16x32xf32>
    %cst_219 = arith.constant 9.99999974E-6 : f32
    %571 = vector.broadcast %cst_219 : f32 to vector<16x1xf32>
    %572 = arith.addf %568, %571 : vector<16x1xf32>
    %573 = math.rsqrt %572 : vector<16x1xf32>
    %574 = vector.broadcast %573 : vector<16x1xf32> to vector<16x32xf32>
    %575 = arith.mulf %570, %574 : vector<16x32xf32>
    %576 = vector.broadcast %498 : vector<1x32xf32> to vector<16x32xf32>
    %577 = arith.mulf %575, %576 : vector<16x32xf32>
    %578 = vector.broadcast %501 : vector<1x32xf32> to vector<16x32xf32>
    %579 = arith.addf %577, %578 : vector<16x32xf32>
    %580 = arith.truncf %579 : vector<16x32xf32> to vector<16x32xbf16>
    %cst_220 = arith.constant dense<0.000000e+00> : vector<16x128xf32>
    %581 = tpu.matmul %580, %486, %cst_220 {dimension_numbers = #tpu.dot_dimension_numbers<[1], [0], [0], [1], [0, 0, 1, 1], [], []>} : vector<16x32xbf16>, vector<32x128xbf16>, vector<16x128xf32> -> vector<16x128xf32>
    %582 = vector.broadcast %489 : vector<1x128xf32> to vector<16x128xf32>
    %583 = arith.addf %581, %582 : vector<16x128xf32>
    %cst_221 = arith.constant 0.000000e+00 : f32
    %584 = vector.broadcast %cst_221 : f32 to vector<16x128xf32>
    %585 = arith.maximumf %583, %584 : vector<16x128xf32>
    %586 = arith.truncf %585 : vector<16x128xf32> to vector<16x128xbf16>
    %cst_222 = arith.constant dense<0.000000e+00> : vector<16x32xf32>
    %587 = tpu.matmul %586, %492, %cst_222 {dimension_numbers = #tpu.dot_dimension_numbers<[1], [0], [0], [1], [0, 0, 1, 1], [], []>} : vector<16x128xbf16>, vector<128x32xbf16>, vector<16x32xf32> -> vector<16x32xf32>
    %588 = vector.broadcast %495 : vector<1x32xf32> to vector<16x32xf32>
    %589 = arith.addf %587, %588 : vector<16x32xf32>
    %590 = arith.addf %579, %589 : vector<16x32xf32>
    %cst_223 = arith.constant dense<0.000000e+00> : vector<16xf32>
    %591 = vector.multi_reduction <add>, %590, %cst_223 [1] : vector<16x32xf32> to vector<16xf32>
    %592 = vector.shape_cast %591 : vector<16xf32> to vector<16x1xf32>
    %cst_224 = arith.constant 3.200000e+01 : f32
    %593 = vector.broadcast %cst_224 : f32 to vector<16x1xf32>
    %594 = arith.divf %592, %593 : vector<16x1xf32>
    %595 = vector.broadcast %594 : vector<16x1xf32> to vector<16x32xf32>
    %596 = arith.subf %590, %595 : vector<16x32xf32>
    %597 = arith.mulf %596, %596 : vector<16x32xf32>
    %cst_225 = arith.constant dense<0.000000e+00> : vector<16xf32>
    %598 = vector.multi_reduction <add>, %597, %cst_225 [1] : vector<16x32xf32> to vector<16xf32>
    %599 = vector.shape_cast %598 : vector<16xf32> to vector<16x1xf32>
    %cst_226 = arith.constant 3.200000e+01 : f32
    %600 = vector.broadcast %cst_226 : f32 to vector<16x1xf32>
    %601 = arith.divf %599, %600 : vector<16x1xf32>
    %602 = vector.broadcast %594 : vector<16x1xf32> to vector<16x32xf32>
    %603 = arith.subf %590, %602 : vector<16x32xf32>
    %cst_227 = arith.constant 9.99999974E-6 : f32
    %604 = vector.broadcast %cst_227 : f32 to vector<16x1xf32>
    %605 = arith.addf %601, %604 : vector<16x1xf32>
    %606 = math.rsqrt %605 : vector<16x1xf32>
    %607 = vector.broadcast %606 : vector<16x1xf32> to vector<16x32xf32>
    %608 = arith.mulf %603, %607 : vector<16x32xf32>
    %609 = vector.broadcast %504 : vector<1x32xf32> to vector<16x32xf32>
    %610 = arith.mulf %608, %609 : vector<16x32xf32>
    %611 = vector.broadcast %507 : vector<1x32xf32> to vector<16x32xf32>
    %612 = arith.addf %610, %611 : vector<16x32xf32>
    %c4_i32 = arith.constant 4 : i32
    %c0_228 = arith.constant 0 : index
    %c0_229 = arith.constant 0 : index
    %613 = vector.load %arg18[%c0_228, %c0_229] : memref<16x32xf32, #tpu.memory_space<vmem>>, vector<16x32xf32>
    tpu.vector_store %arg18[%c0_228, %c0_229], %612 {strides = array<i32>} : memref<16x32xf32, #tpu.memory_space<vmem>>, vector<16x32xf32>,
    return
  }
  func.func @transform_0(%arg0: i32) -> (i32, i32) {
    %c0_i32 = arith.constant 0 : i32
    %c0_i32_0 = arith.constant 0 : i32
    return %arg0, %c0_i32 : i32, i32
  }
  func.func @transform_1(%arg0: i32) -> (i32, i32, i32) {
    %c0_i32 = arith.constant 0 : i32
    %c0_i32_0 = arith.constant 0 : i32
    %c0_i32_1 = arith.constant 0 : i32
    %c0_i32_2 = arith.constant 0 : i32
    return %c0_i32, %c0_i32_0, %c0_i32_1 : i32, i32, i32
  }
  func.func @transform_2(%arg0: i32) -> (i32, i32, i32) {
    %c0_i32 = arith.constant 0 : i32
    %c0_i32_0 = arith.constant 0 : i32
    %c0_i32_1 = arith.constant 0 : i32
    %c0_i32_2 = arith.constant 0 : i32
    return %c0_i32, %c0_i32_0, %c0_i32_1 : i32, i32, i32
  }
  func.func @transform_3(%arg0: i32) -> (i32, i32, i32) {
    %c0_i32 = arith.constant 0 : i32
    %c0_i32_0 = arith.constant 0 : i32
    %c0_i32_1 = arith.constant 0 : i32
    %c0_i32_2 = arith.constant 0 : i32
    return %c0_i32, %c0_i32_0, %c0_i32_1 : i32, i32, i32
  }
  func.func @transform_4(%arg0: i32) -> (i32, i32, i32) {
    %c0_i32 = arith.constant 0 : i32
    %c0_i32_0 = arith.constant 0 : i32
    %c0_i32_1 = arith.constant 0 : i32
    %c0_i32_2 = arith.constant 0 : i32
    return %c0_i32, %c0_i32_0, %c0_i32_1 : i32, i32, i32
  }
  func.func @transform_5(%arg0: i32) -> (i32, i32, i32) {
    %c0_i32 = arith.constant 0 : i32
    %c0_i32_0 = arith.constant 0 : i32
    %c0_i32_1 = arith.constant 0 : i32
    %c0_i32_2 = arith.constant 0 : i32
    return %c0_i32, %c0_i32_0, %c0_i32_1 : i32, i32, i32
  }
  func.func @transform_6(%arg0: i32) -> (i32, i32, i32) {
    %c0_i32 = arith.constant 0 : i32
    %c0_i32_0 = arith.constant 0 : i32
    %c0_i32_1 = arith.constant 0 : i32
    %c0_i32_2 = arith.constant 0 : i32
    return %c0_i32, %c0_i32_0, %c0_i32_1 : i32, i32, i32
  }
  func.func @transform_7(%arg0: i32) -> (i32, i32, i32) {
    %c0_i32 = arith.constant 0 : i32
    %c0_i32_0 = arith.constant 0 : i32
    %c0_i32_1 = arith.constant 0 : i32
    %c0_i32_2 = arith.constant 0 : i32
    return %c0_i32, %c0_i32_0, %c0_i32_1 : i32, i32, i32
  }
  func.func @transform_8(%arg0: i32) -> (i32, i32, i32) {
    %c0_i32 = arith.constant 0 : i32
    %c0_i32_0 = arith.constant 0 : i32
    %c0_i32_1 = arith.constant 0 : i32
    %c0_i32_2 = arith.constant 0 : i32
    return %c0_i32, %c0_i32_0, %c0_i32_1 : i32, i32, i32
  }
  func.func @transform_9(%arg0: i32) -> (i32, i32, i32) {
    %c0_i32 = arith.constant 0 : i32
    %c0_i32_0 = arith.constant 0 : i32
    %c0_i32_1 = arith.constant 0 : i32
    %c0_i32_2 = arith.constant 0 : i32
    return %c0_i32, %c0_i32_0, %c0_i32_1 : i32, i32, i32
  }
  func.func @transform_10(%arg0: i32) -> (i32, i32, i32) {
    %c0_i32 = arith.constant 0 : i32
    %c0_i32_0 = arith.constant 0 : i32
    %c0_i32_1 = arith.constant 0 : i32
    %c0_i32_2 = arith.constant 0 : i32
    return %c0_i32, %c0_i32_0, %c0_i32_1 : i32, i32, i32
  }
  func.func @transform_11(%arg0: i32) -> (i32, i32, i32) {
    %c0_i32 = arith.constant 0 : i32
    %c0_i32_0 = arith.constant 0 : i32
    %c0_i32_1 = arith.constant 0 : i32
    %c0_i32_2 = arith.constant 0 : i32
    return %c0_i32, %c0_i32_0, %c0_i32_1 : i32, i32, i32
  }
  func.func @transform_12(%arg0: i32) -> (i32, i32, i32) {
    %c0_i32 = arith.constant 0 : i32
    %c0_i32_0 = arith.constant 0 : i32
    %c0_i32_1 = arith.constant 0 : i32
    %c0_i32_2 = arith.constant 0 : i32
    return %c0_i32, %c0_i32_0, %c0_i32_1 : i32, i32, i32
  }
  func.func @transform_13(%arg0: i32) -> (i32, i32, i32) {
    %c0_i32 = arith.constant 0 : i32
    %c0_i32_0 = arith.constant 0 : i32
    %c0_i32_1 = arith.constant 0 : i32
    %c0_i32_2 = arith.constant 0 : i32
    return %c0_i32, %c0_i32_0, %c0_i32_1 : i32, i32, i32
  }
  func.func @transform_14(%arg0: i32) -> (i32, i32, i32) {
    %c0_i32 = arith.constant 0 : i32
    %c0_i32_0 = arith.constant 0 : i32
    %c0_i32_1 = arith.constant 0 : i32
    %c0_i32_2 = arith.constant 0 : i32
    return %c0_i32, %c0_i32_0, %c0_i32_1 : i32, i32, i32
  }
  func.func @transform_15(%arg0: i32) -> (i32, i32, i32) {
    %c0_i32 = arith.constant 0 : i32
    %c0_i32_0 = arith.constant 0 : i32
    %c0_i32_1 = arith.constant 0 : i32
    %c0_i32_2 = arith.constant 0 : i32
    return %c0_i32, %c0_i32_0, %c0_i32_1 : i32, i32, i32
  }
  func.func @transform_16(%arg0: i32) -> (i32, i32, i32) {
    %c0_i32 = arith.constant 0 : i32
    %c0_i32_0 = arith.constant 0 : i32
    %c0_i32_1 = arith.constant 0 : i32
    %c0_i32_2 = arith.constant 0 : i32
    return %c0_i32, %c0_i32_0, %c0_i32_1 : i32, i32, i32
  }
  func.func @transform_17(%arg0: i32) -> (i32, i32) {
    %c0_i32 = arith.constant 0 : i32
    %c0_i32_0 = arith.constant 0 : i32
    return %arg0, %c0_i32 : i32, i32
  }
}

</mosaic_0001>

<bundles_post_ra>
// kernel: tpu_custom_call.1
= control target key start
LH: loop header
LB: loop body
LE: loop exit
PB: predicated region body
PF: predicated region fallthrough
CT: control target
= control target key end

     0   :  { %s4460_s0 = inlined_call_operand.hbm [shape: f32[16,32], index: 0, kind: input, shape index: {}]   ;;  %s4461_s1 = inlined_call_operand.vmem [shape: bf16[4,32,32], index: 1, kind: input, shape index: {}]   ;;  %s4462_s2 = inlined_call_operand.hbm [shape: f32[4,1,32], index: 2, kind: input, shape index: {}]   ;;  %s4463_s3 = inlined_call_operand.vmem [shape: bf16[4,32,32], index: 3, kind: input, shape index: {}]   ;;  %s4464_s4 = inlined_call_operand.hbm [shape: f32[4,1,32], index: 4, kind: input, shape index: {}]   ;;  %s4465_s5 = inlined_call_operand.vmem [shape: bf16[4,32,32], index: 5, kind: input, shape index: {}]   ;;  %s4466_s6 = inlined_call_operand.hbm [shape: f32[4,1,32], index: 6, kind: input, shape index: {}]   ;;  %s4467_s7 = inlined_call_operand.vmem [shape: bf16[4,32,32], index: 7, kind: input, shape index: {}]   ;;  %s4468_s8 = inlined_call_operand.vmem [shape: f32[4,1,32], index: 8, kind: input, shape index: {}]   ;;  %s4469_s9 = inlined_call_operand.vmem [shape: bf16[4,32,128], index: 9, kind: input, shape index: {}]   ;;  %s4470_s10 = inlined_call_operand.hbm [shape: f32[4,1,128], index: 10, kind: input, shape index: {}]   ;;  %s4471_s11 = inlined_call_operand.vmem [shape: bf16[4,128,32], index: 11, kind: input, shape index: {}]   ;;  %s4472_s12 = inlined_call_operand.vmem [shape: f32[4,1,32], index: 12, kind: input, shape index: {}]   ;;  %s4473_s13 = inlined_call_operand.hbm [shape: f32[4,1,32], index: 13, kind: input, shape index: {}]   ;;  %s4474_s14 = inlined_call_operand.hbm [shape: f32[4,1,32], index: 14, kind: input, shape index: {}]   ;;  %s4475_s15 = inlined_call_operand.hbm [shape: f32[4,1,32], index: 15, kind: input, shape index: {}]   ;;  %s4476_s16 = inlined_call_operand.vmem [shape: f32[4,1,32], index: 16, kind: input, shape index: {}]   ;;  %s4477_s17 = inlined_call_operand.hbm [shape: f32[16,32], index: 17, kind: output, shape index: {}]  }
   0x1   :  { %4479 = sst [smem:[#allocation23_spill]] %s4460_s0 }
   0x2   :  { %4480 = sst [smem:[#allocation24_spill]] %s4461_s1 }
   0x3   :  { %22 = vsyncpa [#allocation3], 0 }
   0x4   :  { %23 = vsyncpa [#allocation6], 0 }
   0x5   :  { %24 = vsyncpa [#allocation9], 0 }
   0x6   :  { %25 = vsyncpa [#allocation12], 0 }
   0x7   :  { %26 = vsyncpa [#allocation15], 0  ;;  %s47_s26 = sshll.u32 %s4462_s2, 4  ;;  %s48_s26 = int_to_ptr.hbm [resolvable:$true] %s47_s26 }
   0x8   :  { %27 = vsyncpa [#allocation4], 0  ;;  %s3804_s27 = smov [#allocation5]   ;;  %s77_s30 = sshll.u32 %s4466_s6, 4  ;;  %s78_s30 = int_to_ptr.hbm [resolvable:$true] %s77_s30 }
   0x9   :  { %s49_s28 = sshll.u32 %s3804_s27, 4  ;;  %s3805_s18 = smov 16   ;;  %s50_s28 = int_to_ptr.vmem [resolvable:$true] %s49_s28 }
   0xa   :  { %s3806_s19 = smov 1   ;;  %s3807_s1 = smov [#allocation8]  }
   0xb   :  { %55 = dma.hbm_to_vmem [thread:$0]  %s48_s26, 64, %s50_s28, [#allocation6], %s3805_s18, %s3805_s18, %s3806_s19  }
   0xc   :  { %s79_s20 = sshll.u32 %s3807_s1, 4  ;;  %s113_s22 = sshll.u32 %s4473_s13, 4  ;;  %s80_s20 = int_to_ptr.vmem [resolvable:$true] %s79_s20  ;;  %s114_s22 = int_to_ptr.hbm [resolvable:$true] %s113_s22 }
   0xd   :  { %85 = dma.hbm_to_vmem [thread:$0]  %s78_s30, 64, %s80_s20, [#allocation9], %s3805_s18, %s3805_s18, %s3806_s19  }
   0xe   :  { %s4481_s24 = sld [smem:[#allocation23_spill]]  ;;  %s3808_s27 = smov [#allocation11]  }
   0xf   :  { %s115_s29 = sshll.u32 %s3808_s27, 4  ;;  %s3809_s26 = smov [#allocation2]   ;;  %s116_s29 = int_to_ptr.vmem [resolvable:$true] %s115_s29 }
  0x10   :  { %121 = dma.hbm_to_vmem [thread:$0]  %s114_s22, 64, %s116_s29, [#allocation12], %s3805_s18, %s3805_s18, %s3806_s19  }
  0x11   :  { %s34_s13 = sshll.u32 %s3809_s26, 4  ;;  %s3810_s28 = smov 128   ;;  %s35_s13 = int_to_ptr.vmem [resolvable:$true] %s34_s13 }
  0x12   :  { %s3811_s0 = smov 8   ;;  %s62_s20 = sshll.u32 %s4464_s4, 4  ;;  %s63_s20 = int_to_ptr.hbm [resolvable:$true] %s62_s20 }
  0x13   :  { %s3812_s21 = smov [#allocation7]   ;;  %s96_s22 = sshll.u32 %s4470_s10, 4  ;;  %s97_s22 = int_to_ptr.hbm [resolvable:$true] %s96_s22 }
  0x14   :  { %s32_s25 = sshll.u32 %s4481_s24, 4  ;;  %s64_s2 = sshll.u32 %s3812_s21, 4  ;;  %s33_s25 = int_to_ptr.hbm [resolvable:$true] %s32_s25  ;;  %s65_s2 = int_to_ptr.vmem [resolvable:$true] %s64_s2 }
  0x15   :  { %40 = dma.hbm_to_vmem [thread:$0]  %s33_s25, 256, %s35_s13, [#allocation3], %s3810_s28, %s3810_s28, %s3811_s0  }
  0x16   :  { %70 = dma.hbm_to_vmem [thread:$0]  %s63_s20, 64, %s65_s2, [#allocation6], %s3805_s18, %s3805_s18, %s3806_s19  }
  0x17   :  { %s3813_s24 = smov [#allocation10]   ;;  %s126_s26 = sshll.u32 %s4474_s14, 4  ;;  %s127_s26 = int_to_ptr.hbm [resolvable:$true] %s126_s26 }
  0x18   :  { %s98_s27 = sshll.u32 %s3813_s24, 4  ;;  %s139_s10 = sshll.u32 %s4475_s15, 4  ;;  %s99_s27 = int_to_ptr.vmem [resolvable:$true] %s98_s27  ;;  %s140_s10 = int_to_ptr.hbm [resolvable:$true] %s139_s10 }
  0x19   :  { %104 = dma.hbm_to_vmem [thread:$0]  %s97_s22, 64, %s99_s27, [#allocation9], %s3805_s18, %s3805_s18, %s3806_s19  }
  0x1a   :  { %s3814_s30 = smov [#allocation13]   ;;  %s3815_s20 = smov [#allocation14]  }
  0x1b   :  { %s128_s1 = sshll.u32 %s3814_s30, 4  ;;  %s141_s14 = sshll.u32 %s3815_s20, 4  ;;  %s129_s1 = int_to_ptr.vmem [resolvable:$true] %s128_s1  ;;  %s142_s14 = int_to_ptr.vmem [resolvable:$true] %s141_s14 }
  0x1c   :  { %134 = dma.hbm_to_vmem [thread:$0]  %s127_s26, 64, %s129_s1, [#allocation12], %s3805_s18, %s3805_s18, %s3806_s19  }
  0x1d   :  { %147 = dma.hbm_to_vmem [thread:$0]  %s140_s10, 64, %s142_s14, [#allocation15], %s3805_s18, %s3805_s18, %s3806_s19  }
  0x1e   :  { %3792 = dma.done.wait [#allocation3], 256  }
  0x1f   :  { %3793 = vsyncadd [#allocation3], 4294967040 }
  0x20   :  { %3794 = dma.done.wait [#allocation6], 128  }
  0x21   :  { %3795 = vsyncadd [#allocation6], 4294967168 }
  0x22   :  { %3796 = dma.done.wait [#allocation9], 128  }
  0x23   :  { %3797 = vsyncadd [#allocation9], 4294967168 }
  0x24   :  { %3798 = dma.done.wait [#allocation12], 128  }
  0x25   :  { %3799 = vsyncadd [#allocation12], 4294967168 }
  0x26   :  { %3800 = dma.done.wait [#allocation15], 64  }
  0x27   :  { %3801 = vsyncadd [#allocation15], 4294967232  ;;  %s4482_s2 = sld [smem:[#allocation24_spill]]  ;;  %v3963_v2 = vld [vmem:[#allocation2] sm:$0xff]  ;;  %v3965_v3 = vld [vmem:[#allocation2 + $0x8] sm:$0xff]  ;;  %vm247_vm0 = vcmask 261120  }
  0x28   :  { %v3324_v4 = vld [vmem:[%s4463_s3 + $0x8] sm:$0xff]  ;;  %v3325_v6 = vld [vmem:[%s4465_s5] sm:$0xff]  ;;  %v231_v7 = vpack.c.bf16 %v3965_v3, %v3963_v2  ;;  %v3438_v9 = vld [vmem:[#allocation5] ss:$0 sm:$0xff]  ;;  %s3816_s13 = smov 112   ;;  %vm323_vm1 = vcmask 130048  }
  0x29   :  { %v3326_v5 = vld [vmem:[%s4465_s5 + $0x8] sm:$0xff]  ;;  %v3323_v8 = vld [vmem:[%s4463_s3] sm:$0xff]  ;;  %v3439_v14 = vld [vmem:[#allocation7] ss:$0 sm:$0xff]  ;;  %vm376_vm2 = vcmask 64512   ;;  %s3818_s21 = smov [#allocation16]  }
  0x2a   :  { %315 = vmatpush.bf16.msra.mxu2 %v3326_v5  ;;  %v3440_v19 = vld [vmem:[#allocation8] ss:$0 sm:$0xff]  ;;  %s2829_s6 = sshll.u32 %s3818_s21, 4  ;;  %s2830_s6 = int_to_ptr.vmem [resolvable:$true] %s2829_s6 }
  0x2d   :  { %v3322_v0 = vld [vmem:[%s4482_s2 + $0x8] sm:$0xff]  ;;  %v3321_v1 = vld [vmem:[%s4482_s2] sm:$0xff] }
  0x2e   :  { %257 = vmatpush.bf16.msra.mxu1 %v3322_v0  ;;  %316 = vmatpush.bf16.msra.mxu2 %v3325_v6 }
  0x31   :  { %2874 = vmatmul.msk.bf16.vlgmr.msra.gmra.mxu2 %vm247_vm0, %v231_v7 }
  0x32   :  { %258 = vmatpush.bf16.msra.mxu1 %v3321_v1 }
  0x35   :  { %2856 = vmatmul.msk.bf16.vlgmr.msra.gmra.mxu1 %vm247_vm0, %v231_v7 }
  0x36   :  { %286 = vmatpush.bf16.msrb.mxu1 %v3324_v4 }
  0x3a   :  { %287 = vmatpush.bf16.msrb.mxu1 %v3323_v8 }
  0x45   :  { %2865 = vmatmul.msk.bf16.vlgmr.msrb.gmra.mxu1 %vm247_vm0, %v231_v7 }
  0xb2   :  { %v260_v10 = vpop.f32.mrf.mxu1 }
  0xb3   :  { %v261_v11 = vadd.f32 %v3438_v9, %v260_v10 }
  0xb4   :  { %v318_v20 = vpop.f32.mrf.mxu2 }
  0xb5   :  { %445 = vrot.lane.b32.xlu2 %v261_v11, %s3816_s13  ;;  %v3992_v21 = vadd.f32 %v3440_v19, %v318_v20 }
  0xba   :  { %v262_v12 = vpop.f32.mrf.mxu1 }
  0xbb   :  { %v263_v13 = vadd.f32 %v3438_v9, %v262_v12  ;;  %v3328_v9 = vld [vmem:[%s4467_s7 + $0x8] sm:$0xff] }
  0xbc   :  { %v320_v22 = vpop.f32.mrf.mxu2 }
  0xbd   :  { %473 = vrot.lane.b32.xlu2 %v263_v13, %s3816_s13  ;;  %v321_v23 = vadd.f32 %v3440_v19, %v320_v22 }
  0xbf   :  { %440 = vmatpush.msrb.mxu2 %v321_v23 }
  0xc2   :  { %v289_v15 = vpop.f32.mrf.mxu1 }
  0xc3   :  { %v290_v16 = vadd.f32 %v3439_v14, %v289_v15 }
  0xc5   :  { %447 = vrot.lane.b32.xlu1 %v290_v16, %s3816_s13  ;;  %2875 = vmatpush.xpose.msk.msra.mxu3 %vm323_vm1, %v290_v16 }
  0xc8   :  { %2876 = vmatmul.msk.f32.vlgmr.msra.gmra.mxu3 %vm323_vm1, %v261_v11 }
  0xca   :  { %v291_v17 = vpop.f32.mrf.mxu1 }
  0xcb   :  { %v292_v18 = vadd.f32 %v3439_v14, %v291_v17  ;;  %v3327_v14 = vld [vmem:[%s4467_s7] sm:$0xff] }
  0xcd   :  { %475 = vrot.lane.b32.xlu1 %v292_v18, %s3816_s13  ;;  %2877 = vmatpush.xpose.msk.msrb.mxu3 %vm323_vm1, %v292_v18 }
  0xd0   :  { %2878 = vmatmul.msk.f32.vlgmr.msrb.gmra.mxu3 %vm323_vm1, %v263_v13 }
  0xd1   :  { %417 = vmatpush.msra.mxu3 %v3992_v21 }
 0x10f   :  { %v446_v25 = vpop.permute.xlu2 %445 }
 0x117   :  { %v474_v47 = vpop.permute.xlu2 %473 }
 0x137   :  { %v448_v24 = vpop.permute.xlu1 %447 }
 0x138   :  { %2881 = vmatpush.xpose.msk.msra.mxu1 %vm323_vm1, %v448_v24 }
 0x13b   :  { %2882 = vmatmul.msk.f32.vlgmr.msra.gmra.mxu1 %vm323_vm1, %v446_v25 }
 0x13c   :  { %612 = vmatpush.bf16.msrb.mxu1 %v3328_v9 }
 0x13f   :  { %v476_v26 = vpop.permute.xlu1 %475 }
 0x140   :  { %2883 = vmatpush.xpose.msk.msra.mxu2 %vm323_vm1, %v476_v26  ;;  %613 = vmatpush.bf16.msrb.mxu1 %v3327_v14 }
 0x14b   :  { %v347_v27 = vpop.f32.mrf.mxu3 }
 0x14c   :  { %v377_v37 = vsel %vm376_vm2, %v347_v27, -inf }
 0x153   :  { %v373_v28 = vpop.f32.mrf.mxu3 }
 0x154   :  { %v380_v29 = vsel %vm376_vm2, %v373_v28, -inf }
 0x155   :  { %381 = vmax.xlane.f32.xlu0 %v380_v29 }
 0x1b8   :  { %v470_v30 = vpop.f32.mrf.mxu1 }
 0x1b9   :  { %v501_v31 = vsel %vm376_vm2, %v470_v30, -inf }
 0x1ba   :  { %502 = vmax.xlane.f32.xlu1 %v501_v31 }
 0x1c8   :  { %v382_v32 = vpop.xlane.xlu0 %381 }
 0x1c9   :  { %v384_v33 = vsub.f32 %v373_v28, %v382_v32 }
 0x1cb   :  { %v387_v34 = vmul.f32 1.442695, %v384_v33 }
 0x1cd   :  { %3478 = vpow2.f32 %v387_v34 }
 0x1d3   :  { %v3479_v35 = vpop.eup %3478 }
 0x1d4   :  { %v392_v36 = vsel %vm376_vm2, %v3479_v35, 0.0 }
 0x1d5   :  { %393 = vadd.xlane.f32.xlu0 %v392_v36 }
 0x1dd   :  { %378 = vmax.xlane.f32.xlu0 %v377_v37 }
 0x22d   :  { %v503_v40 = vpop.xlane.xlu1 %502 }
 0x22e   :  { %v507_v44 = vsub.f32 %v470_v30, %v503_v40  ;;  %v3817_v30 = vmov 32.0  }
 0x230   :  { %v509_v46 = vmul.f32 1.442695, %v507_v44 }
 0x248   :  { %v394_v38 = vpop.xlane.xlu0 %393 }
 0x249   :  { %3480 = vrcp.f32 %v394_v38 }
 0x24f   :  { %v3481_v39 = vpop.eup %3480 }
 0x250   :  { %v379_v41 = vpop.xlane.xlu0 %378  ;;  %v398_v42 = vmul.f32 %v3481_v39, %v3479_v35 }
 0x251   :  { %v383_v43 = vsub.f32 %v347_v27, %v379_v41 }
 0x252   :  { %2880 = vmatmul.msk.f32.vlgmr.msrb.gmra.mxu2 %vm376_vm2, %v398_v42 }
 0x253   :  { %v385_v45 = vmul.f32 1.442695, %v383_v43 }
 0x255   :  { %3482 = vpow2.f32 %v385_v45  ;;  %v3330_v45 = vld [vmem:[%s4469_s9 + $0x8] sm:$0xff] }
 0x256   :  { %3484 = vpow2.f32 %v509_v46  ;;  %708 = vmatpush.bf16.msrb.mxu2 %v3330_v45 }
 0x25a   :  { %2884 = vmatmul.msk.f32.vlgmr.msra.gmra.mxu2 %vm323_vm1, %v474_v47 }
 0x25b   :  { %v3483_v48 = vpop.eup %3482 }
 0x25c   :  { %v389_v49 = vsel %vm376_vm2, %v3483_v48, 0.0  ;;  %v3485_v50 = vpop.eup %3484 }
 0x25d   :  { %390 = vadd.xlane.f32.xlu0 %v389_v49  ;;  %v513_v51 = vsel %vm376_vm2, %v3485_v50, 0.0 }
 0x265   :  { %514 = vadd.xlane.f32.xlu0 %v513_v51 }
 0x2d0   :  { %v391_v52 = vpop.xlane.xlu0 %390 }
 0x2d1   :  { %3486 = vrcp.f32 %v391_v52 }
 0x2d5   :  { %v442_v53 = vpop.f32.mrf.mxu2 }
 0x2d7   :  { %v3487_v54 = vpop.eup %3486 }
 0x2d8   :  { %v397_v55 = vmul.f32 %v3487_v54, %v3483_v48  ;;  %v515_v0 = vpop.xlane.xlu0 %514  ;;  %v3329_v48 = vld [vmem:[%s4469_s9] sm:$0xff] }
 0x2d9   :  { %709 = vmatpush.bf16.msrb.mxu2 %v3329_v48  ;;  %v3340_v48 = vld [vmem:[%s4482_s2 + $0x18] sm:$0xff] }
 0x2da   :  { %2879 = vmatmul.msk.f32.vlgmr.msra.gmra.mxu3 %vm376_vm2, %v397_v55 }
 0x2dd   :  { %v498_v56 = vpop.f32.mrf.mxu2 }
 0x2de   :  { %v504_v57 = vsel %vm376_vm2, %v498_v56, -inf }
 0x2df   :  { %505 = vmax.xlane.f32.xlu2 %v504_v57  ;;  %v3336_v57 = vld [vmem:[%s4471_s11 + $0x28] sm:$0xff] }
 0x2f7   :  { %551 = vrot.lane.b32.xlu2 %v321_v23, %s3816_s13 }
 0x352   :  { %v506_v58 = vpop.xlane.xlu2 %505 }
 0x353   :  { %v508_v59 = vsub.f32 %v498_v56, %v506_v58 }
 0x355   :  { %v511_v60 = vmul.f32 1.442695, %v508_v59 }
 0x357   :  { %3488 = vpow2.f32 %v511_v60  ;;  %v3335_v60 = vld [vmem:[%s4471_s11 + $0x20] sm:$0xff] }
 0x35a   :  { %v552_v61 = vpop.permute.xlu2 %551 }
 0x35b   :  { %572 = vmatpush.msra.mxu0 %v552_v61 }
 0x35d   :  { %v3489_v62 = vpop.eup %3488  ;;  %v419_v10 = vpop.f32.mrf.mxu3  ;;  %927 = vmatpush.bf16.msrb.mxu0 %v3340_v48 }
 0x35e   :  { %v516_v63 = vsel %vm376_vm2, %v3489_v62, 0.0 }
 0x35f   :  { %517 = vadd.xlane.f32.xlu0 %v516_v63 }
 0x373   :  { %524 = vrot.lane.b32.xlu0 %v3992_v21, %s3816_s13  ;;  %v3441_v21 = vld [vmem:[%s4468_s8] ss:$0 sm:$0xff] }
 0x3d2   :  { %v518_v1 = vpop.xlane.xlu0 %517 }
 0x3d3   :  { %3490 = vrcp.f32 %v518_v1 }
 0x3d4   :  { %3492 = vrcp.f32 %v515_v0 }
 0x3d5   :  { %3494 = vrcp.f32 %v3817_v30  ;;  %v3445_v30 = vld [vmem:[%s4472_s12] ss:$0 sm:$0xff] }
 0x3d9   :  { %v3491_v4 = vpop.eup %3490 }
 0x3da   :  { %v522_v5 = vmul.f32 %v3491_v4, %v3489_v62  ;;  %v3493_v6 = vpop.eup %3492 }
 0x3db   :  { %v521_v7 = vmul.f32 %v3493_v6, %v3485_v50  ;;  %v3495_v31 = vpop.eup %3494  ;;  %v3338_v50 = vld [vmem:[%s4471_s11 + $0x38] sm:$0xff] }
 0x3dc   :  { %2886 = vmatmul.msk.f32.vlgmr.msra.gmra.mxu0 %vm376_vm2, %v522_v5  ;;  %v629_v32 = vmul.f32 32.0, %v3495_v31  ;;  %vm633_vm3 = vweird.f32 %v3495_v31 }
 0x3de   :  { %v630_v33 = vsub.f32 1.0, %v629_v32 }
 0x3e0   :  { %v631_v34 = vmul.f32 %v3495_v31, %v630_v33 }
 0x3e2   :  { %v632_v35 = vadd.f32 %v3495_v31, %v631_v34 }
 0x3e4   :  { %v4031_v36 = vsel %vm633_vm3, %v3495_v31, %v632_v35 }
 0x3e5   :  { %v525_v8 = vpop.permute.xlu0 %524 }
 0x3e6   :  { %545 = vmatpush.msrb.mxu3 %v525_v8 }
 0x3e7   :  { %2885 = vmatmul.msk.f32.vlgmr.msrb.gmra.mxu3 %vm376_vm2, %v521_v7  ;;  %v3442_v7 = vld [vmem:[#allocation11] ss:$0 sm:$0xff] }
 0x3e8   :  { %770 = vmatpush.bf16.msra.mxu3 %v3338_v50  ;;  %v3344_v50 = vld [vmem:[%s4465_s5 + $0x18] sm:$0xff] }
 0x3e9   :  { %985 = vmatpush.bf16.msra.mxu2 %v3344_v50 }
 0x459   :  { %v574_v11 = vpop.f32.mrf.mxu0 }
 0x46a   :  { %v547_v12 = vpop.f32.mrf.mxu3 }
 0x46b   :  { %v3408_v13 = vpack.i.bf16 %v574_v11, %v547_v12  ;;  %v3443_v11 = vld [vmem:[#allocation13] ss:$0 sm:$0xff] }
 0x46d   :  { %3409 = vrot.lane.b32.xlu1 %v3408_v13, %s3805_s18 }
 0x4df   :  { %v3410_v15 = vpop.permute.xlu1 %3409 }
 0x4e0   :  { %v3412_v16 = vunpack.i.h.bf16 %v3410_v15  ;;  %v3411_v17 = vunpack.i.l.bf16 %v3410_v15 }
 0x4e2   :  { %v586_v18 = vsel %vm323_vm1, %v442_v53, %v3412_v16  ;;  %v585_v19 = vsel %vm323_vm1, %v419_v10, %v3411_v17  ;;  %v3337_v53 = vld [vmem:[%s4471_s11 + $0x30] sm:$0xff] }
 0x4e3   :  { %v587_v20 = vpack.c.bf16 %v586_v18, %v585_v19  ;;  %771 = vmatpush.bf16.msra.mxu3 %v3337_v53  ;;  %v3334_v18 = vld [vmem:[%s4471_s11 + $0x18] sm:$0xff]  ;;  %v3333_v19 = vld [vmem:[%s4471_s11 + $0x10] sm:$0xff] }
 0x4e4   :  { %v3341_v53 = vld [vmem:[%s4463_s3 + $0x10] sm:$0xff] }
 0x4e5   :  { %2895 = vmatmul.msk.bf16.vlgmr.msrb.gmra.mxu1 %vm247_vm0, %v587_v20  ;;  %v3332_v20 = vld [vmem:[%s4471_s11 + $0x8] sm:$0xff] }
 0x4e7   :  { %772 = vmatpush.bf16.msra.mxu3 %v3336_v57 }
 0x4eb   :  { %773 = vmatpush.bf16.msra.mxu3 %v3335_v60 }
 0x4ef   :  { %774 = vmatpush.bf16.msra.mxu3 %v3334_v18 }
 0x4f3   :  { %775 = vmatpush.bf16.msra.mxu3 %v3333_v19 }
 0x4f7   :  { %776 = vmatpush.bf16.msra.mxu3 %v3332_v20 }
 0x562   :  { %v615_v22 = vpop.f32.mrf.mxu1 }
 0x563   :  { %v616_v23 = vadd.f32 %v3441_v21, %v615_v22 }
 0x565   :  { %v620_v24 = vadd.f32 %v616_v23, %v3963_v2  ;;  %v3444_v23 = vld [vmem:[#allocation10] ss:$0 sm:$0xff] }
 0x567   :  { %v622_v25 = vsel %vm247_vm0, %v620_v24, 0.0 }
 0x568   :  { %623 = vadd.xlane.f32.xlu0 %v622_v25 }
 0x56a   :  { %v617_v26 = vpop.f32.mrf.mxu1 }
 0x56b   :  { %v618_v27 = vadd.f32 %v3441_v21, %v617_v26  ;;  %v3331_v21 = vld [vmem:[%s4471_s11] sm:$0xff] }
 0x56c   :  { %777 = vmatpush.bf16.msra.mxu3 %v3331_v21  ;;  %v3449_v21 = vld [vmem:[#allocation7 + $0x1] ss:$0 sm:$0xff] }
 0x56d   :  { %v621_v28 = vadd.f32 %v618_v27, %v3965_v3 }
 0x56f   :  { %v625_v29 = vsel %vm247_vm0, %v621_v28, 0.0 }
 0x570   :  { %626 = vadd.xlane.f32.xlu2 %v625_v29 }
 0x5db   :  { %v624_v2 = vpop.xlane.xlu0 %623 }
 0x5dc   :  { %v635_v37 = vmul.f32 %v4031_v36, %v624_v2 }
 0x5de   :  { %v637_v38 = vsub.f32 %v620_v24, %v635_v37 }
 0x5e0   :  { %v639_v39 = vmul.f32 %v637_v38, %v637_v38 }
 0x5e2   :  { %v641_v3 = vsel %vm247_vm0, %v639_v39, 0.0 }
 0x5e3   :  { %v627_v40 = vpop.xlane.xlu2 %626  ;;  %642 = vadd.xlane.f32.xlu1 %v641_v3 }
 0x5e4   :  { %v636_v41 = vmul.f32 %v4031_v36, %v627_v40 }
 0x5e6   :  { %v638_v42 = vsub.f32 %v621_v28, %v636_v41 }
 0x5e8   :  { %v640_v43 = vmul.f32 %v638_v42, %v638_v42 }
 0x5ea   :  { %v644_v44 = vsel %vm247_vm0, %v640_v43, 0.0 }
 0x5eb   :  { %645 = vadd.xlane.f32.xlu0 %v644_v44 }
 0x656   :  { %v643_v46 = vpop.xlane.xlu1 %642 }
 0x657   :  { %v647_v47 = vmul.f32 %v643_v46, %v4031_v36 }
 0x659   :  { %v649_v49 = vadd.f32 1e-05, %v647_v47 }
 0x65b   :  { %3496 = vrsqrt.f32 %v649_v49  ;;  %vm657_vm5 = vweird.f32 %v649_v49 }
 0x65e   :  { %v646_v51 = vpop.xlane.xlu0 %645 }
 0x65f   :  { %v648_v52 = vmul.f32 %v646_v51, %v4031_v36 }
 0x661   :  { %v3497_v54 = vpop.eup %3496  ;;  %v650_v55 = vadd.f32 1e-05, %v648_v52  ;;  %v3339_v52 = vld [vmem:[%s4482_s2 + $0x10] sm:$0xff] }
 0x662   :  { %v652_v56 = vmul.f32 %v3497_v54, %v649_v49  ;;  %vm658_vm4 = vweird.f32 %v3497_v54  ;;  %v3342_v49 = vld [vmem:[%s4463_s3 + $0x18] sm:$0xff]  ;;  %928 = vmatpush.bf16.msrb.mxu0 %v3339_v52 }
 0x663   :  { %3498 = vrsqrt.f32 %v650_v55  ;;  %vm659_vm6 = vmor %vm657_vm5, %vm658_vm4  ;;  %vm667_vm8 = vweird.f32 %v650_v55  ;;  %956 = vmatpush.bf16.msra.mxu1 %v3342_v49 }
 0x664   :  { %v653_v58 = vmul.f32 %v3497_v54, %v652_v56 }
 0x666   :  { %v654_v59 = vmul.f32 0.5, %v653_v58 }
 0x667   :  { %957 = vmatpush.bf16.msra.mxu1 %v3341_v53 }
 0x668   :  { %v655_v61 = vsub.f32 1.5, %v654_v59 }
 0x669   :  { %v3499_v62 = vpop.eup %3498 }
 0x66a   :  { %v656_v63 = vmul.f32 %v3497_v54, %v655_v61  ;;  %v662_v0 = vmul.f32 %v3499_v62, %v650_v55  ;;  %vm668_vm7 = vweird.f32 %v3499_v62  ;;  %v3343_v55 = vld [vmem:[%s4465_s5 + $0x10] sm:$0xff] }
 0x66b   :  { %vm669_vm9 = vmor %vm667_vm8, %vm668_vm7  ;;  %986 = vmatpush.bf16.msra.mxu2 %v3343_v55 }
 0x66c   :  { %v663_v1 = vmul.f32 %v3499_v62, %v662_v0  ;;  %v660_v4 = vsel %vm659_vm6, %v3497_v54, %v656_v63 }
 0x66d   :  { %v671_v8 = vmul.f32 %v660_v4, %v637_v38 }
 0x66e   :  { %v664_v5 = vmul.f32 0.5, %v663_v1 }
 0x66f   :  { %v676_v12 = vmul.f32 %v3442_v7, %v671_v8 }
 0x670   :  { %v665_v6 = vsub.f32 1.5, %v664_v5 }
 0x671   :  { %v681_v15 = vadd.f32 %v3443_v11, %v676_v12 }
 0x672   :  { %v666_v9 = vmul.f32 %v3499_v62, %v665_v6 }
 0x674   :  { %v670_v10 = vsel %vm669_vm9, %v3499_v62, %v666_v9 }
 0x675   :  { %v672_v13 = vmul.f32 %v670_v10, %v638_v42 }
 0x677   :  { %v677_v14 = vmul.f32 %v3442_v7, %v672_v13 }
 0x679   :  { %v682_v16 = vadd.f32 %v3443_v11, %v677_v14  ;;  %v3446_v11 = vld [vmem:[#allocation14] ss:$0 sm:$0xff] }
 0x67b   :  { %v683_v17 = vpack.c.bf16 %v682_v16, %v681_v15 }
 0x67d   :  { %2904 = vmatmul.msk.bf16.vlgmr.msrb.gmra.mxu2 %vm247_vm0, %v683_v17 }
 0x700   :  { %v711_v22 = vpop.f32.mrf.mxu2 }
 0x701   :  { %v712_v24 = vadd.f32 %v3444_v23, %v711_v22  ;;  %v3448_v22 = vld [vmem:[#allocation5 + $0x1] ss:$0 sm:$0xff] }
 0x703   :  { %v716_v27 = vmax.f32 %v712_v24, 0.0 }
 0x708   :  { %v713_v25 = vpop.f32.mrf.mxu2 }
 0x709   :  { %v714_v26 = vadd.f32 %v3444_v23, %v713_v25 }
 0x70b   :  { %v717_v28 = vmax.f32 %v714_v26, 0.0 }
 0x70d   :  { %v718_v29 = vpack.c.bf16 %v717_v28, %v716_v27  ;;  %v3450_v27 = vld [vmem:[#allocation8 + $0x1] ss:$0 sm:$0xff] }
 0x70f   :  { %778 = vmatmul.bf16.vlgmr.msra.gmra.mxu3 %v718_v29 }
 0x792   :  { %v779_v31 = vpop.f32.mrf.mxu3 }
 0x793   :  { %v780_v32 = vadd.f32 %v3445_v30, %v779_v31 }
 0x795   :  { %v784_v33 = vadd.f32 %v780_v32, %v681_v15 }
 0x797   :  { %v786_v34 = vsel %vm247_vm0, %v784_v33, 0.0 }
 0x798   :  { %787 = vadd.xlane.f32.xlu0 %v786_v34 }
 0x79a   :  { %v781_v35 = vpop.f32.mrf.mxu3 }
 0x79b   :  { %v782_v2 = vadd.f32 %v3445_v30, %v781_v35 }
 0x79d   :  { %v785_v37 = vadd.f32 %v782_v2, %v682_v16  ;;  %v3447_v16 = vld [vmem:[%s4476_s16] ss:$0 sm:$0xff] }
 0x79f   :  { %v789_v38 = vsel %vm247_vm0, %v785_v37, 0.0 }
 0x7a0   :  { %790 = vadd.xlane.f32.xlu2 %v789_v38 }
 0x80b   :  { %v788_v39 = vpop.xlane.xlu0 %787 }
 0x80c   :  { %v792_v3 = vmul.f32 %v788_v39, %v4031_v36 }
 0x80e   :  { %v794_v40 = vsub.f32 %v784_v33, %v792_v3 }
 0x810   :  { %v796_v41 = vmul.f32 %v794_v40, %v794_v40 }
 0x812   :  { %v798_v42 = vsel %vm247_vm0, %v796_v41, 0.0 }
 0x813   :  { %v791_v43 = vpop.xlane.xlu2 %790  ;;  %799 = vadd.xlane.f32.xlu1 %v798_v42 }
 0x814   :  { %v793_v44 = vmul.f32 %v791_v43, %v4031_v36 }
 0x816   :  { %v795_v45 = vsub.f32 %v785_v37, %v793_v44 }
 0x818   :  { %v797_v46 = vmul.f32 %v795_v45, %v795_v45 }
 0x81a   :  { %v801_v47 = vsel %vm247_vm0, %v797_v46, 0.0 }
 0x81b   :  { %802 = vadd.xlane.f32.xlu0 %v801_v47 }
 0x886   :  { %v800_v51 = vpop.xlane.xlu1 %799 }
 0x887   :  { %v804_v54 = vmul.f32 %v800_v51, %v4031_v36 }
 0x889   :  { %v806_v56 = vadd.f32 1e-05, %v804_v54 }
 0x88b   :  { %3500 = vrsqrt.f32 %v806_v56  ;;  %vm814_vm11 = vweird.f32 %v806_v56 }
 0x88e   :  { %v803_v57 = vpop.xlane.xlu0 %802 }
 0x88f   :  { %v805_v58 = vmul.f32 %v803_v57, %v4031_v36 }
 0x891   :  { %v3501_v59 = vpop.eup %3500  ;;  %v807_v60 = vadd.f32 1e-05, %v805_v58 }
 0x892   :  { %v809_v61 = vmul.f32 %v3501_v59, %v806_v56  ;;  %vm815_vm10 = vweird.f32 %v3501_v59 }
 0x893   :  { %3502 = vrsqrt.f32 %v807_v60  ;;  %vm816_vm12 = vmor %vm814_vm11, %vm815_vm10  ;;  %vm824_vm14 = vweird.f32 %v807_v60 }
 0x894   :  { %v810_v62 = vmul.f32 %v3501_v59, %v809_v61 }
 0x896   :  { %v811_v63 = vmul.f32 0.5, %v810_v62 }
 0x898   :  { %v812_v0 = vsub.f32 1.5, %v811_v63 }
 0x899   :  { %v3503_v1 = vpop.eup %3502 }
 0x89a   :  { %v813_v4 = vmul.f32 %v3501_v59, %v812_v0  ;;  %v819_v5 = vmul.f32 %v3503_v1, %v807_v60  ;;  %vm825_vm13 = vweird.f32 %v3503_v1 }
 0x89b   :  { %vm826_vm15 = vmor %vm824_vm14, %vm825_vm13 }
 0x89c   :  { %v820_v6 = vmul.f32 %v3503_v1, %v819_v5  ;;  %v817_v7 = vsel %vm816_vm12, %v3501_v59, %v813_v4 }
 0x89d   :  { %v828_v10 = vmul.f32 %v817_v7, %v794_v40 }
 0x89e   :  { %v821_v8 = vmul.f32 0.5, %v820_v6 }
 0x89f   :  { %v833_v15 = vmul.f32 %v3446_v11, %v828_v10 }
 0x8a0   :  { %v822_v9 = vsub.f32 1.5, %v821_v8 }
 0x8a1   :  { %v4102_v18 = vadd.f32 %v3447_v16, %v833_v15 }
 0x8a2   :  { %v823_v12 = vmul.f32 %v3503_v1, %v822_v9 }
 0x8a4   :  { %v827_v13 = vsel %vm826_vm15, %v3503_v1, %v823_v12 }
 0x8a5   :  { %v829_v14 = vmul.f32 %v827_v13, %v795_v45 }
 0x8a7   :  { %v834_v17 = vmul.f32 %v3446_v11, %v829_v14 }
 0x8a9   :  { %v4104_v19 = vadd.f32 %v3447_v16, %v834_v17 }
 0x8ab   :  { %v902_v20 = vpack.c.bf16 %v4104_v19, %v4102_v18 }
 0x8ad   :  { %2984 = vmatmul.msk.bf16.vlgmr.msrb.gmra.mxu0 %vm247_vm0, %v902_v20  ;;  %2993 = vmatmul.msk.bf16.vlgmr.msra.gmra.mxu1 %vm247_vm0, %v902_v20 }
 0x8ae   :  { %3002 = vmatmul.msk.bf16.vlgmr.msra.gmra.mxu2 %vm247_vm0, %v902_v20 }
 0x92a   :  { %v930_v23 = vpop.f32.mrf.mxu0  ;;  %v959_v24 = vpop.f32.mrf.mxu1 }
 0x92b   :  { %v960_v25 = vadd.f32 %v3449_v21, %v959_v24  ;;  %v931_v26 = vadd.f32 %v3448_v22, %v930_v23  ;;  %v3346_v24 = vld [vmem:[%s4467_s7 + $0x18] sm:$0xff] }
 0x92d   :  { %1115 = vrot.lane.b32.xlu0 %v960_v25, %s3816_s13  ;;  %3003 = vmatpush.xpose.msk.msra.mxu0 %vm323_vm1, %v960_v25 }
 0x930   :  { %3004 = vmatmul.msk.f32.vlgmr.msra.gmra.mxu0 %vm323_vm1, %v931_v26 }
 0x931   :  { %v988_v28 = vpop.f32.mrf.mxu2 }
 0x932   :  { %v989_v29 = vadd.f32 %v3450_v27, %v988_v28  ;;  %v932_v30 = vpop.f32.mrf.mxu0  ;;  %v961_v31 = vpop.f32.mrf.mxu1 }
 0x933   :  { %v933_v32 = vadd.f32 %v3448_v22, %v932_v30  ;;  %v962_v33 = vadd.f32 %v3449_v21, %v961_v31 }
 0x934   :  { %1085 = vmatpush.msrb.mxu1 %v989_v29 }
 0x935   :  { %3005 = vmatpush.xpose.msk.msrb.mxu0 %vm323_vm1, %v962_v33  ;;  %1141 = vrot.lane.b32.xlu0 %v933_v32, %s3816_s13 }
 0x938   :  { %3006 = vmatmul.msk.f32.vlgmr.msrb.gmra.mxu0 %vm323_vm1, %v933_v32 }
 0x939   :  { %v990_v34 = vpop.f32.mrf.mxu2 }
 0x93a   :  { %v991_v35 = vadd.f32 %v3450_v27, %v990_v34 }
 0x93c   :  { %v3413_v2 = vpack.i.bf16 %v991_v35, %v989_v29  ;;  %1108 = vmatpush.msrb.mxu2 %v991_v35  ;;  %v3345_v29 = vld [vmem:[%s4467_s7 + $0x10] sm:$0xff] }
 0x99f   :  { %v1116_v37 = vpop.permute.xlu0 %1115 }
 0x9a0   :  { %3009 = vmatpush.xpose.msk.msra.mxu0 %vm323_vm1, %v1116_v37 }
 0x9a4   :  { %1280 = vmatpush.bf16.msrb.mxu0 %v3346_v24 }
 0x9a7   :  { %v1142_v50 = vpop.permute.xlu0 %1141 }
 0x9a8   :  { %1281 = vmatpush.bf16.msrb.mxu0 %v3345_v29  ;;  %v3350_v29 = vld [vmem:[%s4471_s11 + $0x48] sm:$0xff] }
 0x9ad   :  { %v1016_v38 = vpop.f32.mrf.mxu0 }
 0x9ae   :  { %v1045_v39 = vsel %vm376_vm2, %v1016_v38, -inf }
 0x9af   :  { %1046 = vmax.xlane.f32.xlu2 %v1045_v39 }
 0x9b5   :  { %v1042_v3 = vpop.f32.mrf.mxu0 }
 0x9b6   :  { %v1048_v40 = vsel %vm376_vm2, %v1042_v3, -inf }
 0x9b7   :  { %1049 = vmax.xlane.f32.xlu0 %v1048_v40 }
 0x9c7   :  { %1143 = vrot.lane.b32.xlu2 %v962_v33, %s3816_s13 }
 0xa22   :  { %v1047_v41 = vpop.xlane.xlu2 %1046 }
 0xa23   :  { %v1051_v42 = vsub.f32 %v1016_v38, %v1047_v41 }
 0xa25   :  { %v1053_v43 = vmul.f32 1.442695, %v1051_v42 }
 0xa27   :  { %3504 = vpow2.f32 %v1053_v43 }
 0xa2a   :  { %v1144_v44 = vpop.permute.xlu2 %1143  ;;  %v1050_v53 = vpop.xlane.xlu0 %1049 }
 0xa2b   :  { %3011 = vmatpush.xpose.msk.msra.mxu1 %vm323_vm1, %v1144_v44  ;;  %v1052_v54 = vsub.f32 %v1042_v3, %v1050_v53 }
 0xa2d   :  { %v3505_v45 = vpop.eup %3504  ;;  %v1055_v57 = vmul.f32 1.442695, %v1052_v54 }
 0xa2e   :  { %v1057_v46 = vsel %vm376_vm2, %v3505_v45, 0.0 }
 0xa2f   :  { %1058 = vadd.xlane.f32.xlu1 %v1057_v46 }
 0xa48   :  { %1113 = vrot.lane.b32.xlu1 %v931_v26, %s3816_s13 }
 0xaa2   :  { %v1059_v47 = vpop.xlane.xlu1 %1058 }
 0xaa3   :  { %3506 = vrcp.f32 %v1059_v47 }
 0xaa4   :  { %3508 = vpow2.f32 %v1055_v57  ;;  %v3356_v57 = vld [vmem:[%s4471_s11 + $0x78] sm:$0xff] }
 0xaa9   :  { %v3507_v48 = vpop.eup %3506 }
 0xaaa   :  { %v1065_v49 = vmul.f32 %v3507_v48, %v3505_v45  ;;  %v3509_v60 = vpop.eup %3508 }
 0xaab   :  { %v1060_v61 = vsel %vm376_vm2, %v3509_v60, 0.0 }
 0xaac   :  { %3007 = vmatmul.msk.f32.vlgmr.msrb.gmra.mxu1 %vm376_vm2, %v1065_v49 }
 0xab4   :  { %3012 = vmatmul.msk.f32.vlgmr.msra.gmra.mxu1 %vm323_vm1, %v1142_v50 }
 0xaba   :  { %v1114_v51 = vpop.permute.xlu1 %1113 }
 0xabb   :  { %3010 = vmatmul.msk.f32.vlgmr.msra.gmra.mxu0 %vm323_vm1, %v1114_v51 }
 0xb29   :  { %v4127_v52 = vpop.f32.mrf.mxu1 }
 0xb31   :  { %v1166_v55 = vpop.f32.mrf.mxu1 }
 0xb32   :  { %v1172_v56 = vsel %vm376_vm2, %v1166_v55, -inf }
 0xb33   :  { %1173 = vmax.xlane.f32.xlu1 %v1172_v56  ;;  %v3347_v56 = vld [vmem:[%s4469_s9 + $0x10] sm:$0xff] }
 0xb38   :  { %v1138_v58 = vpop.f32.mrf.mxu0 }
 0xb39   :  { %v1169_v59 = vsel %vm376_vm2, %v1138_v58, -inf }
 0xb3a   :  { %1170 = vmax.xlane.f32.xlu2 %v1169_v59 }
 0xb42   :  { %1061 = vadd.xlane.f32.xlu2 %v1060_v61 }
 0xb5a   :  { %3414 = vrot.lane.b32.xlu2 %v3413_v2, %s3816_s13  ;;  %v3451_v2 = vld [vmem:[%s4468_s8 + $0x1] ss:$0 sm:$0xff] }
 0xba6   :  { %v1174_v62 = vpop.xlane.xlu1 %1173 }
 0xba7   :  { %v1176_v63 = vsub.f32 %v1166_v55, %v1174_v62 }
 0xba9   :  { %v1179_v0 = vmul.f32 1.442695, %v1176_v63 }
 0xbab   :  { %3510 = vpow2.f32 %v1179_v0  ;;  %v3354_v0 = vld [vmem:[%s4471_s11 + $0x68] sm:$0xff] }
 0xbad   :  { %v1171_v1 = vpop.xlane.xlu2 %1170 }
 0xbae   :  { %v1175_v4 = vsub.f32 %v1138_v58, %v1171_v1 }
 0xbb0   :  { %v1177_v5 = vmul.f32 1.442695, %v1175_v4 }
 0xbb1   :  { %v3511_v6 = vpop.eup %3510 }
 0xbb2   :  { %3512 = vpow2.f32 %v1177_v5  ;;  %v1184_v7 = vsel %vm376_vm2, %v3511_v6, 0.0  ;;  %v3353_v5 = vld [vmem:[%s4471_s11 + $0x60] sm:$0xff] }
 0xbb3   :  { %1185 = vadd.xlane.f32.xlu1 %v1184_v7 }
 0xbb5   :  { %v1062_v8 = vpop.xlane.xlu2 %1061 }
 0xbb6   :  { %3514 = vrcp.f32 %v1062_v8 }
 0xbb8   :  { %v3513_v9 = vpop.eup %3512 }
 0xbb9   :  { %v1181_v10 = vsel %vm376_vm2, %v3513_v9, 0.0 }
 0xbba   :  { %1182 = vadd.xlane.f32.xlu0 %v1181_v10 }
 0xbbc   :  { %v3515_v11 = vpop.eup %3514 }
 0xbbd   :  { %v1066_v12 = vmul.f32 %v3515_v11, %v3509_v60  ;;  %v3415_v13 = vpop.permute.xlu2 %3414  ;;  %v3355_v60 = vld [vmem:[%s4471_s11 + $0x70] sm:$0xff] }
 0xbbe   :  { %v3417_v14 = vunpack.i.h.bf16 %v3415_v13  ;;  %v3416_v15 = vunpack.i.l.bf16 %v3415_v13 }
 0xbbf   :  { %3008 = vmatmul.msk.f32.vlgmr.msrb.gmra.mxu2 %vm376_vm2, %v1066_v12 }
 0xbc0   :  { %1213 = vmatpush.msra.mxu2 %v3416_v15  ;;  %1240 = vmatpush.msrb.mxu3 %v3417_v14  ;;  %v3452_v14 = vld [vmem:[#allocation11 + $0x1] ss:$0 sm:$0xff] }
 0xbc2   :  { %1431 = vmatpush.bf16.msrb.mxu2 %v3356_v57  ;;  %v3362_v57 = vld [vmem:[%s4465_s5 + $0x28] sm:$0xff] }
 0xbc6   :  { %1432 = vmatpush.bf16.msrb.mxu2 %v3355_v60 }
 0xbca   :  { %1433 = vmatpush.bf16.msrb.mxu2 %v3354_v0 }
 0xbce   :  { %1434 = vmatpush.bf16.msrb.mxu2 %v3353_v5 }
 0xc26   :  { %v1186_v16 = vpop.xlane.xlu1 %1185 }
 0xc27   :  { %3516 = vrcp.f32 %v1186_v16 }
 0xc2d   :  { %v3517_v17 = vpop.eup %3516  ;;  %v1183_v20 = vpop.xlane.xlu0 %1182 }
 0xc2e   :  { %v1190_v21 = vmul.f32 %v3517_v17, %v3511_v6  ;;  %3518 = vrcp.f32 %v1183_v20  ;;  %v3453_v20 = vld [vmem:[#allocation13 + $0x1] ss:$0 sm:$0xff] }
 0xc30   :  { %3014 = vmatmul.msk.f32.vlgmr.msrb.gmra.mxu3 %vm376_vm2, %v1190_v21 }
 0xc34   :  { %v3519_v22 = vpop.eup %3518 }
 0xc35   :  { %v1189_v23 = vmul.f32 %v3519_v22, %v3513_v9 }
 0xc37   :  { %3013 = vmatmul.msk.f32.vlgmr.msra.gmra.mxu2 %vm376_vm2, %v1189_v23 }
 0xc42   :  { %v1110_v25 = vpop.f32.mrf.mxu2 }
 0xcb3   :  { %v1242_v26 = vpop.f32.mrf.mxu3 }
 0xcba   :  { %v1215_v27 = vpop.f32.mrf.mxu2 }
 0xcbb   :  { %v3418_v28 = vpack.i.bf16 %v1242_v26, %v1215_v27  ;;  %v3352_v27 = vld [vmem:[%s4471_s11 + $0x58] sm:$0xff] }
 0xcbc   :  { %1435 = vmatpush.bf16.msrb.mxu2 %v3352_v27 }
 0xcbd   :  { %3419 = vrot.lane.b32.xlu0 %v3418_v28, %s3805_s18  ;;  %v3351_v28 = vld [vmem:[%s4471_s11 + $0x50] sm:$0xff] }
 0xcc0   :  { %1436 = vmatpush.bf16.msrb.mxu2 %v3351_v28 }
 0xcc4   :  { %1437 = vmatpush.bf16.msrb.mxu2 %v3350_v29 }
 0xd2f   :  { %v3420_v30 = vpop.permute.xlu0 %3419 }
 0xd30   :  { %v3422_v31 = vunpack.i.h.bf16 %v3420_v30  ;;  %v3421_v32 = vunpack.i.l.bf16 %v3420_v30  ;;  %v3349_v30 = vld [vmem:[%s4471_s11 + $0x40] sm:$0xff] }
 0xd31   :  { %1438 = vmatpush.bf16.msrb.mxu2 %v3349_v30  ;;  %v3458_v30 = vld [vmem:[#allocation7 + $0x2] ss:$0 sm:$0xff] }
 0xd32   :  { %v1254_v33 = vsel %vm323_vm1, %v1110_v25, %v3422_v31  ;;  %v1253_v34 = vsel %vm323_vm1, %v4127_v52, %v3421_v32  ;;  %v3454_v32 = vld [vmem:[#allocation10 + $0x1] ss:$0 sm:$0xff] }
 0xd33   :  { %v1255_v35 = vpack.c.bf16 %v1254_v33, %v1253_v34 }
 0xd35   :  { %3023 = vmatmul.msk.bf16.vlgmr.msrb.gmra.mxu0 %vm247_vm0, %v1255_v35 }
 0xdb2   :  { %v1283_v37 = vpop.f32.mrf.mxu0 }
 0xdb3   :  { %v1284_v38 = vadd.f32 %v3451_v2, %v1283_v37 }
 0xdb5   :  { %v1288_v39 = vadd.f32 %v1284_v38, %v4102_v18 }
 0xdb7   :  { %v1290_v3 = vsel %vm247_vm0, %v1288_v39, 0.0 }
 0xdb8   :  { %1291 = vadd.xlane.f32.xlu1 %v1290_v3 }
 0xdba   :  { %v1285_v40 = vpop.f32.mrf.mxu0 }
 0xdbb   :  { %v1286_v41 = vadd.f32 %v3451_v2, %v1285_v40 }
 0xdbd   :  { %v1289_v42 = vadd.f32 %v1286_v41, %v4104_v19  ;;  %v3348_v19 = vld [vmem:[%s4469_s9 + $0x18] sm:$0xff] }
 0xdbe   :  { %1369 = vmatpush.bf16.msrb.mxu1 %v3348_v19 }
 0xdbf   :  { %v1293_v43 = vsel %vm247_vm0, %v1289_v42, 0.0 }
 0xdc0   :  { %1294 = vadd.xlane.f32.xlu1 %v1293_v43 }
 0xdc2   :  { %1370 = vmatpush.bf16.msrb.mxu1 %v3347_v56  ;;  %v3360_v56 = vld [vmem:[%s4463_s3 + $0x28] sm:$0xff] }
 0xdc3   :  { %1617 = vmatpush.bf16.msra.mxu0 %v3360_v56 }
 0xdc6   :  { %1646 = vmatpush.bf16.msra.mxu1 %v3362_v57 }
 0xe2b   :  { %v1292_v44 = vpop.xlane.xlu1 %1291 }
 0xe2c   :  { %v1296_v45 = vmul.f32 %v1292_v44, %v4031_v36 }
 0xe2e   :  { %v1298_v46 = vsub.f32 %v1288_v39, %v1296_v45  ;;  %v3455_v39 = vld [vmem:[%s4472_s12 + $0x1] ss:$0 sm:$0xff] }
 0xe30   :  { %v1300_v47 = vmul.f32 %v1298_v46, %v1298_v46 }
 0xe32   :  { %v1302_v48 = vsel %vm247_vm0, %v1300_v47, 0.0 }
 0xe33   :  { %1303 = vadd.xlane.f32.xlu0 %v1302_v48  ;;  %v1295_v49 = vpop.xlane.xlu1 %1294 }
 0xe34   :  { %v1297_v18 = vmul.f32 %v1295_v49, %v4031_v36 }
 0xe36   :  { %v1299_v50 = vsub.f32 %v1289_v42, %v1297_v18 }
 0xe38   :  { %v1301_v51 = vmul.f32 %v1299_v50, %v1299_v50 }
 0xe3a   :  { %v1305_v52 = vsel %vm247_vm0, %v1301_v51, 0.0 }
 0xe3b   :  { %1306 = vadd.xlane.f32.xlu1 %v1305_v52 }
 0xea6   :  { %v1304_v53 = vpop.xlane.xlu0 %1303 }
 0xea7   :  { %v1308_v54 = vmul.f32 %v1304_v53, %v4031_v36 }
 0xea9   :  { %v1310_v55 = vadd.f32 1e-05, %v1308_v54 }
 0xeab   :  { %3520 = vrsqrt.f32 %v1310_v55  ;;  %vm1318_vm4 = vweird.f32 %v1310_v55 }
 0xeae   :  { %v1307_v58 = vpop.xlane.xlu1 %1306 }
 0xeaf   :  { %v1309_v59 = vmul.f32 %v1307_v58, %v4031_v36 }
 0xeb1   :  { %v3521_v61 = vpop.eup %3520  ;;  %v1311_v62 = vadd.f32 1e-05, %v1309_v59 }
 0xeb2   :  { %v1313_v63 = vmul.f32 %v3521_v61, %v1310_v55  ;;  %vm1319_vm3 = vweird.f32 %v3521_v61  ;;  %v3358_v55 = vld [vmem:[%s4482_s2 + $0x28] sm:$0xff] }
 0xeb3   :  { %3522 = vrsqrt.f32 %v1311_v62  ;;  %vm1320_vm5 = vmor %vm1318_vm4, %vm1319_vm3  ;;  %vm1328_vm7 = vweird.f32 %v1311_v62  ;;  %1588 = vmatpush.bf16.msra.mxu3 %v3358_v55 }
 0xeb4   :  { %v1314_v1 = vmul.f32 %v3521_v61, %v1313_v63  ;;  %v3361_v63 = vld [vmem:[%s4465_s5 + $0x20] sm:$0xff] }
 0xeb5   :  { %1647 = vmatpush.bf16.msra.mxu1 %v3361_v63 }
 0xeb6   :  { %v1315_v4 = vmul.f32 0.5, %v1314_v1 }
 0xeb8   :  { %v1316_v6 = vsub.f32 1.5, %v1315_v4 }
 0xeb9   :  { %v3523_v7 = vpop.eup %3522 }
 0xeba   :  { %v1317_v8 = vmul.f32 %v3521_v61, %v1316_v6  ;;  %v1323_v9 = vmul.f32 %v3523_v7, %v1311_v62  ;;  %vm1329_vm6 = vweird.f32 %v3523_v7  ;;  %v3359_v62 = vld [vmem:[%s4463_s3 + $0x20] sm:$0xff] }
 0xebb   :  { %vm1330_vm8 = vmor %vm1328_vm7, %vm1329_vm6  ;;  %1618 = vmatpush.bf16.msra.mxu0 %v3359_v62 }
 0xebc   :  { %v1324_v10 = vmul.f32 %v3523_v7, %v1323_v9  ;;  %v1321_v11 = vsel %vm1320_vm5, %v3521_v61, %v1317_v8  ;;  %v3357_v61 = vld [vmem:[%s4482_s2 + $0x20] sm:$0xff] }
 0xebd   :  { %v1332_v15 = vmul.f32 %v1321_v11, %v1298_v46  ;;  %1589 = vmatpush.bf16.msra.mxu3 %v3357_v61 }
 0xebe   :  { %v1325_v12 = vmul.f32 0.5, %v1324_v10 }
 0xebf   :  { %v1337_v21 = vmul.f32 %v3452_v14, %v1332_v15 }
 0xec0   :  { %v1326_v13 = vsub.f32 1.5, %v1325_v12 }
 0xec1   :  { %v1342_v24 = vadd.f32 %v3453_v20, %v1337_v21 }
 0xec2   :  { %v1327_v16 = vmul.f32 %v3523_v7, %v1326_v13 }
 0xec4   :  { %v1331_v17 = vsel %vm1330_vm8, %v3523_v7, %v1327_v16 }
 0xec5   :  { %v1333_v22 = vmul.f32 %v1331_v17, %v1299_v50  ;;  %v3456_v17 = vld [vmem:[#allocation14 + $0x1] ss:$0 sm:$0xff] }
 0xec7   :  { %v1338_v23 = vmul.f32 %v3452_v14, %v1333_v22 }
 0xec9   :  { %v1343_v25 = vadd.f32 %v3453_v20, %v1338_v23  ;;  %v3457_v23 = vld [vmem:[%s4476_s16 + $0x1] ss:$0 sm:$0xff] }
 0xecb   :  { %v1344_v26 = vpack.c.bf16 %v1343_v25, %v1342_v24 }
 0xecd   :  { %3032 = vmatmul.msk.bf16.vlgmr.msrb.gmra.mxu1 %vm247_vm0, %v1344_v26 }
 0xf4a   :  { %v1372_v31 = vpop.f32.mrf.mxu1 }
 0xf4b   :  { %v1373_v33 = vadd.f32 %v3454_v32, %v1372_v31  ;;  %v3459_v31 = vld [vmem:[#allocation8 + $0x2] ss:$0 sm:$0xff] }
 0xf4d   :  { %v1377_v2 = vmax.f32 %v1373_v33, 0.0 }
 0xf52   :  { %v1374_v34 = vpop.f32.mrf.mxu1 }
 0xf53   :  { %v1375_v35 = vadd.f32 %v3454_v32, %v1374_v34 }
 0xf55   :  { %v1378_v37 = vmax.f32 %v1375_v35, 0.0 }
 0xf57   :  { %v1379_v38 = vpack.c.bf16 %v1378_v37, %v1377_v2  ;;  %v3460_v2 = vld [vmem:[#allocation5 + $0x2] ss:$0 sm:$0xff] }
 0xf59   :  { %1439 = vmatmul.bf16.vlgmr.msrb.gmra.mxu2 %v1379_v38 }
 0xfdc   :  { %v1440_v3 = vpop.f32.mrf.mxu2 }
 0xfdd   :  { %v1441_v40 = vadd.f32 %v3455_v39, %v1440_v3 }
 0xfdf   :  { %v1445_v41 = vadd.f32 %v1441_v40, %v1342_v24 }
 0xfe1   :  { %v1447_v42 = vsel %vm247_vm0, %v1445_v41, 0.0 }
 0xfe2   :  { %1448 = vadd.xlane.f32.xlu2 %v1447_v42 }
 0xfe4   :  { %v1442_v43 = vpop.f32.mrf.mxu2 }
 0xfe5   :  { %v1443_v44 = vadd.f32 %v3455_v39, %v1442_v43 }
 0xfe7   :  { %v1446_v45 = vadd.f32 %v1443_v44, %v1343_v25 }
 0xfe9   :  { %v1450_v46 = vsel %vm247_vm0, %v1446_v45, 0.0 }
 0xfea   :  { %1451 = vadd.xlane.f32.xlu1 %v1450_v46 }
0x1055   :  { %v1449_v47 = vpop.xlane.xlu2 %1448 }
0x1056   :  { %v1453_v48 = vmul.f32 %v1449_v47, %v4031_v36 }
0x1058   :  { %v1455_v49 = vsub.f32 %v1445_v41, %v1453_v48 }
0x105a   :  { %v1457_v18 = vmul.f32 %v1455_v49, %v1455_v49 }
0x105c   :  { %v1459_v50 = vsel %vm247_vm0, %v1457_v18, 0.0 }
0x105d   :  { %v1452_v51 = vpop.xlane.xlu1 %1451  ;;  %1460 = vadd.xlane.f32.xlu1 %v1459_v50 }
0x105e   :  { %v1454_v52 = vmul.f32 %v1452_v51, %v4031_v36 }
0x1060   :  { %v1456_v19 = vsub.f32 %v1446_v45, %v1454_v52 }
0x1062   :  { %v1458_v53 = vmul.f32 %v1456_v19, %v1456_v19 }
0x1064   :  { %v1462_v54 = vsel %vm247_vm0, %v1458_v53, 0.0 }
0x1065   :  { %1463 = vadd.xlane.f32.xlu1 %v1462_v54 }
0x10d0   :  { %v1461_v58 = vpop.xlane.xlu1 %1460 }
0x10d1   :  { %v1465_v59 = vmul.f32 %v1461_v58, %v4031_v36 }
0x10d3   :  { %v1467_v60 = vadd.f32 1e-05, %v1465_v59 }
0x10d5   :  { %3524 = vrsqrt.f32 %v1467_v60  ;;  %vm1475_vm10 = vweird.f32 %v1467_v60 }
0x10d8   :  { %v1464_v0 = vpop.xlane.xlu1 %1463 }
0x10d9   :  { %v1466_v1 = vmul.f32 %v1464_v0, %v4031_v36 }
0x10db   :  { %v3525_v4 = vpop.eup %3524  ;;  %v1468_v5 = vadd.f32 1e-05, %v1466_v1 }
0x10dc   :  { %v1470_v6 = vmul.f32 %v3525_v4, %v1467_v60  ;;  %vm1476_vm9 = vweird.f32 %v3525_v4 }
0x10dd   :  { %3526 = vrsqrt.f32 %v1468_v5  ;;  %vm1477_vm11 = vmor %vm1475_vm10, %vm1476_vm9  ;;  %vm1485_vm13 = vweird.f32 %v1468_v5 }
0x10de   :  { %v1471_v7 = vmul.f32 %v3525_v4, %v1470_v6 }
0x10e0   :  { %v1472_v8 = vmul.f32 0.5, %v1471_v7 }
0x10e2   :  { %v1473_v9 = vsub.f32 1.5, %v1472_v8 }
0x10e3   :  { %v3527_v10 = vpop.eup %3526 }
0x10e4   :  { %v1474_v11 = vmul.f32 %v3525_v4, %v1473_v9  ;;  %v1480_v12 = vmul.f32 %v3527_v10, %v1468_v5  ;;  %vm1486_vm12 = vweird.f32 %v3527_v10 }
0x10e5   :  { %vm1487_vm14 = vmor %vm1485_vm13, %vm1486_vm12 }
0x10e6   :  { %v1481_v13 = vmul.f32 %v3527_v10, %v1480_v12  ;;  %v1478_v14 = vsel %vm1477_vm11, %v3525_v4, %v1474_v11 }
0x10e7   :  { %v1489_v20 = vmul.f32 %v1478_v14, %v1455_v49 }
0x10e8   :  { %v1482_v15 = vmul.f32 0.5, %v1481_v13 }
0x10e9   :  { %v1494_v24 = vmul.f32 %v3456_v17, %v1489_v20 }
0x10ea   :  { %v1483_v16 = vsub.f32 1.5, %v1482_v15 }
0x10eb   :  { %v4225_v27 = vadd.f32 %v3457_v23, %v1494_v24 }
0x10ec   :  { %v1484_v21 = vmul.f32 %v3527_v10, %v1483_v16 }
0x10ee   :  { %v1488_v22 = vsel %vm1487_vm14, %v3527_v10, %v1484_v21 }
0x10ef   :  { %v1490_v25 = vmul.f32 %v1488_v22, %v1456_v19 }
0x10f1   :  { %v1495_v26 = vmul.f32 %v3456_v17, %v1490_v25 }
0x10f3   :  { %v4227_v28 = vadd.f32 %v3457_v23, %v1495_v26 }
0x10f5   :  { %v1563_v29 = vpack.c.bf16 %v4227_v28, %v4225_v27 }
0x10f7   :  { %3112 = vmatmul.msk.bf16.vlgmr.msra.gmra.mxu3 %vm247_vm0, %v1563_v29  ;;  %3121 = vmatmul.msk.bf16.vlgmr.msra.gmra.mxu0 %vm247_vm0, %v1563_v29 }
0x10f8   :  { %3130 = vmatmul.msk.bf16.vlgmr.msra.gmra.mxu1 %vm247_vm0, %v1563_v29 }
0x1174   :  { %v1620_v32 = vpop.f32.mrf.mxu0 }
0x1175   :  { %v1621_v33 = vadd.f32 %v3458_v30, %v1620_v32  ;;  %v1649_v34 = vpop.f32.mrf.mxu1 }
0x1176   :  { %v4234_v35 = vadd.f32 %v3459_v31, %v1649_v34 }
0x1177   :  { %1776 = vrot.lane.b32.xlu0 %v1621_v33, %s3816_s13  ;;  %3131 = vmatpush.xpose.msk.msrb.mxu3 %vm323_vm1, %v1621_v33 }
0x1178   :  { %1746 = vmatpush.msrb.mxu0 %v4234_v35 }
0x117a   :  { %v1591_v37 = vpop.f32.mrf.mxu3 }
0x117b   :  { %v1592_v38 = vadd.f32 %v3460_v2, %v1591_v37 }
0x117c   :  { %v1622_v39 = vpop.f32.mrf.mxu0 }
0x117d   :  { %v1623_v3 = vadd.f32 %v3458_v30, %v1622_v39  ;;  %v1651_v40 = vpop.f32.mrf.mxu1  ;;  %3132 = vmatmul.msk.f32.vlgmr.msrb.gmra.mxu3 %vm323_vm1, %v1592_v38 }
0x117e   :  { %v1652_v41 = vadd.f32 %v3459_v31, %v1651_v40  ;;  %v3364_v31 = vld [vmem:[%s4467_s7 + $0x28] sm:$0xff] }
0x117f   :  { %1804 = vrot.lane.b32.xlu2 %v1623_v3, %s3816_s13  ;;  %3133 = vmatpush.xpose.msk.msra.mxu3 %vm323_vm1, %v1623_v3 }
0x1180   :  { %1769 = vmatpush.msrb.mxu1 %v1652_v41 }
0x1182   :  { %v1593_v42 = vpop.f32.mrf.mxu3 }
0x1183   :  { %v1594_v43 = vadd.f32 %v3460_v2, %v1593_v42  ;;  %v3363_v2 = vld [vmem:[%s4467_s7 + $0x20] sm:$0xff] }
0x1184   :  { %v3461_v42 = vld [vmem:[%s4468_s8 + $0x2] ss:$0 sm:$0xff] }
0x1185   :  { %1802 = vrot.lane.b32.xlu0 %v1594_v43, %s3816_s13  ;;  %3134 = vmatmul.msk.f32.vlgmr.msra.gmra.mxu3 %vm323_vm1, %v1594_v43 }
0x11d9   :  { %v1805_v44 = vpop.permute.xlu2 %1804 }
0x11da   :  { %3139 = vmatpush.xpose.msk.msra.mxu0 %vm323_vm1, %v1805_v44 }
0x11e9   :  { %v1777_v45 = vpop.permute.xlu0 %1776 }
0x11ea   :  { %3137 = vmatpush.xpose.msk.msrb.mxu3 %vm323_vm1, %v1777_v45 }
0x11ee   :  { %1941 = vmatpush.bf16.msra.mxu3 %v3364_v31 }
0x11f2   :  { %1942 = vmatpush.bf16.msra.mxu3 %v3363_v2  ;;  %v3368_v2 = vld [vmem:[%s4471_s11 + $0x88] sm:$0xff] }
0x11f7   :  { %v1803_v1 = vpop.permute.xlu0 %1802 }
0x1200   :  { %v1677_v46 = vpop.f32.mrf.mxu3 }
0x1201   :  { %v1706_v47 = vsel %vm376_vm2, %v1677_v46, -inf }
0x1202   :  { %1707 = vmax.xlane.f32.xlu1 %v1706_v47 }
0x1208   :  { %v1703_v48 = vpop.f32.mrf.mxu3 }
0x1209   :  { %v1709_v49 = vsel %vm376_vm2, %v1703_v48, -inf }
0x120a   :  { %1710 = vmax.xlane.f32.xlu2 %v1709_v49 }
0x1275   :  { %v1708_v18 = vpop.xlane.xlu1 %1707 }
0x1276   :  { %v1712_v50 = vsub.f32 %v1677_v46, %v1708_v18 }
0x1278   :  { %v1714_v51 = vmul.f32 1.442695, %v1712_v50 }
0x127a   :  { %3528 = vpow2.f32 %v1714_v51 }
0x127d   :  { %v1711_v52 = vpop.xlane.xlu2 %1710 }
0x127e   :  { %v1713_v19 = vsub.f32 %v1703_v48, %v1711_v52 }
0x1280   :  { %v3529_v53 = vpop.eup %3528  ;;  %v1716_v54 = vmul.f32 1.442695, %v1713_v19 }
0x1281   :  { %v1718_v55 = vsel %vm376_vm2, %v3529_v53, 0.0 }
0x1282   :  { %3530 = vpow2.f32 %v1716_v54  ;;  %1719 = vadd.xlane.f32.xlu1 %v1718_v55 }
0x1288   :  { %v3531_v56 = vpop.eup %3530 }
0x1289   :  { %v1721_v57 = vsel %vm376_vm2, %v3531_v56, 0.0 }
0x128a   :  { %1722 = vadd.xlane.f32.xlu2 %v1721_v57 }
0x129b   :  { %1774 = vrot.lane.b32.xlu1 %v1592_v38, %s3816_s13 }
0x12a2   :  { %1880 = vrot.lane.b32.xlu2 %v1652_v41, %s3816_s13 }
0x12f5   :  { %v1720_v58 = vpop.xlane.xlu1 %1719 }
0x12f6   :  { %3532 = vrcp.f32 %v1720_v58 }
0x12fc   :  { %v3533_v59 = vpop.eup %3532 }
0x12fd   :  { %v1726_v60 = vmul.f32 %v3533_v59, %v3529_v53  ;;  %v1723_v61 = vpop.xlane.xlu2 %1722 }
0x12fe   :  { %3534 = vrcp.f32 %v1723_v61  ;;  %v3365_v61 = vld [vmem:[%s4469_s9 + $0x20] sm:$0xff] }
0x12ff   :  { %3135 = vmatmul.msk.f32.vlgmr.msrb.gmra.mxu0 %vm376_vm2, %v1726_v60 }
0x1304   :  { %v3535_v62 = vpop.eup %3534 }
0x1305   :  { %v1727_v63 = vmul.f32 %v3535_v62, %v3531_v56  ;;  %v1881_v0 = vpop.permute.xlu2 %1880  ;;  %v3374_v62 = vld [vmem:[%s4471_s11 + $0xb8] sm:$0xff] }
0x1306   :  { %1901 = vmatpush.msra.mxu2 %v1881_v0 }
0x1307   :  { %3136 = vmatmul.msk.f32.vlgmr.msrb.gmra.mxu1 %vm376_vm2, %v1727_v63  ;;  %3140 = vmatmul.msk.f32.vlgmr.msra.gmra.mxu0 %vm323_vm1, %v1803_v1  ;;  %v3373_v1 = vld [vmem:[%s4471_s11 + $0xb0] sm:$0xff] }
0x130d   :  { %v1775_v4 = vpop.permute.xlu1 %1774 }
0x130e   :  { %3138 = vmatmul.msk.f32.vlgmr.msrb.gmra.mxu3 %vm323_vm1, %v1775_v4 }
0x137c   :  { %v1748_v5 = vpop.f32.mrf.mxu0 }
0x1384   :  { %v1827_v6 = vpop.f32.mrf.mxu0  ;;  %v1771_v32 = vpop.f32.mrf.mxu1 }
0x1385   :  { %v1833_v7 = vsel %vm376_vm2, %v1827_v6, -inf }
0x1386   :  { %1834 = vmax.xlane.f32.xlu0 %v1833_v7  ;;  %v3372_v7 = vld [vmem:[%s4471_s11 + $0xa8] sm:$0xff] }
0x1391   :  { %v1799_v8 = vpop.f32.mrf.mxu3 }
0x1392   :  { %v1830_v9 = vsel %vm376_vm2, %v1799_v8, -inf }
0x1393   :  { %1831 = vmax.xlane.f32.xlu1 %v1830_v9 }
0x13f9   :  { %v1835_v10 = vpop.xlane.xlu0 %1834 }
0x13fa   :  { %v1837_v11 = vsub.f32 %v1827_v6, %v1835_v10  ;;  %v3371_v10 = vld [vmem:[%s4471_s11 + $0xa0] sm:$0xff] }
0x13fc   :  { %v1840_v12 = vmul.f32 1.442695, %v1837_v11 }
0x13fe   :  { %3536 = vpow2.f32 %v1840_v12 }
0x1404   :  { %v3537_v13 = vpop.eup %3536 }
0x1405   :  { %v1845_v14 = vsel %vm376_vm2, %v3537_v13, 0.0 }
0x1406   :  { %1846 = vadd.xlane.f32.xlu0 %v1845_v14  ;;  %v1832_v15 = vpop.xlane.xlu1 %1831 }
0x1407   :  { %v1836_v16 = vsub.f32 %v1799_v8, %v1832_v15 }
0x1409   :  { %v1838_v17 = vmul.f32 1.442695, %v1836_v16 }
0x140b   :  { %3538 = vpow2.f32 %v1838_v17 }
0x1411   :  { %v3539_v20 = vpop.eup %3538 }
0x1412   :  { %v1842_v21 = vsel %vm376_vm2, %v3539_v20, 0.0 }
0x1413   :  { %1843 = vadd.xlane.f32.xlu1 %v1842_v21  ;;  %v3462_v21 = vld [vmem:[#allocation11 + $0x2] ss:$0 sm:$0xff] }
0x141a   :  { %1853 = vrot.lane.b32.xlu0 %v4234_v35, %s3816_s13 }
0x1479   :  { %v1847_v22 = vpop.xlane.xlu0 %1846 }
0x147a   :  { %3540 = vrcp.f32 %v1847_v22 }
0x1480   :  { %v3541_v23 = vpop.eup %3540 }
0x1481   :  { %v1851_v24 = vmul.f32 %v3541_v23, %v3537_v13 }
0x1483   :  { %3142 = vmatmul.msk.f32.vlgmr.msra.gmra.mxu2 %vm376_vm2, %v1851_v24 }
0x1486   :  { %v1844_v25 = vpop.xlane.xlu1 %1843 }
0x1487   :  { %3542 = vrcp.f32 %v1844_v25  ;;  %v3463_v25 = vld [vmem:[#allocation13 + $0x2] ss:$0 sm:$0xff] }
0x148c   :  { %v1854_v26 = vpop.permute.xlu0 %1853 }
0x148d   :  { %v3543_v29 = vpop.eup %3542  ;;  %1874 = vmatpush.msra.mxu1 %v1854_v26 }
0x148e   :  { %v1850_v30 = vmul.f32 %v3543_v29, %v3539_v20 }
0x148f   :  { %2092 = vmatpush.bf16.msrb.mxu1 %v3374_v62  ;;  %v3380_v62 = vld [vmem:[%s4465_s5 + $0x38] sm:$0xff] }
0x1490   :  { %3141 = vmatmul.msk.f32.vlgmr.msra.gmra.mxu1 %vm376_vm2, %v1850_v30 }
0x1493   :  { %2093 = vmatpush.bf16.msrb.mxu1 %v3373_v1 }
0x1497   :  { %2094 = vmatpush.bf16.msrb.mxu1 %v3372_v7 }
0x149b   :  { %2095 = vmatpush.bf16.msrb.mxu1 %v3371_v10 }
0x1506   :  { %v1903_v33 = vpop.f32.mrf.mxu2 }
0x150d   :  { %v1876_v34 = vpop.f32.mrf.mxu1 }
0x150e   :  { %v3423_v35 = vpack.i.bf16 %v1903_v33, %v1876_v34  ;;  %v3370_v34 = vld [vmem:[%s4471_s11 + $0x98] sm:$0xff] }
0x150f   :  { %2096 = vmatpush.bf16.msrb.mxu1 %v3370_v34 }
0x1510   :  { %3424 = vrot.lane.b32.xlu1 %v3423_v35, %s3805_s18  ;;  %v3369_v35 = vld [vmem:[%s4471_s11 + $0x90] sm:$0xff] }
0x1513   :  { %2097 = vmatpush.bf16.msrb.mxu1 %v3369_v35 }
0x1517   :  { %2098 = vmatpush.bf16.msrb.mxu1 %v3368_v2 }
0x1582   :  { %v3425_v37 = vpop.permute.xlu1 %3424 }
0x1583   :  { %v3427_v38 = vunpack.i.h.bf16 %v3425_v37  ;;  %v3426_v39 = vunpack.i.l.bf16 %v3425_v37  ;;  %v3367_v37 = vld [vmem:[%s4471_s11 + $0x80] sm:$0xff] }
0x1584   :  { %2099 = vmatpush.bf16.msrb.mxu1 %v3367_v37  ;;  %v3468_v37 = vld [vmem:[#allocation8 + $0x3] ss:$0 sm:$0xff] }
0x1585   :  { %v1915_v3 = vsel %vm323_vm1, %v1771_v32, %v3427_v38  ;;  %v1914_v40 = vsel %vm323_vm1, %v1748_v5, %v3426_v39  ;;  %v3464_v39 = vld [vmem:[#allocation10 + $0x2] ss:$0 sm:$0xff] }
0x1586   :  { %v1916_v41 = vpack.c.bf16 %v1915_v3, %v1914_v40 }
0x1588   :  { %3151 = vmatmul.msk.bf16.vlgmr.msra.gmra.mxu3 %vm247_vm0, %v1916_v41 }
0x160b   :  { %v1944_v43 = vpop.f32.mrf.mxu3 }
0x160c   :  { %v1945_v44 = vadd.f32 %v3461_v42, %v1944_v43 }
0x160e   :  { %v1949_v45 = vadd.f32 %v1945_v44, %v4225_v27 }
0x1610   :  { %v1951_v46 = vsel %vm247_vm0, %v1949_v45, 0.0 }
0x1611   :  { %1952 = vadd.xlane.f32.xlu0 %v1951_v46 }
0x1613   :  { %v1946_v47 = vpop.f32.mrf.mxu3 }
0x1614   :  { %v1947_v48 = vadd.f32 %v3461_v42, %v1946_v47 }
0x1616   :  { %v1950_v49 = vadd.f32 %v1947_v48, %v4227_v28  ;;  %v3366_v28 = vld [vmem:[%s4469_s9 + $0x28] sm:$0xff] }
0x1617   :  { %2030 = vmatpush.bf16.msrb.mxu0 %v3366_v28 }
0x1618   :  { %v1954_v18 = vsel %vm247_vm0, %v1950_v49, 0.0 }
0x1619   :  { %1955 = vadd.xlane.f32.xlu2 %v1954_v18 }
0x161b   :  { %2031 = vmatpush.bf16.msrb.mxu0 %v3365_v61  ;;  %v3378_v61 = vld [vmem:[%s4463_s3 + $0x38] sm:$0xff] }
0x161c   :  { %2278 = vmatpush.bf16.msrb.mxu3 %v3378_v61 }
0x161f   :  { %2307 = vmatpush.bf16.msra.mxu0 %v3380_v62 }
0x1684   :  { %v1953_v50 = vpop.xlane.xlu0 %1952 }
0x1685   :  { %v1957_v51 = vmul.f32 %v1953_v50, %v4031_v36 }
0x1687   :  { %v1959_v52 = vsub.f32 %v1949_v45, %v1957_v51  ;;  %v3465_v45 = vld [vmem:[%s4472_s12 + $0x2] ss:$0 sm:$0xff] }
0x1689   :  { %v1961_v19 = vmul.f32 %v1959_v52, %v1959_v52 }
0x168b   :  { %v1963_v53 = vsel %vm247_vm0, %v1961_v19, 0.0 }
0x168c   :  { %v1956_v54 = vpop.xlane.xlu2 %1955  ;;  %1964 = vadd.xlane.f32.xlu1 %v1963_v53 }
0x168d   :  { %v1958_v27 = vmul.f32 %v1956_v54, %v4031_v36 }
0x168f   :  { %v1960_v55 = vsub.f32 %v1950_v49, %v1958_v27 }
0x1691   :  { %v1962_v56 = vmul.f32 %v1960_v55, %v1960_v55 }
0x1693   :  { %v1966_v57 = vsel %vm247_vm0, %v1962_v56, 0.0 }
0x1694   :  { %1967 = vadd.xlane.f32.xlu0 %v1966_v57 }
0x16ff   :  { %v1965_v58 = vpop.xlane.xlu1 %1964 }
0x1700   :  { %v1969_v59 = vmul.f32 %v1965_v58, %v4031_v36 }
0x1702   :  { %v1971_v60 = vadd.f32 1e-05, %v1969_v59 }
0x1704   :  { %3544 = vrsqrt.f32 %v1971_v60  ;;  %vm1979_vm3 = vweird.f32 %v1971_v60 }
0x1707   :  { %v1968_v63 = vpop.xlane.xlu0 %1967 }
0x1708   :  { %v1970_v0 = vmul.f32 %v1968_v63, %v4031_v36 }
0x170a   :  { %v3545_v4 = vpop.eup %3544  ;;  %v1972_v5 = vadd.f32 1e-05, %v1970_v0 }
0x170b   :  { %v1974_v6 = vmul.f32 %v3545_v4, %v1971_v60  ;;  %vm1980_vm15 = vweird.f32 %v3545_v4  ;;  %v3376_v60 = vld [vmem:[%s4482_s2 + $0x38] sm:$0xff] }
0x170c   :  { %3546 = vrsqrt.f32 %v1972_v5  ;;  %vm1981_vm4 = vmor %vm1979_vm3, %vm1980_vm15  ;;  %vm1989_vm6 = vweird.f32 %v1972_v5  ;;  %2249 = vmatpush.bf16.msrb.mxu2 %v3376_v60 }
0x170d   :  { %v1975_v8 = vmul.f32 %v3545_v4, %v1974_v6  ;;  %v3379_v6 = vld [vmem:[%s4465_s5 + $0x30] sm:$0xff] }
0x170e   :  { %2308 = vmatpush.bf16.msra.mxu0 %v3379_v6 }
0x170f   :  { %v1976_v9 = vmul.f32 0.5, %v1975_v8 }
0x1711   :  { %v1977_v11 = vsub.f32 1.5, %v1976_v9 }
0x1712   :  { %v3547_v12 = vpop.eup %3546 }
0x1713   :  { %v1978_v13 = vmul.f32 %v3545_v4, %v1977_v11  ;;  %v1984_v14 = vmul.f32 %v3547_v12, %v1972_v5  ;;  %vm1990_vm5 = vweird.f32 %v3547_v12  ;;  %v3377_v5 = vld [vmem:[%s4463_s3 + $0x30] sm:$0xff] }
0x1714   :  { %vm1991_vm7 = vmor %vm1989_vm6, %vm1990_vm5  ;;  %2279 = vmatpush.bf16.msrb.mxu3 %v3377_v5 }
0x1715   :  { %v1985_v15 = vmul.f32 %v3547_v12, %v1984_v14  ;;  %v1982_v16 = vsel %vm1981_vm4, %v3545_v4, %v1978_v13  ;;  %v3375_v4 = vld [vmem:[%s4482_s2 + $0x30] sm:$0xff] }
0x1716   :  { %v1993_v22 = vmul.f32 %v1982_v16, %v1959_v52  ;;  %2250 = vmatpush.bf16.msrb.mxu2 %v3375_v4 }
0x1717   :  { %v1986_v17 = vmul.f32 0.5, %v1985_v15 }
0x1718   :  { %v1998_v26 = vmul.f32 %v3462_v21, %v1993_v22 }
0x1719   :  { %v1987_v20 = vsub.f32 1.5, %v1986_v17 }
0x171a   :  { %v2003_v31 = vadd.f32 %v3463_v25, %v1998_v26 }
0x171b   :  { %v1988_v23 = vmul.f32 %v3547_v12, %v1987_v20 }
0x171d   :  { %v1992_v24 = vsel %vm1991_vm7, %v3547_v12, %v1988_v23 }
0x171e   :  { %v1994_v29 = vmul.f32 %v1992_v24, %v1960_v55  ;;  %v3466_v24 = vld [vmem:[#allocation14 + $0x2] ss:$0 sm:$0xff] }
0x1720   :  { %v1999_v30 = vmul.f32 %v3462_v21, %v1994_v29 }
0x1722   :  { %v2004_v32 = vadd.f32 %v3463_v25, %v1999_v30  ;;  %v3467_v30 = vld [vmem:[%s4476_s16 + $0x2] ss:$0 sm:$0xff] }
0x1724   :  { %v2005_v33 = vpack.c.bf16 %v2004_v32, %v2003_v31 }
0x1726   :  { %3160 = vmatmul.msk.bf16.vlgmr.msrb.gmra.mxu0 %vm247_vm0, %v2005_v33 }
0x17a3   :  { %v2033_v38 = vpop.f32.mrf.mxu0 }
0x17a4   :  { %v2034_v3 = vadd.f32 %v3464_v39, %v2033_v38 }
0x17a6   :  { %v2038_v42 = vmax.f32 %v2034_v3, 0.0  ;;  %v3470_v3 = vld [vmem:[#allocation7 + $0x3] ss:$0 sm:$0xff] }
0x17ab   :  { %v2035_v40 = vpop.f32.mrf.mxu0 }
0x17ac   :  { %v2036_v41 = vadd.f32 %v3464_v39, %v2035_v40  ;;  %v3469_v40 = vld [vmem:[#allocation5 + $0x3] ss:$0 sm:$0xff] }
0x17ae   :  { %v2039_v43 = vmax.f32 %v2036_v41, 0.0 }
0x17b0   :  { %v2040_v44 = vpack.c.bf16 %v2039_v43, %v2038_v42 }
0x17b2   :  { %2100 = vmatmul.bf16.vlgmr.msrb.gmra.mxu1 %v2040_v44 }
0x182f   :  { %v2101_v46 = vpop.f32.mrf.mxu1 }
0x1830   :  { %v2102_v47 = vadd.f32 %v3465_v45, %v2101_v46 }
0x1832   :  { %v2106_v48 = vadd.f32 %v2102_v47, %v2003_v31 }
0x1834   :  { %v2108_v49 = vsel %vm247_vm0, %v2106_v48, 0.0 }
0x1835   :  { %2109 = vadd.xlane.f32.xlu2 %v2108_v49 }
0x1837   :  { %v2103_v18 = vpop.f32.mrf.mxu1 }
0x1838   :  { %v2104_v50 = vadd.f32 %v3465_v45, %v2103_v18 }
0x183a   :  { %v2107_v51 = vadd.f32 %v2104_v50, %v2004_v32 }
0x183c   :  { %v2111_v52 = vsel %vm247_vm0, %v2107_v51, 0.0 }
0x183d   :  { %2112 = vadd.xlane.f32.xlu0 %v2111_v52 }
0x18a8   :  { %v2110_v19 = vpop.xlane.xlu2 %2109 }
0x18a9   :  { %v2114_v53 = vmul.f32 %v2110_v19, %v4031_v36 }
0x18ab   :  { %v2116_v54 = vsub.f32 %v2106_v48, %v2114_v53 }
0x18ad   :  { %v2118_v27 = vmul.f32 %v2116_v54, %v2116_v54 }
0x18af   :  { %v2120_v55 = vsel %vm247_vm0, %v2118_v27, 0.0 }
0x18b0   :  { %v2113_v56 = vpop.xlane.xlu0 %2112  ;;  %2121 = vadd.xlane.f32.xlu1 %v2120_v55 }
0x18b1   :  { %v2115_v57 = vmul.f32 %v2113_v56, %v4031_v36 }
0x18b3   :  { %v2117_v28 = vsub.f32 %v2107_v51, %v2115_v57 }
0x18b5   :  { %v2119_v58 = vmul.f32 %v2117_v28, %v2117_v28 }
0x18b7   :  { %v2123_v59 = vsel %vm247_vm0, %v2119_v58, 0.0 }
0x18b8   :  { %2124 = vadd.xlane.f32.xlu2 %v2123_v59 }
0x1923   :  { %v2122_v63 = vpop.xlane.xlu1 %2121 }
0x1924   :  { %v2126_v0 = vmul.f32 %v2122_v63, %v4031_v36 }
0x1926   :  { %v2128_v1 = vadd.f32 1e-05, %v2126_v0 }
0x1928   :  { %3548 = vrsqrt.f32 %v2128_v1  ;;  %vm2136_vm9 = vweird.f32 %v2128_v1 }
0x192b   :  { %v2125_v7 = vpop.xlane.xlu2 %2124 }
0x192c   :  { %v2127_v8 = vmul.f32 %v2125_v7, %v4031_v36 }
0x192e   :  { %v3549_v9 = vpop.eup %3548  ;;  %v2129_v10 = vadd.f32 1e-05, %v2127_v8 }
0x192f   :  { %v2131_v11 = vmul.f32 %v3549_v9, %v2128_v1  ;;  %vm2137_vm8 = vweird.f32 %v3549_v9 }
0x1930   :  { %3550 = vrsqrt.f32 %v2129_v10  ;;  %vm2138_vm10 = vmor %vm2136_vm9, %vm2137_vm8  ;;  %vm2146_vm12 = vweird.f32 %v2129_v10 }
0x1931   :  { %v2132_v12 = vmul.f32 %v3549_v9, %v2131_v11 }
0x1933   :  { %v2133_v13 = vmul.f32 0.5, %v2132_v12 }
0x1935   :  { %v2134_v14 = vsub.f32 1.5, %v2133_v13 }
0x1936   :  { %v3551_v15 = vpop.eup %3550 }
0x1937   :  { %v2135_v16 = vmul.f32 %v3549_v9, %v2134_v14  ;;  %v2141_v17 = vmul.f32 %v3551_v15, %v2129_v10  ;;  %vm2147_vm11 = vweird.f32 %v3551_v15 }
0x1938   :  { %vm2148_vm13 = vmor %vm2146_vm12, %vm2147_vm11 }
0x1939   :  { %v2142_v20 = vmul.f32 %v3551_v15, %v2141_v17  ;;  %v2139_v21 = vsel %vm2138_vm10, %v3549_v9, %v2135_v16 }
0x193a   :  { %v2150_v25 = vmul.f32 %v2139_v21, %v2116_v54 }
0x193b   :  { %v2143_v22 = vmul.f32 0.5, %v2142_v20 }
0x193c   :  { %v2155_v31 = vmul.f32 %v3466_v24, %v2150_v25 }
0x193d   :  { %v2144_v23 = vsub.f32 1.5, %v2143_v22 }
0x193e   :  { %v4350_v34 = vadd.f32 %v3467_v30, %v2155_v31 }
0x193f   :  { %v2145_v26 = vmul.f32 %v3551_v15, %v2144_v23 }
0x1941   :  { %v2149_v29 = vsel %vm2148_vm13, %v3551_v15, %v2145_v26 }
0x1942   :  { %v2151_v32 = vmul.f32 %v2149_v29, %v2117_v28 }
0x1944   :  { %v2156_v33 = vmul.f32 %v3466_v24, %v2151_v32 }
0x1946   :  { %v4352_v35 = vadd.f32 %v3467_v30, %v2156_v33 }
0x1948   :  { %v2224_v2 = vpack.c.bf16 %v4352_v35, %v4350_v34 }
0x194a   :  { %3240 = vmatmul.msk.bf16.vlgmr.msrb.gmra.mxu2 %vm247_vm0, %v2224_v2  ;;  %3249 = vmatmul.msk.bf16.vlgmr.msrb.gmra.mxu3 %vm247_vm0, %v2224_v2 }
0x194b   :  { %3258 = vmatmul.msk.bf16.vlgmr.msra.gmra.mxu0 %vm247_vm0, %v2224_v2 }
0x19c8   :  { %v2310_v38 = vpop.f32.mrf.mxu0 }
0x19c9   :  { %v2311_v39 = vadd.f32 %v3468_v37, %v2310_v38 }
0x19cb   :  { %2407 = vmatpush.msra.mxu3 %v2311_v39 }
0x19cd   :  { %v2252_v41 = vpop.f32.mrf.mxu2  ;;  %v2281_v42 = vpop.f32.mrf.mxu3 }
0x19ce   :  { %v2282_v43 = vadd.f32 %v3470_v3, %v2281_v42  ;;  %v2253_v45 = vadd.f32 %v3469_v40, %v2252_v41 }
0x19d0   :  { %v2312_v44 = vpop.f32.mrf.mxu0  ;;  %2437 = vrot.lane.b32.xlu2 %v2282_v43, %s3816_s13  ;;  %3259 = vmatpush.xpose.msk.msra.mxu2 %vm323_vm1, %v2282_v43 }
0x19d1   :  { %v2313_v46 = vadd.f32 %v3468_v37, %v2312_v44  ;;  %v3381_v44 = vld [vmem:[%s4467_s7 + $0x30] sm:$0xff] }
0x19d3   :  { %v3428_v47 = vpack.i.bf16 %v2313_v46, %v2311_v39  ;;  %2430 = vmatpush.msrb.mxu0 %v2313_v46  ;;  %3260 = vmatmul.msk.f32.vlgmr.msra.gmra.mxu2 %vm323_vm1, %v2253_v45 }
0x19d5   :  { %v2254_v48 = vpop.f32.mrf.mxu2  ;;  %v2283_v49 = vpop.f32.mrf.mxu3 }
0x19d6   :  { %v2255_v18 = vadd.f32 %v3469_v40, %v2254_v48  ;;  %v2284_v50 = vadd.f32 %v3470_v3, %v2283_v49  ;;  %v3382_v3 = vld [vmem:[%s4467_s7 + $0x38] sm:$0xff] }
0x19d8   :  { %3261 = vmatpush.xpose.msk.msrb.mxu2 %vm323_vm1, %v2284_v50  ;;  %2463 = vrot.lane.b32.xlu2 %v2255_v18, %s3816_s13 }
0x19db   :  { %3262 = vmatmul.msk.f32.vlgmr.msrb.gmra.mxu2 %vm323_vm1, %v2255_v18 }
0x1a2a   :  { %v2438_v51 = vpop.permute.xlu2 %2437 }
0x1a2b   :  { %3265 = vmatpush.xpose.msk.msra.mxu2 %vm323_vm1, %v2438_v51 }
0x1a2f   :  { %2602 = vmatpush.bf16.msrb.mxu2 %v3382_v3 }
0x1a32   :  { %v2464_v5 = vpop.permute.xlu2 %2463 }
0x1a33   :  { %2603 = vmatpush.bf16.msrb.mxu2 %v3381_v44  ;;  %v3386_v44 = vld [vmem:[%s4471_s11 + $0xc8] sm:$0xff] }
0x1a56   :  { %v2338_v52 = vpop.f32.mrf.mxu2 }
0x1a57   :  { %v2367_v19 = vsel %vm376_vm2, %v2338_v52, -inf }
0x1a58   :  { %2368 = vmax.xlane.f32.xlu0 %v2367_v19 }
0x1a5e   :  { %v2364_v53 = vpop.f32.mrf.mxu2 }
0x1a5f   :  { %v2370_v54 = vsel %vm376_vm2, %v2364_v53, -inf }
0x1a6c   :  { %2465 = vrot.lane.b32.xlu0 %v2284_v50, %s3816_s13  ;;  %v3471_v50 = vld [vmem:[%s4468_s8 + $0x3] ss:$0 sm:$0xff]  ;;  %s2831_s8 = sshll.u32 %s4477_s17, 4  ;;  %s2832_s8 = int_to_ptr.hbm [resolvable:$true] %s2831_s8 }
0x1a96   :  { %2371 = vmax.xlane.f32.xlu0 %v2370_v54 }
0x1acb   :  { %v2369_v27 = vpop.xlane.xlu0 %2368 }
0x1acc   :  { %v2373_v55 = vsub.f32 %v2338_v52, %v2369_v27 }
0x1ace   :  { %v2375_v56 = vmul.f32 1.442695, %v2373_v55 }
0x1ad0   :  { %3552 = vpow2.f32 %v2375_v56 }
0x1ad6   :  { %v3553_v57 = vpop.eup %3552 }
0x1ad7   :  { %v2379_v28 = vsel %vm376_vm2, %v3553_v57, 0.0 }
0x1ad8   :  { %2380 = vadd.xlane.f32.xlu1 %v2379_v28 }
0x1ade   :  { %v2466_v58 = vpop.permute.xlu0 %2465 }
0x1adf   :  { %3267 = vmatpush.xpose.msk.msrb.mxu3 %vm323_vm1, %v2466_v58 }
0x1af1   :  { %2435 = vrot.lane.b32.xlu1 %v2253_v45, %s3816_s13 }
0x1b09   :  { %v2372_v59 = vpop.xlane.xlu0 %2371 }
0x1b0a   :  { %v2374_v60 = vsub.f32 %v2364_v53, %v2372_v59 }
0x1b0c   :  { %v2377_v61 = vmul.f32 1.442695, %v2374_v60 }
0x1b0e   :  { %3554 = vpow2.f32 %v2377_v61 }
0x1b14   :  { %v3555_v62 = vpop.eup %3554 }
0x1b15   :  { %v2382_v63 = vsel %vm376_vm2, %v3555_v62, 0.0 }
0x1b16   :  { %2383 = vadd.xlane.f32.xlu0 %v2382_v63 }
0x1b2a   :  { %3429 = vrot.lane.b32.xlu0 %v3428_v47, %s3816_s13 }
0x1b4b   :  { %v2381_v0 = vpop.xlane.xlu1 %2380 }
0x1b4c   :  { %3556 = vrcp.f32 %v2381_v0 }
0x1b52   :  { %v3557_v1 = vpop.eup %3556 }
0x1b53   :  { %v2387_v4 = vmul.f32 %v3557_v1, %v3553_v57 }
0x1b55   :  { %3263 = vmatmul.msk.f32.vlgmr.msra.gmra.mxu3 %vm376_vm2, %v2387_v4 }
0x1b5d   :  { %3268 = vmatmul.msk.f32.vlgmr.msrb.gmra.mxu3 %vm323_vm1, %v2464_v5 }
0x1b63   :  { %v2436_v6 = vpop.permute.xlu1 %2435 }
0x1b64   :  { %3266 = vmatmul.msk.f32.vlgmr.msra.gmra.mxu2 %vm323_vm1, %v2436_v6  ;;  %v3383_v6 = vld [vmem:[%s4469_s9 + $0x30] sm:$0xff] }
0x1b89   :  { %v2384_v7 = vpop.xlane.xlu0 %2383 }
0x1b8a   :  { %3558 = vrcp.f32 %v2384_v7  ;;  %v3392_v7 = vld [vmem:[%s4471_s11 + $0xf8] sm:$0xff] }
0x1b90   :  { %v3559_v8 = vpop.eup %3558 }
0x1b91   :  { %v2388_v9 = vmul.f32 %v3559_v8, %v3555_v62 }
0x1b93   :  { %3264 = vmatmul.msk.f32.vlgmr.msrb.gmra.mxu0 %vm376_vm2, %v2388_v9 }
0x1b9c   :  { %v3430_v10 = vpop.permute.xlu0 %3429 }
0x1b9d   :  { %v3432_v11 = vunpack.i.h.bf16 %v3430_v10  ;;  %v3431_v12 = vunpack.i.l.bf16 %v3430_v10  ;;  %v3391_v10 = vld [vmem:[%s4471_s11 + $0xf0] sm:$0xff] }
0x1b9f   :  { %2535 = vmatpush.msra.mxu0 %v3431_v12  ;;  %2562 = vmatpush.msra.mxu1 %v3432_v11 }
0x1ba1   :  { %2753 = vmatpush.bf16.msrb.mxu0 %v3392_v7 }
0x1ba5   :  { %2754 = vmatpush.bf16.msrb.mxu0 %v3391_v10 }
0x1bd8   :  { %v2409_v13 = vpop.f32.mrf.mxu3 }
0x1be0   :  { %v2488_v14 = vpop.f32.mrf.mxu3 }
0x1be1   :  { %v2494_v15 = vsel %vm376_vm2, %v2488_v14, -inf }
0x1be2   :  { %2495 = vmax.xlane.f32.xlu1 %v2494_v15 }
0x1be7   :  { %v2460_v16 = vpop.f32.mrf.mxu2 }
0x1be8   :  { %v2491_v17 = vsel %vm376_vm2, %v2460_v16, -inf }
0x1be9   :  { %2492 = vmax.xlane.f32.xlu2 %v2491_v17  ;;  %v3389_v17 = vld [vmem:[%s4471_s11 + $0xe0] sm:$0xff] }
0x1c10   :  { %v2432_v40 = vpop.f32.mrf.mxu0 }
0x1c55   :  { %v2496_v20 = vpop.xlane.xlu1 %2495 }
0x1c56   :  { %v2498_v21 = vsub.f32 %v2488_v14, %v2496_v20  ;;  %v3390_v14 = vld [vmem:[%s4471_s11 + $0xe8] sm:$0xff] }
0x1c57   :  { %2755 = vmatpush.bf16.msrb.mxu0 %v3390_v14 }
0x1c58   :  { %v2501_v22 = vmul.f32 1.442695, %v2498_v21 }
0x1c5a   :  { %3560 = vpow2.f32 %v2501_v22 }
0x1c5b   :  { %2756 = vmatpush.bf16.msrb.mxu0 %v3389_v17 }
0x1c5c   :  { %v2493_v23 = vpop.xlane.xlu2 %2492 }
0x1c5d   :  { %v2497_v24 = vsub.f32 %v2460_v16, %v2493_v23 }
0x1c5f   :  { %v2499_v25 = vmul.f32 1.442695, %v2497_v24 }
0x1c60   :  { %v3561_v26 = vpop.eup %3560 }
0x1c61   :  { %3562 = vpow2.f32 %v2499_v25  ;;  %v2506_v29 = vsel %vm376_vm2, %v3561_v26, 0.0 }
0x1c62   :  { %2507 = vadd.xlane.f32.xlu1 %v2506_v29 }
0x1c67   :  { %v3563_v30 = vpop.eup %3562 }
0x1c68   :  { %v2503_v31 = vsel %vm376_vm2, %v3563_v30, 0.0 }
0x1c69   :  { %2504 = vadd.xlane.f32.xlu2 %v2503_v31 }
0x1cd5   :  { %v2508_v32 = vpop.xlane.xlu1 %2507 }
0x1cd6   :  { %3564 = vrcp.f32 %v2508_v32 }
0x1cdc   :  { %v3565_v33 = vpop.eup %3564  ;;  %v2505_v2 = vpop.xlane.xlu2 %2504 }
0x1cdd   :  { %v2512_v37 = vmul.f32 %v3565_v33, %v3561_v26  ;;  %3566 = vrcp.f32 %v2505_v2  ;;  %v3473_v2 = vld [vmem:[#allocation13 + $0x3] ss:$0 sm:$0xff] }
0x1cdf   :  { %3270 = vmatmul.msk.f32.vlgmr.msra.gmra.mxu1 %vm376_vm2, %v2512_v37 }
0x1ce3   :  { %v3567_v38 = vpop.eup %3566 }
0x1ce4   :  { %v2511_v39 = vmul.f32 %v3567_v38, %v3563_v30  ;;  %v3472_v30 = vld [vmem:[#allocation11 + $0x3] ss:$0 sm:$0xff] }
0x1ce6   :  { %3269 = vmatmul.msk.f32.vlgmr.msra.gmra.mxu0 %vm376_vm2, %v2511_v39 }
0x1d5c   :  { %v2564_v41 = vpop.f32.mrf.mxu1 }
0x1d63   :  { %v2537_v42 = vpop.f32.mrf.mxu0 }
0x1d64   :  { %v3433_v43 = vpack.i.bf16 %v2564_v41, %v2537_v42  ;;  %v3388_v42 = vld [vmem:[%s4471_s11 + $0xd8] sm:$0xff] }
0x1d65   :  { %2757 = vmatpush.bf16.msrb.mxu0 %v3388_v42 }
0x1d66   :  { %3434 = vrot.lane.b32.xlu2 %v3433_v43, %s3805_s18  ;;  %v3387_v43 = vld [vmem:[%s4471_s11 + $0xd0] sm:$0xff] }
0x1d69   :  { %2758 = vmatpush.bf16.msrb.mxu0 %v3387_v43 }
0x1d6d   :  { %2759 = vmatpush.bf16.msrb.mxu0 %v3386_v44 }
0x1dc0   :  { %v3435_v45 = vpop.permute.xlu2 %3434 }
0x1dc1   :  { %v3437_v46 = vunpack.i.h.bf16 %v3435_v45  ;;  %v3436_v47 = vunpack.i.l.bf16 %v3435_v45  ;;  %v3385_v45 = vld [vmem:[%s4471_s11 + $0xc0] sm:$0xff] }
0x1dc2   :  { %2760 = vmatpush.bf16.msrb.mxu0 %v3385_v45 }
0x1dc3   :  { %v2576_v48 = vsel %vm323_vm1, %v2432_v40, %v3437_v46  ;;  %v2575_v49 = vsel %vm323_vm1, %v2409_v13, %v3436_v47  ;;  %v3474_v47 = vld [vmem:[#allocation10 + $0x3] ss:$0 sm:$0xff] }
0x1dc4   :  { %v2577_v18 = vpack.c.bf16 %v2576_v48, %v2575_v49 }
0x1dc6   :  { %3279 = vmatmul.msk.bf16.vlgmr.msrb.gmra.mxu2 %vm247_vm0, %v2577_v18 }
0x1e49   :  { %v2605_v51 = vpop.f32.mrf.mxu2 }
0x1e4a   :  { %v2606_v52 = vadd.f32 %v3471_v50, %v2605_v51 }
0x1e4c   :  { %v2610_v19 = vadd.f32 %v2606_v52, %v4350_v34 }
0x1e4e   :  { %v2612_v53 = vsel %vm247_vm0, %v2610_v19, 0.0 }
0x1e4f   :  { %2613 = vadd.xlane.f32.xlu1 %v2612_v53 }
0x1e51   :  { %v2607_v54 = vpop.f32.mrf.mxu2 }
0x1e52   :  { %v2608_v27 = vadd.f32 %v3471_v50, %v2607_v54 }
0x1e54   :  { %v2611_v55 = vadd.f32 %v2608_v27, %v4352_v35  ;;  %v3384_v35 = vld [vmem:[%s4469_s9 + $0x38] sm:$0xff] }
0x1e55   :  { %2691 = vmatpush.bf16.msra.mxu3 %v3384_v35 }
0x1e56   :  { %v2615_v56 = vsel %vm247_vm0, %v2611_v55, 0.0 }
0x1e57   :  { %2616 = vadd.xlane.f32.xlu1 %v2615_v56 }
0x1e59   :  { %2692 = vmatpush.bf16.msra.mxu3 %v3383_v6 }
0x1ec2   :  { %v2614_v57 = vpop.xlane.xlu1 %2613 }
0x1ec3   :  { %v2618_v28 = vmul.f32 %v2614_v57, %v4031_v36 }
0x1ec5   :  { %v2620_v58 = vsub.f32 %v2610_v19, %v2618_v28  ;;  %v3475_v19 = vld [vmem:[%s4472_s12 + $0x3] ss:$0 sm:$0xff] }
0x1ec7   :  { %v2622_v59 = vmul.f32 %v2620_v58, %v2620_v58 }
0x1ec9   :  { %v2624_v60 = vsel %vm247_vm0, %v2622_v59, 0.0 }
0x1eca   :  { %2625 = vadd.xlane.f32.xlu0 %v2624_v60  ;;  %v2617_v61 = vpop.xlane.xlu1 %2616 }
0x1ecb   :  { %v2619_v34 = vmul.f32 %v2617_v61, %v4031_v36 }
0x1ecd   :  { %v2621_v62 = vsub.f32 %v2611_v55, %v2619_v34 }
0x1ecf   :  { %v2623_v63 = vmul.f32 %v2621_v62, %v2621_v62 }
0x1ed1   :  { %v2627_v0 = vsel %vm247_vm0, %v2623_v63, 0.0 }
0x1ed2   :  { %2628 = vadd.xlane.f32.xlu1 %v2627_v0 }
0x1f3d   :  { %v2626_v1 = vpop.xlane.xlu0 %2625 }
0x1f3e   :  { %v2630_v4 = vmul.f32 %v2626_v1, %v4031_v36 }
0x1f40   :  { %v2632_v5 = vadd.f32 1e-05, %v2630_v4 }
0x1f42   :  { %3568 = vrsqrt.f32 %v2632_v5  ;;  %vm2640_vm2 = vweird.f32 %v2632_v5 }
0x1f45   :  { %v2629_v8 = vpop.xlane.xlu1 %2628 }
0x1f46   :  { %v2631_v9 = vmul.f32 %v2629_v8, %v4031_v36 }
0x1f48   :  { %v3569_v11 = vpop.eup %3568  ;;  %v2633_v12 = vadd.f32 1e-05, %v2631_v9 }
0x1f49   :  { %v2635_v13 = vmul.f32 %v3569_v11, %v2632_v5  ;;  %vm2641_vm1 = vweird.f32 %v3569_v11 }
0x1f4a   :  { %3570 = vrsqrt.f32 %v2633_v12  ;;  %vm2642_vm14 = vmor %vm2640_vm2, %vm2641_vm1  ;;  %vm2650_vm3 = vweird.f32 %v2633_v12 }
0x1f4b   :  { %v2636_v15 = vmul.f32 %v3569_v11, %v2635_v13 }
0x1f4d   :  { %v2637_v16 = vmul.f32 0.5, %v2636_v15 }
0x1f4f   :  { %v2638_v20 = vsub.f32 1.5, %v2637_v16 }
0x1f50   :  { %v3571_v21 = vpop.eup %3570 }
0x1f51   :  { %v2639_v22 = vmul.f32 %v3569_v11, %v2638_v20  ;;  %v2645_v23 = vmul.f32 %v3571_v21, %v2633_v12  ;;  %vm2651_vm15 = vweird.f32 %v3571_v21 }
0x1f52   :  { %vm2652_vm4 = vmor %vm2650_vm3, %vm2651_vm15 }
0x1f53   :  { %v2646_v24 = vmul.f32 %v3571_v21, %v2645_v23  ;;  %v2643_v25 = vsel %vm2642_vm14, %v3569_v11, %v2639_v22 }
0x1f54   :  { %v2654_v31 = vmul.f32 %v2643_v25, %v2620_v58 }
0x1f55   :  { %v2647_v26 = vmul.f32 0.5, %v2646_v24 }
0x1f56   :  { %v2659_v37 = vmul.f32 %v3472_v30, %v2654_v31 }
0x1f57   :  { %v2648_v29 = vsub.f32 1.5, %v2647_v26 }
0x1f58   :  { %v2664_v3 = vadd.f32 %v3473_v2, %v2659_v37 }
0x1f59   :  { %v2649_v32 = vmul.f32 %v3571_v21, %v2648_v29 }
0x1f5b   :  { %v2653_v33 = vsel %vm2652_vm4, %v3571_v21, %v2649_v32  ;;  %v3476_v21 = vld [vmem:[#allocation14 + $0x3] ss:$0 sm:$0xff] }
0x1f5c   :  { %v2655_v38 = vmul.f32 %v2653_v33, %v2621_v62 }
0x1f5e   :  { %v2660_v39 = vmul.f32 %v3472_v30, %v2655_v38 }
0x1f60   :  { %v2665_v40 = vadd.f32 %v3473_v2, %v2660_v39 }
0x1f62   :  { %v2666_v41 = vpack.c.bf16 %v2665_v40, %v2664_v3 }
0x1f64   :  { %3288 = vmatmul.msk.bf16.vlgmr.msra.gmra.mxu3 %vm247_vm0, %v2666_v41 }
0x1fe7   :  { %v2694_v46 = vpop.f32.mrf.mxu3 }
0x1fe8   :  { %v2695_v48 = vadd.f32 %v3474_v47, %v2694_v46 }
0x1fea   :  { %v2699_v50 = vmax.f32 %v2695_v48, 0.0 }
0x1fef   :  { %v2696_v49 = vpop.f32.mrf.mxu3 }
0x1ff0   :  { %v2697_v18 = vadd.f32 %v3474_v47, %v2696_v49 }
0x1ff2   :  { %v2700_v51 = vmax.f32 %v2697_v18, 0.0 }
0x1ff4   :  { %v2701_v52 = vpack.c.bf16 %v2700_v51, %v2699_v50 }
0x1ff6   :  { %2761 = vmatmul.bf16.vlgmr.msrb.gmra.mxu0 %v2701_v52 }
0x2073   :  { %v2762_v53 = vpop.f32.mrf.mxu0 }
0x2074   :  { %v2763_v54 = vadd.f32 %v3475_v19, %v2762_v53 }
0x2076   :  { %v2767_v27 = vadd.f32 %v2763_v54, %v2664_v3 }
0x2078   :  { %v2769_v55 = vsel %vm247_vm0, %v2767_v27, 0.0 }
0x2079   :  { %2770 = vadd.xlane.f32.xlu2 %v2769_v55 }
0x207b   :  { %v2764_v56 = vpop.f32.mrf.mxu0 }
0x207c   :  { %v2765_v57 = vadd.f32 %v3475_v19, %v2764_v56 }
0x207e   :  { %v2768_v28 = vadd.f32 %v2765_v57, %v2665_v40 }
0x2080   :  { %v2772_v58 = vsel %vm247_vm0, %v2768_v28, 0.0 }
0x2081   :  { %2773 = vadd.xlane.f32.xlu1 %v2772_v58 }
0x20ec   :  { %v2771_v59 = vpop.xlane.xlu2 %2770 }
0x20ed   :  { %v2775_v60 = vmul.f32 %v2771_v59, %v4031_v36 }
0x20ef   :  { %v2777_v61 = vsub.f32 %v2767_v27, %v2775_v60 }
0x20f1   :  { %v2779_v34 = vmul.f32 %v2777_v61, %v2777_v61 }
0x20f3   :  { %v2781_v62 = vsel %vm247_vm0, %v2779_v34, 0.0 }
0x20f4   :  { %v2774_v63 = vpop.xlane.xlu1 %2773  ;;  %2782 = vadd.xlane.f32.xlu1 %v2781_v62 }
0x20f5   :  { %v2776_v0 = vmul.f32 %v2774_v63, %v4031_v36 }
0x20f7   :  { %v2778_v35 = vsub.f32 %v2768_v28, %v2776_v0 }
0x20f9   :  { %v2780_v1 = vmul.f32 %v2778_v35, %v2778_v35 }
0x20fb   :  { %v2784_v4 = vsel %vm247_vm0, %v2780_v1, 0.0 }
0x20fc   :  { %2785 = vadd.xlane.f32.xlu1 %v2784_v4 }
0x2167   :  { %v2783_v5 = vpop.xlane.xlu1 %2782 }
0x2168   :  { %v2787_v6 = vmul.f32 %v2783_v5, %v4031_v36 }
0x216a   :  { %v2789_v7 = vadd.f32 1e-05, %v2787_v6 }
0x216c   :  { %3572 = vrsqrt.f32 %v2789_v7  ;;  %vm2797_vm6 = vweird.f32 %v2789_v7 }
0x216f   :  { %v2786_v8 = vpop.xlane.xlu1 %2785 }
0x2170   :  { %v2788_v9 = vmul.f32 %v2786_v8, %v4031_v36  ;;  %v3477_v36 = vld [vmem:[%s4476_s16 + $0x3] ss:$0 sm:$0xff] }
0x2172   :  { %v3573_v10 = vpop.eup %3572  ;;  %v2790_v11 = vadd.f32 1e-05, %v2788_v9 }
0x2173   :  { %v2792_v12 = vmul.f32 %v3573_v10, %v2789_v7  ;;  %vm2798_vm5 = vweird.f32 %v3573_v10 }
0x2174   :  { %3574 = vrsqrt.f32 %v2790_v11  ;;  %vm2799_vm7 = vmor %vm2797_vm6, %vm2798_vm5  ;;  %vm2807_vm9 = vweird.f32 %v2790_v11 }
0x2175   :  { %v2793_v13 = vmul.f32 %v3573_v10, %v2792_v12 }
0x2177   :  { %v2794_v14 = vmul.f32 0.5, %v2793_v13 }
0x2179   :  { %v2795_v15 = vsub.f32 1.5, %v2794_v14 }
0x217a   :  { %v3575_v16 = vpop.eup %3574 }
0x217b   :  { %v2796_v17 = vmul.f32 %v3573_v10, %v2795_v15  ;;  %v2802_v20 = vmul.f32 %v3575_v16, %v2790_v11  ;;  %vm2808_vm8 = vweird.f32 %v3575_v16 }
0x217c   :  { %vm2809_vm10 = vmor %vm2807_vm9, %vm2808_vm8 }
0x217d   :  { %v2800_v22 = vsel %vm2799_vm7, %v3573_v10, %v2796_v17  ;;  %v2803_v23 = vmul.f32 %v3575_v16, %v2802_v20 }
0x217e   :  { %v2811_v24 = vmul.f32 %v2800_v22, %v2777_v61 }
0x217f   :  { %v2804_v25 = vmul.f32 0.5, %v2803_v23 }
0x2180   :  { %v2816_v26 = vmul.f32 %v3476_v21, %v2811_v24 }
0x2181   :  { %v2805_v29 = vsub.f32 1.5, %v2804_v25 }
0x2182   :  { %v2821_v30 = vadd.f32 %v3477_v36, %v2816_v26 }
0x2183   :  { %v2806_v31 = vmul.f32 %v3575_v16, %v2805_v29 }
0x2184   :  { %2823 = vst.msk [vmem:[#allocation16] sm:$0xff] %vm247_vm0, %v2821_v30 }
0x2185   :  { %v2810_v32 = vsel %vm2809_vm10, %v3575_v16, %v2806_v31 }
0x2186   :  { %v2812_v33 = vmul.f32 %v2810_v32, %v2778_v35 }
0x2188   :  { %v2817_v2 = vmul.f32 %v3476_v21, %v2812_v33 }
0x218a   :  { %v2822_v37 = vadd.f32 %v3477_v36, %v2817_v2 }
0x218c   :  { %2824 = vst.msk [vmem:[#allocation16 + $0x8] sm:$0xff] %vm247_vm0, %v2822_v37 }
0x218d   :  { %2837 = dma.vmem_to_hbm [thread:$0]  %s2830_s6, 256, %s2832_s8, [#allocation4], %s3810_s28, %s3810_s28, %s3811_s0  }
0x218e   :  { %3802 = dma.done.wait [#allocation4], 256  }
0x218f   :  { %3803 = vsyncadd [#allocation4], 4294967040 }
0x2190   :  { %2842 = vsyncpa [#allocation3], 1 }
0x2191   :  { %2843 = vsyncpa [#allocation6], 1 }
0x2192   :  { %2844 = vsyncpa [#allocation9], 1 }
0x2193   :  { %2845 = vsyncpa [#allocation12], 1 }
0x2194   :  { %2846 = vsyncpa [#allocation15], 1 }
0x2195   :  { %2847 = vsyncpa [#allocation4], 1 }

</bundles_post_ra>
